<compile_context>
chip_gen: v7x
topology: tpu7x:2x2x1
jax: 0.10.0
libtpu: 0.0.40
codegen_flags: <defaults>
</compile_context>

<pallas_src>
import functools

import jax
import jax.numpy as jnp
from jax.experimental import pallas as pl
from jax.experimental.pallas import tpu as pltpu

# ----------------------------- small synthetic config -----------------------------
VOCAB = 64       # vocab size (synthetic)
MAX_POS = 32     # max position embeddings
B = 2            # batch
S = 16           # sequence length
H = 64           # hidden size
NH = 4           # attention heads
DH = H // NH     # head dim
INTER = 128      # intermediate (FFN) size
LAYERS = 2       # number of encoder layers
EPS = 1e-7       # DeBERTa layer_norm_eps


def _concat0(blocks):
    return blocks[0] if len(blocks) == 1 else jnp.concatenate(blocks, axis=0)


def _gelu(x):
    # tanh-approximate GELU (see TODO above).
    c = 0.7978845608028654  # sqrt(2/pi)
    return 0.5 * x * (1.0 + jnp.tanh(c * (x + 0.044715 * x * x * x)))


def _layernorm(x, g, b):
    mu = jnp.mean(x, axis=-1, keepdims=True)
    var = jnp.mean((x - mu) ** 2, axis=-1, keepdims=True)
    return (x - mu) * jax.lax.rsqrt(var + EPS) * g + b


# --------------------------- single fused forward kernel ---------------------------
def _deberta_fused_kernel(
        ids_ref, mask_ref, maskc_ref, wemb_ref, pemb_ref, emb_g_ref, emb_b_ref,
        wqkv_ref, bqkv_ref, wo_ref, bo_ref, ln1g_ref, ln1b_ref,
        wi_ref, bi_ref, wo2_ref, bo2_ref, ln2g_ref, ln2b_ref,
        poolw_ref, poolb_ref, out_ref, *, nb):
    """Embeddings -> encoder -> pooler for `nb` batch rows, all in VMEM/vregs."""
    f32 = jnp.float32
    bf16 = jnp.bfloat16
    rows = nb * S

    # ---- embeddings: in-kernel token gather via one-hot matmul (robust Mosaic
    #      lowering; removes the separate XLA gather op + HBM round trip) ----
    pos = pemb_ref[0:S, :]                                             # [S, H]
    emb_blocks = []
    for b in range(nb):
        onehot = (ids_ref[b] == jax.lax.broadcasted_iota(
            jnp.int32, (S, VOCAB), 1)).astype(f32)                     # [S, VOCAB]
        word = jnp.dot(onehot, wemb_ref[...], preferred_element_type=f32)
        emb_blocks.append(word + pos)                                  # [S, H]
    emb = _concat0(emb_blocks)                                         # [rows, H]

    x = _layernorm(emb, emb_g_ref[...], emb_b_ref[...])
    mask_col = _concat0([maskc_ref[b] for b in range(nb)])             # [rows, 1]
    x = x * mask_col                                                   # HF: emb * mask

    # ---- additive attention-mask bias, stacked for ALL (batch, head) score rows;
    #      built ONCE (hoisted out of the layer/head loops) ----
    bias_blocks = []
    for b in range(nb):
        bias_b = (1.0 - mask_ref[b]) * -1e9                            # [1, S]
        bias_blocks.append(jnp.broadcast_to(bias_b, (NH * S, S)))
    bias_stacked = _concat0(bias_blocks)                               # [nb*NH*S, S]

    for l in range(LAYERS):
        # fused QKV projection (1/sqrt(DH) folded into Q columns); bf16 MXU dot
        qkv = jnp.dot(x.astype(bf16), wqkv_ref[l],
                      preferred_element_type=f32) + bqkv_ref[l]        # [rows, 3H]
        q_all = qkv[:, :H]
        k_all = qkv[:, H:2 * H]
        v_all = qkv[:, 2 * H:]

        # per-(batch, head) score dots -> ONE stacked softmax
        score_blocks = []
        for b in range(nb):
            for h in range(NH):
                q = q_all[b * S:(b + 1) * S, h * DH:(h + 1) * DH]      # [S, DH]
                k = k_all[b * S:(b + 1) * S, h * DH:(h + 1) * DH]      # [S, DH]
                # q @ k^T without an explicit transpose
                score_blocks.append(jax.lax.dot_general(
                    q, k, (((1,), (1,)), ((), ())),
                    preferred_element_type=f32))                       # [S, S]
        scores = _concat0(score_blocks) + bias_stacked                 # [nb*NH*S, S]
        m = jnp.max(scores, axis=-1, keepdims=True)
        p = jnp.exp(scores - m)
        p = p * pl.reciprocal(jnp.sum(p, axis=-1, keepdims=True), approx=True)

        # per-head context, merged once -> single output-projection dot
        ctx_blocks = []
        for b in range(nb):
            heads = []
            for h in range(NH):
                pb = p[(b * NH + h) * S:(b * NH + h + 1) * S, :]       # [S, S]
                v = v_all[b * S:(b + 1) * S, h * DH:(h + 1) * DH]      # [S, DH]
                heads.append(jnp.dot(pb, v, preferred_element_type=f32))
            ctx_blocks.append(jnp.concatenate(heads, axis=1))          # [S, H]
        ctx = _concat0(ctx_blocks)                                     # [rows, H]
        attn = jnp.dot(ctx.astype(bf16), wo_ref[l],
                       preferred_element_type=f32) + bo_ref[l]         # [rows, H]

        # residual + LayerNorm, FFN (GELU) + residual + LayerNorm, all fused
        h1 = _layernorm(attn + x, ln1g_ref[l], ln1b_ref[l])
        inter = _gelu(jnp.dot(h1.astype(bf16), wi_ref[l],
                              preferred_element_type=f32) + bi_ref[l])
        ffn = jnp.dot(inter.astype(bf16), wo2_ref[l],
                      preferred_element_type=f32) + bo2_ref[l]
        x = _layernorm(ffn + h1, ln2g_ref[l], ln2b_ref[l])

    # ---- ContextPooler: CLS token per batch (dropout = identity), dense + GELU ----
    cls = _concat0([x[b * S:b * S + 1, :] for b in range(nb)])         # [nb, H]
    pooled = _gelu(jnp.dot(cls.astype(bf16), poolw_ref[...],
                           preferred_element_type=f32) + poolb_ref[...])
    out_ref[...] = jnp.reshape(pooled, (nb, 1, H))


# ------------------------------- params (synthetic) --------------------------------
def init_params(key):
    keys = iter(jax.random.split(key, 256))

    def w(shape):
        return (0.02 * jax.random.normal(next(keys), shape)).astype(jnp.float32)

    def zeros(shape):
        return jnp.zeros(shape, jnp.float32)

    params = {
        "word_emb": w((VOCAB, H)),
        "pos_emb": w((MAX_POS, H)),
        "emb_ln_g": jnp.ones((H,), jnp.float32),
        "emb_ln_b": zeros((H,)),
        "layers": [],
        "pool_w": w((H, H)),
        "pool_b": zeros((H,)),
    }
    for _ in range(LAYERS):
        params["layers"].append({
            "wq": w((H, H)), "bq": zeros((H,)),
            "wk": w((H, H)), "bk": zeros((H,)),
            "wv": w((H, H)), "bv": zeros((H,)),
            "wo": w((H, H)), "bo": zeros((H,)),
            "ln1_g": jnp.ones((H,), jnp.float32), "ln1_b": zeros((H,)),
            "wi": w((H, INTER)), "bi": zeros((INTER,)),
            "wo2": w((INTER, H)), "bo2": zeros((H,)),
            "ln2_g": jnp.ones((H,), jnp.float32), "ln2_b": zeros((H,)),
        })
    return params


def fuse_params(params):
    """Fold per-layer weights into stacked, kernel-friendly arrays.

    - Q|K|V concatenated into one [H, 3H] matrix per layer (single matmul).
    - attention scale 1/sqrt(DH) folded into the Q columns + bias.
    - weight matrices stored bf16 (MXU-native); biases / LN params f32 [1, N].
    """
    scale = float(DH) ** -0.5
    bf16 = jnp.bfloat16
    cols = {k: [] for k in ["wqkv", "bqkv", "wo", "bo", "ln1_g", "ln1_b",
                            "wi", "bi", "wo2", "bo2", "ln2_g", "ln2_b"]}
    for lp in params["layers"]:
        cols["wqkv"].append(jnp.concatenate(
            [lp["wq"] * scale, lp["wk"], lp["wv"]], axis=1).astype(bf16))
        cols["bqkv"].append(jnp.concatenate(
            [lp["bq"] * scale, lp["bk"], lp["bv"]])[None, :])
        cols["wo"].append(lp["wo"].astype(bf16))
        cols["bo"].append(lp["bo"][None, :])
        cols["ln1_g"].append(lp["ln1_g"][None, :])
        cols["ln1_b"].append(lp["ln1_b"][None, :])
        cols["wi"].append(lp["wi"].astype(bf16))
        cols["bi"].append(lp["bi"][None, :])
        cols["wo2"].append(lp["wo2"].astype(bf16))
        cols["bo2"].append(lp["bo2"][None, :])
        cols["ln2_g"].append(lp["ln2_g"][None, :])
        cols["ln2_b"].append(lp["ln2_b"][None, :])
    fused = {k: jnp.stack(v, axis=0) for k, v in cols.items()}
    fused.update({
        "word_emb": params["word_emb"],
        "pos_emb": params["pos_emb"],
        "emb_ln_g": params["emb_ln_g"][None, :],
        "emb_ln_b": params["emb_ln_b"][None, :],
        "pool_w": params["pool_w"].astype(bf16),
        "pool_b": params["pool_b"][None, :],
    })
    return fused


# ------------------------------------ forward ---------------------------------------
def _use_batch_grid():
    """Shard batches across TensorCores only on v7x (2 TCs/chip)."""
    try:
        kind = jax.devices()[0].device_kind.lower().replace(" ", "")
        return ("v7" in kind) or ("tpu7" in kind)
    except Exception:
        return False


@functools.partial(jax.jit, static_argnames=("batch_grid",))
def deberta_forward(fp, input_ids, attention_mask, *, batch_grid=False):
    """input_ids: int32 [B,S]; attention_mask: float32 [B,S] (1=keep, 0=pad)."""
    Bx, Sx = input_ids.shape
    # only trivial re-layouts stay outside the kernel; gather/mask-bias are in-kernel
    ids3 = input_ids.reshape(Bx, Sx, 1).astype(jnp.int32)
    mask3 = attention_mask.reshape(Bx, 1, Sx).astype(jnp.float32)
    maskc3 = attention_mask.reshape(Bx, Sx, 1).astype(jnp.float32)

    args = (ids3, mask3, maskc3, fp["word_emb"], fp["pos_emb"],
            fp["emb_ln_g"], fp["emb_ln_b"],
            fp["wqkv"], fp["bqkv"], fp["wo"], fp["bo"], fp["ln1_g"], fp["ln1_b"],
            fp["wi"], fp["bi"], fp["wo2"], fp["bo2"], fp["ln2_g"], fp["ln2_b"],
            fp["pool_w"], fp["pool_b"])
    out_shape = jax.ShapeDtypeStruct((Bx, 1, H), jnp.float32)

    if batch_grid:
        # v7x: one batch element per TensorCore; weights broadcast (block 0 always)
        def full2(a):
            return pl.BlockSpec(a.shape, lambda b: (0, 0))

        def full3(a):
            return pl.BlockSpec(a.shape, lambda b: (0, 0, 0))

        in_specs = [
            pl.BlockSpec((1, Sx, 1), lambda b: (b, 0, 0)),   # ids
            pl.BlockSpec((1, 1, Sx), lambda b: (b, 0, 0)),   # mask (row form)
            pl.BlockSpec((1, Sx, 1), lambda b: (b, 0, 0)),   # mask (col form)
            full2(fp["word_emb"]), full2(fp["pos_emb"]),
            full2(fp["emb_ln_g"]), full2(fp["emb_ln_b"]),
            full3(fp["wqkv"]), full3(fp["bqkv"]), full3(fp["wo"]), full3(fp["bo"]),
            full3(fp["ln1_g"]), full3(fp["ln1_b"]),
            full3(fp["wi"]), full3(fp["bi"]), full3(fp["wo2"]), full3(fp["bo2"]),
            full3(fp["ln2_g"]), full3(fp["ln2_b"]),
            full2(fp["pool_w"]), full2(fp["pool_b"]),
        ]
        out = pl.pallas_call(
            functools.partial(_deberta_fused_kernel, nb=1),
            out_shape=out_shape,
            grid=(Bx,),
            in_specs=in_specs,
            out_specs=pl.BlockSpec((1, 1, H), lambda b: (b, 0, 0)),
            compiler_params=pltpu.CompilerParams(
                dimension_semantics=("parallel",)),
        )(*args)
    else:
        # v5e/v6e (single TC): one program, everything VMEM-resident (<0.5 MiB)
        out = pl.pallas_call(
            functools.partial(_deberta_fused_kernel, nb=Bx),
            out_shape=out_shape,
        )(*args)
    return out.reshape(Bx, H)


# ------------------------------------- main ------------------------------------------
if __name__ == "__main__":
    key = jax.random.PRNGKey(0)
    k_param, k_ids = jax.random.split(key)

    params = init_params(k_param)
    fused = fuse_params(params)

    input_ids = jax.random.randint(k_ids, (B, S), 0, VOCAB, dtype=jnp.int32)
    # batch 0 fully valid; batch 1 has 4 padding tokens at the end
    attention_mask = jnp.ones((B, S), jnp.float32)
    attention_mask = attention_mask.at[1, S - 4:].set(0.0)

    pooled = deberta_forward(fused, input_ids, attention_mask,
                             batch_grid=_use_batch_grid())
    pooled = jax.block_until_ready(pooled)

    assert pooled.shape == (B, H) and pooled.dtype == jnp.float32
    assert bool(jnp.all(jnp.isfinite(pooled)))
    print("KERNEL_OK")
</pallas_src>

<mosaic_0001>
module attributes {stable_mosaic.version = 11 : i64} {
  func.func @_deberta_fused_kernel(%arg0: memref<2x16x1xi32, #tpu.memory_space<vmem>>, %arg1: memref<2x1x16xf32, #tpu.memory_space<vmem>>, %arg2: memref<2x16x1xf32, #tpu.memory_space<vmem>>, %arg3: memref<64x64xf32, #tpu.memory_space<vmem>>, %arg4: memref<32x64xf32, #tpu.memory_space<vmem>>, %arg5: memref<1x64xf32, #tpu.memory_space<vmem>>, %arg6: memref<1x64xf32, #tpu.memory_space<vmem>>, %arg7: memref<2x64x192xbf16, #tpu.memory_space<vmem>>, %arg8: memref<2x1x192xf32, #tpu.memory_space<vmem>>, %arg9: memref<2x64x64xbf16, #tpu.memory_space<vmem>>, %arg10: memref<2x1x64xf32, #tpu.memory_space<vmem>>, %arg11: memref<2x1x64xf32, #tpu.memory_space<vmem>>, %arg12: memref<2x1x64xf32, #tpu.memory_space<vmem>>, %arg13: memref<2x64x128xbf16, #tpu.memory_space<vmem>>, %arg14: memref<2x1x128xf32, #tpu.memory_space<vmem>>, %arg15: memref<2x128x64xbf16, #tpu.memory_space<vmem>>, %arg16: memref<2x1x64xf32, #tpu.memory_space<vmem>>, %arg17: memref<2x1x64xf32, #tpu.memory_space<vmem>>, %arg18: memref<2x1x64xf32, #tpu.memory_space<vmem>>, %arg19: memref<64x64xbf16, #tpu.memory_space<vmem>>, %arg20: memref<1x64xf32, #tpu.memory_space<vmem>>, %arg21: memref<2x1x64xf32, #tpu.memory_space<vmem>>) attributes {dimension_semantics = [], scalar_prefetch = 0 : i64, scratch_operands = 0 : i64, tpu.core_type = #tpu.core_type<tc>} {
    %c0 = arith.constant 0 : index
    %c0_0 = arith.constant 0 : index
    %0 = vector.load %arg4[%c0, %c0_0] : memref<32x64xf32, #tpu.memory_space<vmem>>, vector<16x64xf32>
    %c0_1 = arith.constant 0 : index
    %c0_2 = arith.constant 0 : index
    %c0_3 = arith.constant 0 : index
    %1 = vector.load %arg0[%c0_1, %c0_2, %c0_3] : memref<2x16x1xi32, #tpu.memory_space<vmem>>, vector<1x16x1xi32>
    %2 = vector.shape_cast %1 : vector<1x16x1xi32> to vector<16x1xi32>
    %3 = tpu.iota {dimensions = array<i32: 1>} : vector<16x64xi32>
    %4 = vector.broadcast %2 : vector<16x1xi32> to vector<16x64xi32>
    %5 = arith.cmpi eq, %4, %3 : vector<16x64xi32>
    %6 = arith.extui %5 : vector<16x64xi1> to vector<16x64xi32>
    %7 = arith.sitofp %6 : vector<16x64xi32> to vector<16x64xf32>
    %c0_4 = arith.constant 0 : index
    %c0_5 = arith.constant 0 : index
    %8 = vector.load %arg3[%c0_4, %c0_5] : memref<64x64xf32, #tpu.memory_space<vmem>>, vector<64x64xf32>
    %cst = arith.constant dense<0.000000e+00> : vector<16x64xf32>
    %9 = tpu.matmul %7, %8, %cst {dimension_numbers = #tpu.dot_dimension_numbers<[1], [0], [0], [1], [0, 0, 1, 1], [], []>} : vector<16x64xf32>, vector<64x64xf32>, vector<16x64xf32> -> vector<16x64xf32>
    %10 = arith.addf %9, %0 : vector<16x64xf32>
    %c1 = arith.constant 1 : index
    %c0_6 = arith.constant 0 : index
    %c0_7 = arith.constant 0 : index
    %11 = vector.load %arg0[%c1, %c0_6, %c0_7] : memref<2x16x1xi32, #tpu.memory_space<vmem>>, vector<1x16x1xi32>
    %12 = vector.shape_cast %11 : vector<1x16x1xi32> to vector<16x1xi32>
    %13 = tpu.iota {dimensions = array<i32: 1>} : vector<16x64xi32>
    %14 = vector.broadcast %12 : vector<16x1xi32> to vector<16x64xi32>
    %15 = arith.cmpi eq, %14, %13 : vector<16x64xi32>
    %16 = arith.extui %15 : vector<16x64xi1> to vector<16x64xi32>
    %17 = arith.sitofp %16 : vector<16x64xi32> to vector<16x64xf32>
    %c0_8 = arith.constant 0 : index
    %c0_9 = arith.constant 0 : index
    %18 = vector.load %arg3[%c0_8, %c0_9] : memref<64x64xf32, #tpu.memory_space<vmem>>, vector<64x64xf32>
    %cst_10 = arith.constant dense<0.000000e+00> : vector<16x64xf32>
    %19 = tpu.matmul %17, %18, %cst_10 {dimension_numbers = #tpu.dot_dimension_numbers<[1], [0], [0], [1], [0, 0, 1, 1], [], []>} : vector<16x64xf32>, vector<64x64xf32>, vector<16x64xf32> -> vector<16x64xf32>
    %20 = arith.addf %19, %0 : vector<16x64xf32>
    %21 = tpu.concatenate %10, %20 in 0 : vector<16x64xf32>, vector<16x64xf32> -> vector<32x64xf32>
    %c0_11 = arith.constant 0 : index
    %c0_12 = arith.constant 0 : index
    %22 = vector.load %arg5[%c0_11, %c0_12] : memref<1x64xf32, #tpu.memory_space<vmem>>, vector<1x64xf32>
    %c0_13 = arith.constant 0 : index
    %c0_14 = arith.constant 0 : index
    %23 = vector.load %arg6[%c0_13, %c0_14] : memref<1x64xf32, #tpu.memory_space<vmem>>, vector<1x64xf32>
    %cst_15 = arith.constant dense<0.000000e+00> : vector<32xf32>
    %24 = vector.multi_reduction <add>, %21, %cst_15 [1] : vector<32x64xf32> to vector<32xf32>
    %25 = vector.shape_cast %24 : vector<32xf32> to vector<32x1xf32>
    %cst_16 = arith.constant 6.400000e+01 : f32
    %26 = vector.broadcast %cst_16 : f32 to vector<32x1xf32>
    %27 = arith.divf %25, %26 : vector<32x1xf32>
    %28 = vector.broadcast %27 : vector<32x1xf32> to vector<32x64xf32>
    %29 = arith.subf %21, %28 : vector<32x64xf32>
    %30 = arith.mulf %29, %29 : vector<32x64xf32>
    %cst_17 = arith.constant dense<0.000000e+00> : vector<32xf32>
    %31 = vector.multi_reduction <add>, %30, %cst_17 [1] : vector<32x64xf32> to vector<32xf32>
    %32 = vector.shape_cast %31 : vector<32xf32> to vector<32x1xf32>
    %cst_18 = arith.constant 6.400000e+01 : f32
    %33 = vector.broadcast %cst_18 : f32 to vector<32x1xf32>
    %34 = arith.divf %32, %33 : vector<32x1xf32>
    %35 = vector.broadcast %27 : vector<32x1xf32> to vector<32x64xf32>
    %36 = arith.subf %21, %35 : vector<32x64xf32>
    %cst_19 = arith.constant 1.000000e-07 : f32
    %37 = vector.broadcast %cst_19 : f32 to vector<32x1xf32>
    %38 = arith.addf %34, %37 : vector<32x1xf32>
    %39 = math.rsqrt %38 : vector<32x1xf32>
    %40 = vector.broadcast %39 : vector<32x1xf32> to vector<32x64xf32>
    %41 = arith.mulf %36, %40 : vector<32x64xf32>
    %42 = vector.broadcast %22 : vector<1x64xf32> to vector<32x64xf32>
    %43 = arith.mulf %41, %42 : vector<32x64xf32>
    %44 = vector.broadcast %23 : vector<1x64xf32> to vector<32x64xf32>
    %45 = arith.addf %43, %44 : vector<32x64xf32>
    %c0_20 = arith.constant 0 : index
    %c0_21 = arith.constant 0 : index
    %c0_22 = arith.constant 0 : index
    %46 = vector.load %arg2[%c0_20, %c0_21, %c0_22] : memref<2x16x1xf32, #tpu.memory_space<vmem>>, vector<1x16x1xf32>
    %47 = vector.shape_cast %46 : vector<1x16x1xf32> to vector<16x1xf32>
    %c1_23 = arith.constant 1 : index
    %c0_24 = arith.constant 0 : index
    %c0_25 = arith.constant 0 : index
    %48 = vector.load %arg2[%c1_23, %c0_24, %c0_25] : memref<2x16x1xf32, #tpu.memory_space<vmem>>, vector<1x16x1xf32>
    %49 = vector.shape_cast %48 : vector<1x16x1xf32> to vector<16x1xf32>
    %50 = tpu.concatenate %47, %49 in 0 : vector<16x1xf32>, vector<16x1xf32> -> vector<32x1xf32>
    %51 = vector.broadcast %50 : vector<32x1xf32> to vector<32x64xf32>
    %52 = arith.mulf %45, %51 : vector<32x64xf32>
    %c0_26 = arith.constant 0 : index
    %c0_27 = arith.constant 0 : index
    %c0_28 = arith.constant 0 : index
    %53 = vector.load %arg1[%c0_26, %c0_27, %c0_28] : memref<2x1x16xf32, #tpu.memory_space<vmem>>, vector<1x1x16xf32>
    %54 = vector.shape_cast %53 : vector<1x1x16xf32> to vector<1x16xf32>
    %cst_29 = arith.constant 1.000000e+00 : f32
    %55 = vector.broadcast %cst_29 : f32 to vector<1x16xf32>
    %56 = arith.subf %55, %54 : vector<1x16xf32>
    %cst_30 = arith.constant -1.000000e+09 : f32
    %57 = vector.broadcast %cst_30 : f32 to vector<1x16xf32>
    %58 = arith.mulf %56, %57 : vector<1x16xf32>
    %59 = vector.shape_cast %58 : vector<1x16xf32> to vector<1x16xf32>
    %60 = vector.broadcast %59 : vector<1x16xf32> to vector<64x16xf32>
    %c1_31 = arith.constant 1 : index
    %c0_32 = arith.constant 0 : index
    %c0_33 = arith.constant 0 : index
    %61 = vector.load %arg1[%c1_31, %c0_32, %c0_33] : memref<2x1x16xf32, #tpu.memory_space<vmem>>, vector<1x1x16xf32>
    %62 = vector.shape_cast %61 : vector<1x1x16xf32> to vector<1x16xf32>
    %cst_34 = arith.constant 1.000000e+00 : f32
    %63 = vector.broadcast %cst_34 : f32 to vector<1x16xf32>
    %64 = arith.subf %63, %62 : vector<1x16xf32>
    %cst_35 = arith.constant -1.000000e+09 : f32
    %65 = vector.broadcast %cst_35 : f32 to vector<1x16xf32>
    %66 = arith.mulf %64, %65 : vector<1x16xf32>
    %67 = vector.shape_cast %66 : vector<1x16xf32> to vector<1x16xf32>
    %68 = vector.broadcast %67 : vector<1x16xf32> to vector<64x16xf32>
    %69 = tpu.concatenate %60, %68 in 0 : vector<64x16xf32>, vector<64x16xf32> -> vector<128x16xf32>
    %70 = arith.truncf %52 : vector<32x64xf32> to vector<32x64xbf16>
    %c0_36 = arith.constant 0 : index
    %c0_37 = arith.constant 0 : index
    %c0_38 = arith.constant 0 : index
    %71 = vector.load %arg7[%c0_36, %c0_37, %c0_38] : memref<2x64x192xbf16, #tpu.memory_space<vmem>>, vector<1x64x192xbf16>
    %72 = vector.shape_cast %71 : vector<1x64x192xbf16> to vector<64x192xbf16>
    %cst_39 = arith.constant dense<0.000000e+00> : vector<32x192xf32>
    %73 = tpu.matmul %70, %72, %cst_39 {dimension_numbers = #tpu.dot_dimension_numbers<[1], [0], [0], [1], [0, 0, 1, 1], [], []>} : vector<32x64xbf16>, vector<64x192xbf16>, vector<32x192xf32> -> vector<32x192xf32>
    %c0_40 = arith.constant 0 : index
    %c0_41 = arith.constant 0 : index
    %c0_42 = arith.constant 0 : index
    %74 = vector.load %arg8[%c0_40, %c0_41, %c0_42] : memref<2x1x192xf32, #tpu.memory_space<vmem>>, vector<1x1x192xf32>
    %75 = vector.shape_cast %74 : vector<1x1x192xf32> to vector<1x192xf32>
    %76 = vector.broadcast %75 : vector<1x192xf32> to vector<32x192xf32>
    %77 = arith.addf %73, %76 : vector<32x192xf32>
    %78 = vector.extract_strided_slice %77 {offsets = [0, 0], sizes = [32, 64], strides = [1, 1]} : vector<32x192xf32> to vector<32x64xf32>
    %79 = vector.extract_strided_slice %77 {offsets = [0, 64], sizes = [32, 64], strides = [1, 1]} : vector<32x192xf32> to vector<32x64xf32>
    %80 = vector.extract_strided_slice %77 {offsets = [0, 128], sizes = [32, 64], strides = [1, 1]} : vector<32x192xf32> to vector<32x64xf32>
    %81 = vector.extract_strided_slice %78 {offsets = [0, 0], sizes = [16, 16], strides = [1, 1]} : vector<32x64xf32> to vector<16x16xf32>
    %82 = vector.extract_strided_slice %79 {offsets = [0, 0], sizes = [16, 16], strides = [1, 1]} : vector<32x64xf32> to vector<16x16xf32>
    %cst_43 = arith.constant dense<0.000000e+00> : vector<16x16xf32>
    %83 = tpu.matmul %81, %82, %cst_43 {dimension_numbers = #tpu.dot_dimension_numbers<[1], [1], [0], [0], [0, 0, 1, 0], [], []>} : vector<16x16xf32>, vector<16x16xf32>, vector<16x16xf32> -> vector<16x16xf32>
    %84 = vector.extract_strided_slice %78 {offsets = [0, 16], sizes = [16, 16], strides = [1, 1]} : vector<32x64xf32> to vector<16x16xf32>
    %85 = vector.extract_strided_slice %79 {offsets = [0, 16], sizes = [16, 16], strides = [1, 1]} : vector<32x64xf32> to vector<16x16xf32>
    %cst_44 = arith.constant dense<0.000000e+00> : vector<16x16xf32>
    %86 = tpu.matmul %84, %85, %cst_44 {dimension_numbers = #tpu.dot_dimension_numbers<[1], [1], [0], [0], [0, 0, 1, 0], [], []>} : vector<16x16xf32>, vector<16x16xf32>, vector<16x16xf32> -> vector<16x16xf32>
    %87 = vector.extract_strided_slice %78 {offsets = [0, 32], sizes = [16, 16], strides = [1, 1]} : vector<32x64xf32> to vector<16x16xf32>
    %88 = vector.extract_strided_slice %79 {offsets = [0, 32], sizes = [16, 16], strides = [1, 1]} : vector<32x64xf32> to vector<16x16xf32>
    %cst_45 = arith.constant dense<0.000000e+00> : vector<16x16xf32>
    %89 = tpu.matmul %87, %88, %cst_45 {dimension_numbers = #tpu.dot_dimension_numbers<[1], [1], [0], [0], [0, 0, 1, 0], [], []>} : vector<16x16xf32>, vector<16x16xf32>, vector<16x16xf32> -> vector<16x16xf32>
    %90 = vector.extract_strided_slice %78 {offsets = [0, 48], sizes = [16, 16], strides = [1, 1]} : vector<32x64xf32> to vector<16x16xf32>
    %91 = vector.extract_strided_slice %79 {offsets = [0, 48], sizes = [16, 16], strides = [1, 1]} : vector<32x64xf32> to vector<16x16xf32>
    %cst_46 = arith.constant dense<0.000000e+00> : vector<16x16xf32>
    %92 = tpu.matmul %90, %91, %cst_46 {dimension_numbers = #tpu.dot_dimension_numbers<[1], [1], [0], [0], [0, 0, 1, 0], [], []>} : vector<16x16xf32>, vector<16x16xf32>, vector<16x16xf32> -> vector<16x16xf32>
    %93 = vector.extract_strided_slice %78 {offsets = [16, 0], sizes = [16, 16], strides = [1, 1]} : vector<32x64xf32> to vector<16x16xf32>
    %94 = vector.extract_strided_slice %79 {offsets = [16, 0], sizes = [16, 16], strides = [1, 1]} : vector<32x64xf32> to vector<16x16xf32>
    %cst_47 = arith.constant dense<0.000000e+00> : vector<16x16xf32>
    %95 = tpu.matmul %93, %94, %cst_47 {dimension_numbers = #tpu.dot_dimension_numbers<[1], [1], [0], [0], [0, 0, 1, 0], [], []>} : vector<16x16xf32>, vector<16x16xf32>, vector<16x16xf32> -> vector<16x16xf32>
    %96 = vector.extract_strided_slice %78 {offsets = [16, 16], sizes = [16, 16], strides = [1, 1]} : vector<32x64xf32> to vector<16x16xf32>
    %97 = vector.extract_strided_slice %79 {offsets = [16, 16], sizes = [16, 16], strides = [1, 1]} : vector<32x64xf32> to vector<16x16xf32>
    %cst_48 = arith.constant dense<0.000000e+00> : vector<16x16xf32>
    %98 = tpu.matmul %96, %97, %cst_48 {dimension_numbers = #tpu.dot_dimension_numbers<[1], [1], [0], [0], [0, 0, 1, 0], [], []>} : vector<16x16xf32>, vector<16x16xf32>, vector<16x16xf32> -> vector<16x16xf32>
    %99 = vector.extract_strided_slice %78 {offsets = [16, 32], sizes = [16, 16], strides = [1, 1]} : vector<32x64xf32> to vector<16x16xf32>
    %100 = vector.extract_strided_slice %79 {offsets = [16, 32], sizes = [16, 16], strides = [1, 1]} : vector<32x64xf32> to vector<16x16xf32>
    %cst_49 = arith.constant dense<0.000000e+00> : vector<16x16xf32>
    %101 = tpu.matmul %99, %100, %cst_49 {dimension_numbers = #tpu.dot_dimension_numbers<[1], [1], [0], [0], [0, 0, 1, 0], [], []>} : vector<16x16xf32>, vector<16x16xf32>, vector<16x16xf32> -> vector<16x16xf32>
    %102 = vector.extract_strided_slice %78 {offsets = [16, 48], sizes = [16, 16], strides = [1, 1]} : vector<32x64xf32> to vector<16x16xf32>
    %103 = vector.extract_strided_slice %79 {offsets = [16, 48], sizes = [16, 16], strides = [1, 1]} : vector<32x64xf32> to vector<16x16xf32>
    %cst_50 = arith.constant dense<0.000000e+00> : vector<16x16xf32>
    %104 = tpu.matmul %102, %103, %cst_50 {dimension_numbers = #tpu.dot_dimension_numbers<[1], [1], [0], [0], [0, 0, 1, 0], [], []>} : vector<16x16xf32>, vector<16x16xf32>, vector<16x16xf32> -> vector<16x16xf32>
    %105 = tpu.concatenate %83, %86, %89, %92, %95, %98, %101, %104 in 0 : vector<16x16xf32>, vector<16x16xf32>, vector<16x16xf32>, vector<16x16xf32>, vector<16x16xf32>, vector<16x16xf32>, vector<16x16xf32>, vector<16x16xf32> -> vector<128x16xf32>
    %106 = arith.addf %105, %69 : vector<128x16xf32>
    %cst_51 = arith.constant dense<0xFF800000> : vector<128xf32>
    %107 = vector.multi_reduction <maximumf>, %106, %cst_51 [1] : vector<128x16xf32> to vector<128xf32>
    %108 = vector.shape_cast %107 : vector<128xf32> to vector<128x1xf32>
    %109 = vector.broadcast %108 : vector<128x1xf32> to vector<128x16xf32>
    %110 = arith.subf %106, %109 : vector<128x16xf32>
    %111 = math.exp %110 : vector<128x16xf32>
    %cst_52 = arith.constant dense<0.000000e+00> : vector<128xf32>
    %112 = vector.multi_reduction <add>, %111, %cst_52 [1] : vector<128x16xf32> to vector<128xf32>
    %113 = vector.shape_cast %112 : vector<128xf32> to vector<128x1xf32>
    %114 = tpu.reciprocal %113 {approx = true} : vector<128x1xf32> -> vector<128x1xf32>
    %115 = vector.broadcast %114 : vector<128x1xf32> to vector<128x16xf32>
    %116 = arith.mulf %111, %115 : vector<128x16xf32>
    %117 = vector.extract_strided_slice %116 {offsets = [0, 0], sizes = [16, 16], strides = [1, 1]} : vector<128x16xf32> to vector<16x16xf32>
    %118 = vector.extract_strided_slice %80 {offsets = [0, 0], sizes = [16, 16], strides = [1, 1]} : vector<32x64xf32> to vector<16x16xf32>
    %cst_53 = arith.constant dense<0.000000e+00> : vector<16x16xf32>
    %119 = tpu.matmul %117, %118, %cst_53 {dimension_numbers = #tpu.dot_dimension_numbers<[1], [0], [0], [1], [0, 0, 1, 1], [], []>} : vector<16x16xf32>, vector<16x16xf32>, vector<16x16xf32> -> vector<16x16xf32>
    %120 = vector.extract_strided_slice %116 {offsets = [16, 0], sizes = [16, 16], strides = [1, 1]} : vector<128x16xf32> to vector<16x16xf32>
    %121 = vector.extract_strided_slice %80 {offsets = [0, 16], sizes = [16, 16], strides = [1, 1]} : vector<32x64xf32> to vector<16x16xf32>
    %cst_54 = arith.constant dense<0.000000e+00> : vector<16x16xf32>
    %122 = tpu.matmul %120, %121, %cst_54 {dimension_numbers = #tpu.dot_dimension_numbers<[1], [0], [0], [1], [0, 0, 1, 1], [], []>} : vector<16x16xf32>, vector<16x16xf32>, vector<16x16xf32> -> vector<16x16xf32>
    %123 = vector.extract_strided_slice %116 {offsets = [32, 0], sizes = [16, 16], strides = [1, 1]} : vector<128x16xf32> to vector<16x16xf32>
    %124 = vector.extract_strided_slice %80 {offsets = [0, 32], sizes = [16, 16], strides = [1, 1]} : vector<32x64xf32> to vector<16x16xf32>
    %cst_55 = arith.constant dense<0.000000e+00> : vector<16x16xf32>
    %125 = tpu.matmul %123, %124, %cst_55 {dimension_numbers = #tpu.dot_dimension_numbers<[1], [0], [0], [1], [0, 0, 1, 1], [], []>} : vector<16x16xf32>, vector<16x16xf32>, vector<16x16xf32> -> vector<16x16xf32>
    %126 = vector.extract_strided_slice %116 {offsets = [48, 0], sizes = [16, 16], strides = [1, 1]} : vector<128x16xf32> to vector<16x16xf32>
    %127 = vector.extract_strided_slice %80 {offsets = [0, 48], sizes = [16, 16], strides = [1, 1]} : vector<32x64xf32> to vector<16x16xf32>
    %cst_56 = arith.constant dense<0.000000e+00> : vector<16x16xf32>
    %128 = tpu.matmul %126, %127, %cst_56 {dimension_numbers = #tpu.dot_dimension_numbers<[1], [0], [0], [1], [0, 0, 1, 1], [], []>} : vector<16x16xf32>, vector<16x16xf32>, vector<16x16xf32> -> vector<16x16xf32>
    %129 = tpu.concatenate %119, %122, %125, %128 in 1 : vector<16x16xf32>, vector<16x16xf32>, vector<16x16xf32>, vector<16x16xf32> -> vector<16x64xf32>
    %130 = vector.extract_strided_slice %116 {offsets = [64, 0], sizes = [16, 16], strides = [1, 1]} : vector<128x16xf32> to vector<16x16xf32>
    %131 = vector.extract_strided_slice %80 {offsets = [16, 0], sizes = [16, 16], strides = [1, 1]} : vector<32x64xf32> to vector<16x16xf32>
    %cst_57 = arith.constant dense<0.000000e+00> : vector<16x16xf32>
    %132 = tpu.matmul %130, %131, %cst_57 {dimension_numbers = #tpu.dot_dimension_numbers<[1], [0], [0], [1], [0, 0, 1, 1], [], []>} : vector<16x16xf32>, vector<16x16xf32>, vector<16x16xf32> -> vector<16x16xf32>
    %133 = vector.extract_strided_slice %116 {offsets = [80, 0], sizes = [16, 16], strides = [1, 1]} : vector<128x16xf32> to vector<16x16xf32>
    %134 = vector.extract_strided_slice %80 {offsets = [16, 16], sizes = [16, 16], strides = [1, 1]} : vector<32x64xf32> to vector<16x16xf32>
    %cst_58 = arith.constant dense<0.000000e+00> : vector<16x16xf32>
    %135 = tpu.matmul %133, %134, %cst_58 {dimension_numbers = #tpu.dot_dimension_numbers<[1], [0], [0], [1], [0, 0, 1, 1], [], []>} : vector<16x16xf32>, vector<16x16xf32>, vector<16x16xf32> -> vector<16x16xf32>
    %136 = vector.extract_strided_slice %116 {offsets = [96, 0], sizes = [16, 16], strides = [1, 1]} : vector<128x16xf32> to vector<16x16xf32>
    %137 = vector.extract_strided_slice %80 {offsets = [16, 32], sizes = [16, 16], strides = [1, 1]} : vector<32x64xf32> to vector<16x16xf32>
    %cst_59 = arith.constant dense<0.000000e+00> : vector<16x16xf32>
    %138 = tpu.matmul %136, %137, %cst_59 {dimension_numbers = #tpu.dot_dimension_numbers<[1], [0], [0], [1], [0, 0, 1, 1], [], []>} : vector<16x16xf32>, vector<16x16xf32>, vector<16x16xf32> -> vector<16x16xf32>
    %139 = vector.extract_strided_slice %116 {offsets = [112, 0], sizes = [16, 16], strides = [1, 1]} : vector<128x16xf32> to vector<16x16xf32>
    %140 = vector.extract_strided_slice %80 {offsets = [16, 48], sizes = [16, 16], strides = [1, 1]} : vector<32x64xf32> to vector<16x16xf32>
    %cst_60 = arith.constant dense<0.000000e+00> : vector<16x16xf32>
    %141 = tpu.matmul %139, %140, %cst_60 {dimension_numbers = #tpu.dot_dimension_numbers<[1], [0], [0], [1], [0, 0, 1, 1], [], []>} : vector<16x16xf32>, vector<16x16xf32>, vector<16x16xf32> -> vector<16x16xf32>
    %142 = tpu.concatenate %132, %135, %138, %141 in 1 : vector<16x16xf32>, vector<16x16xf32>, vector<16x16xf32>, vector<16x16xf32> -> vector<16x64xf32>
    %143 = tpu.concatenate %129, %142 in 0 : vector<16x64xf32>, vector<16x64xf32> -> vector<32x64xf32>
    %144 = arith.truncf %143 : vector<32x64xf32> to vector<32x64xbf16>
    %c0_61 = arith.constant 0 : index
    %c0_62 = arith.constant 0 : index
    %c0_63 = arith.constant 0 : index
    %145 = vector.load %arg9[%c0_61, %c0_62, %c0_63] : memref<2x64x64xbf16, #tpu.memory_space<vmem>>, vector<1x64x64xbf16>
    %146 = vector.shape_cast %145 : vector<1x64x64xbf16> to vector<64x64xbf16>
    %cst_64 = arith.constant dense<0.000000e+00> : vector<32x64xf32>
    %147 = tpu.matmul %144, %146, %cst_64 {dimension_numbers = #tpu.dot_dimension_numbers<[1], [0], [0], [1], [0, 0, 1, 1], [], []>} : vector<32x64xbf16>, vector<64x64xbf16>, vector<32x64xf32> -> vector<32x64xf32>
    %c0_65 = arith.constant 0 : index
    %c0_66 = arith.constant 0 : index
    %c0_67 = arith.constant 0 : index
    %148 = vector.load %arg10[%c0_65, %c0_66, %c0_67] : memref<2x1x64xf32, #tpu.memory_space<vmem>>, vector<1x1x64xf32>
    %149 = vector.shape_cast %148 : vector<1x1x64xf32> to vector<1x64xf32>
    %150 = vector.broadcast %149 : vector<1x64xf32> to vector<32x64xf32>
    %151 = arith.addf %147, %150 : vector<32x64xf32>
    %152 = arith.addf %151, %52 : vector<32x64xf32>
    %c0_68 = arith.constant 0 : index
    %c0_69 = arith.constant 0 : index
    %c0_70 = arith.constant 0 : index
    %153 = vector.load %arg11[%c0_68, %c0_69, %c0_70] : memref<2x1x64xf32, #tpu.memory_space<vmem>>, vector<1x1x64xf32>
    %154 = vector.shape_cast %153 : vector<1x1x64xf32> to vector<1x64xf32>
    %c0_71 = arith.constant 0 : index
    %c0_72 = arith.constant 0 : index
    %c0_73 = arith.constant 0 : index
    %155 = vector.load %arg12[%c0_71, %c0_72, %c0_73] : memref<2x1x64xf32, #tpu.memory_space<vmem>>, vector<1x1x64xf32>
    %156 = vector.shape_cast %155 : vector<1x1x64xf32> to vector<1x64xf32>
    %cst_74 = arith.constant dense<0.000000e+00> : vector<32xf32>
    %157 = vector.multi_reduction <add>, %152, %cst_74 [1] : vector<32x64xf32> to vector<32xf32>
    %158 = vector.shape_cast %157 : vector<32xf32> to vector<32x1xf32>
    %cst_75 = arith.constant 6.400000e+01 : f32
    %159 = vector.broadcast %cst_75 : f32 to vector<32x1xf32>
    %160 = arith.divf %158, %159 : vector<32x1xf32>
    %161 = vector.broadcast %160 : vector<32x1xf32> to vector<32x64xf32>
    %162 = arith.subf %152, %161 : vector<32x64xf32>
    %163 = arith.mulf %162, %162 : vector<32x64xf32>
    %cst_76 = arith.constant dense<0.000000e+00> : vector<32xf32>
    %164 = vector.multi_reduction <add>, %163, %cst_76 [1] : vector<32x64xf32> to vector<32xf32>
    %165 = vector.shape_cast %164 : vector<32xf32> to vector<32x1xf32>
    %cst_77 = arith.constant 6.400000e+01 : f32
    %166 = vector.broadcast %cst_77 : f32 to vector<32x1xf32>
    %167 = arith.divf %165, %166 : vector<32x1xf32>
    %168 = vector.broadcast %160 : vector<32x1xf32> to vector<32x64xf32>
    %169 = arith.subf %152, %168 : vector<32x64xf32>
    %cst_78 = arith.constant 1.000000e-07 : f32
    %170 = vector.broadcast %cst_78 : f32 to vector<32x1xf32>
    %171 = arith.addf %167, %170 : vector<32x1xf32>
    %172 = math.rsqrt %171 : vector<32x1xf32>
    %173 = vector.broadcast %172 : vector<32x1xf32> to vector<32x64xf32>
    %174 = arith.mulf %169, %173 : vector<32x64xf32>
    %175 = vector.broadcast %154 : vector<1x64xf32> to vector<32x64xf32>
    %176 = arith.mulf %174, %175 : vector<32x64xf32>
    %177 = vector.broadcast %156 : vector<1x64xf32> to vector<32x64xf32>
    %178 = arith.addf %176, %177 : vector<32x64xf32>
    %179 = arith.truncf %178 : vector<32x64xf32> to vector<32x64xbf16>
    %c0_79 = arith.constant 0 : index
    %c0_80 = arith.constant 0 : index
    %c0_81 = arith.constant 0 : index
    %180 = vector.load %arg13[%c0_79, %c0_80, %c0_81] : memref<2x64x128xbf16, #tpu.memory_space<vmem>>, vector<1x64x128xbf16>
    %181 = vector.shape_cast %180 : vector<1x64x128xbf16> to vector<64x128xbf16>
    %cst_82 = arith.constant dense<0.000000e+00> : vector<32x128xf32>
    %182 = tpu.matmul %179, %181, %cst_82 {dimension_numbers = #tpu.dot_dimension_numbers<[1], [0], [0], [1], [0, 0, 1, 1], [], []>} : vector<32x64xbf16>, vector<64x128xbf16>, vector<32x128xf32> -> vector<32x128xf32>
    %c0_83 = arith.constant 0 : index
    %c0_84 = arith.constant 0 : index
    %c0_85 = arith.constant 0 : index
    %183 = vector.load %arg14[%c0_83, %c0_84, %c0_85] : memref<2x1x128xf32, #tpu.memory_space<vmem>>, vector<1x1x128xf32>
    %184 = vector.shape_cast %183 : vector<1x1x128xf32> to vector<1x128xf32>
    %185 = vector.broadcast %184 : vector<1x128xf32> to vector<32x128xf32>
    %186 = arith.addf %182, %185 : vector<32x128xf32>
    %cst_86 = arith.constant 5.000000e-01 : f32
    %187 = vector.broadcast %cst_86 : f32 to vector<32x128xf32>
    %188 = arith.mulf %187, %186 : vector<32x128xf32>
    %cst_87 = arith.constant 4.471500e-02 : f32
    %189 = vector.broadcast %cst_87 : f32 to vector<32x128xf32>
    %190 = arith.mulf %189, %186 : vector<32x128xf32>
    %191 = arith.mulf %190, %186 : vector<32x128xf32>
    %192 = arith.mulf %191, %186 : vector<32x128xf32>
    %193 = arith.addf %186, %192 : vector<32x128xf32>
    %cst_88 = arith.constant 0.797884583 : f32
    %194 = vector.broadcast %cst_88 : f32 to vector<32x128xf32>
    %195 = arith.mulf %194, %193 : vector<32x128xf32>
    %196 = math.tanh %195 : vector<32x128xf32>
    %cst_89 = arith.constant 1.000000e+00 : f32
    %197 = vector.broadcast %cst_89 : f32 to vector<32x128xf32>
    %198 = arith.addf %197, %196 : vector<32x128xf32>
    %199 = arith.mulf %188, %198 : vector<32x128xf32>
    %200 = arith.truncf %199 : vector<32x128xf32> to vector<32x128xbf16>
    %c0_90 = arith.constant 0 : index
    %c0_91 = arith.constant 0 : index
    %c0_92 = arith.constant 0 : index
    %201 = vector.load %arg15[%c0_90, %c0_91, %c0_92] : memref<2x128x64xbf16, #tpu.memory_space<vmem>>, vector<1x128x64xbf16>
    %202 = vector.shape_cast %201 : vector<1x128x64xbf16> to vector<128x64xbf16>
    %cst_93 = arith.constant dense<0.000000e+00> : vector<32x64xf32>
    %203 = tpu.matmul %200, %202, %cst_93 {dimension_numbers = #tpu.dot_dimension_numbers<[1], [0], [0], [1], [0, 0, 1, 1], [], []>} : vector<32x128xbf16>, vector<128x64xbf16>, vector<32x64xf32> -> vector<32x64xf32>
    %c0_94 = arith.constant 0 : index
    %c0_95 = arith.constant 0 : index
    %c0_96 = arith.constant 0 : index
    %204 = vector.load %arg16[%c0_94, %c0_95, %c0_96] : memref<2x1x64xf32, #tpu.memory_space<vmem>>, vector<1x1x64xf32>
    %205 = vector.shape_cast %204 : vector<1x1x64xf32> to vector<1x64xf32>
    %206 = vector.broadcast %205 : vector<1x64xf32> to vector<32x64xf32>
    %207 = arith.addf %203, %206 : vector<32x64xf32>
    %208 = arith.addf %207, %178 : vector<32x64xf32>
    %c0_97 = arith.constant 0 : index
    %c0_98 = arith.constant 0 : index
    %c0_99 = arith.constant 0 : index
    %209 = vector.load %arg17[%c0_97, %c0_98, %c0_99] : memref<2x1x64xf32, #tpu.memory_space<vmem>>, vector<1x1x64xf32>
    %210 = vector.shape_cast %209 : vector<1x1x64xf32> to vector<1x64xf32>
    %c0_100 = arith.constant 0 : index
    %c0_101 = arith.constant 0 : index
    %c0_102 = arith.constant 0 : index
    %211 = vector.load %arg18[%c0_100, %c0_101, %c0_102] : memref<2x1x64xf32, #tpu.memory_space<vmem>>, vector<1x1x64xf32>
    %212 = vector.shape_cast %211 : vector<1x1x64xf32> to vector<1x64xf32>
    %cst_103 = arith.constant dense<0.000000e+00> : vector<32xf32>
    %213 = vector.multi_reduction <add>, %208, %cst_103 [1] : vector<32x64xf32> to vector<32xf32>
    %214 = vector.shape_cast %213 : vector<32xf32> to vector<32x1xf32>
    %cst_104 = arith.constant 6.400000e+01 : f32
    %215 = vector.broadcast %cst_104 : f32 to vector<32x1xf32>
    %216 = arith.divf %214, %215 : vector<32x1xf32>
    %217 = vector.broadcast %216 : vector<32x1xf32> to vector<32x64xf32>
    %218 = arith.subf %208, %217 : vector<32x64xf32>
    %219 = arith.mulf %218, %218 : vector<32x64xf32>
    %cst_105 = arith.constant dense<0.000000e+00> : vector<32xf32>
    %220 = vector.multi_reduction <add>, %219, %cst_105 [1] : vector<32x64xf32> to vector<32xf32>
    %221 = vector.shape_cast %220 : vector<32xf32> to vector<32x1xf32>
    %cst_106 = arith.constant 6.400000e+01 : f32
    %222 = vector.broadcast %cst_106 : f32 to vector<32x1xf32>
    %223 = arith.divf %221, %222 : vector<32x1xf32>
    %224 = vector.broadcast %216 : vector<32x1xf32> to vector<32x64xf32>
    %225 = arith.subf %208, %224 : vector<32x64xf32>
    %cst_107 = arith.constant 1.000000e-07 : f32
    %226 = vector.broadcast %cst_107 : f32 to vector<32x1xf32>
    %227 = arith.addf %223, %226 : vector<32x1xf32>
    %228 = math.rsqrt %227 : vector<32x1xf32>
    %229 = vector.broadcast %228 : vector<32x1xf32> to vector<32x64xf32>
    %230 = arith.mulf %225, %229 : vector<32x64xf32>
    %231 = vector.broadcast %210 : vector<1x64xf32> to vector<32x64xf32>
    %232 = arith.mulf %230, %231 : vector<32x64xf32>
    %233 = vector.broadcast %212 : vector<1x64xf32> to vector<32x64xf32>
    %234 = arith.addf %232, %233 : vector<32x64xf32>
    %235 = arith.truncf %234 : vector<32x64xf32> to vector<32x64xbf16>
    %c1_108 = arith.constant 1 : index
    %c0_109 = arith.constant 0 : index
    %c0_110 = arith.constant 0 : index
    %236 = vector.load %arg7[%c1_108, %c0_109, %c0_110] : memref<2x64x192xbf16, #tpu.memory_space<vmem>>, vector<1x64x192xbf16>
    %237 = vector.shape_cast %236 : vector<1x64x192xbf16> to vector<64x192xbf16>
    %cst_111 = arith.constant dense<0.000000e+00> : vector<32x192xf32>
    %238 = tpu.matmul %235, %237, %cst_111 {dimension_numbers = #tpu.dot_dimension_numbers<[1], [0], [0], [1], [0, 0, 1, 1], [], []>} : vector<32x64xbf16>, vector<64x192xbf16>, vector<32x192xf32> -> vector<32x192xf32>
    %c1_112 = arith.constant 1 : index
    %c0_113 = arith.constant 0 : index
    %c0_114 = arith.constant 0 : index
    %239 = vector.load %arg8[%c1_112, %c0_113, %c0_114] : memref<2x1x192xf32, #tpu.memory_space<vmem>>, vector<1x1x192xf32>
    %240 = vector.shape_cast %239 : vector<1x1x192xf32> to vector<1x192xf32>
    %241 = vector.broadcast %240 : vector<1x192xf32> to vector<32x192xf32>
    %242 = arith.addf %238, %241 : vector<32x192xf32>
    %243 = vector.extract_strided_slice %242 {offsets = [0, 0], sizes = [32, 64], strides = [1, 1]} : vector<32x192xf32> to vector<32x64xf32>
    %244 = vector.extract_strided_slice %242 {offsets = [0, 64], sizes = [32, 64], strides = [1, 1]} : vector<32x192xf32> to vector<32x64xf32>
    %245 = vector.extract_strided_slice %242 {offsets = [0, 128], sizes = [32, 64], strides = [1, 1]} : vector<32x192xf32> to vector<32x64xf32>
    %246 = vector.extract_strided_slice %243 {offsets = [0, 0], sizes = [16, 16], strides = [1, 1]} : vector<32x64xf32> to vector<16x16xf32>
    %247 = vector.extract_strided_slice %244 {offsets = [0, 0], sizes = [16, 16], strides = [1, 1]} : vector<32x64xf32> to vector<16x16xf32>
    %cst_115 = arith.constant dense<0.000000e+00> : vector<16x16xf32>
    %248 = tpu.matmul %246, %247, %cst_115 {dimension_numbers = #tpu.dot_dimension_numbers<[1], [1], [0], [0], [0, 0, 1, 0], [], []>} : vector<16x16xf32>, vector<16x16xf32>, vector<16x16xf32> -> vector<16x16xf32>
    %249 = vector.extract_strided_slice %243 {offsets = [0, 16], sizes = [16, 16], strides = [1, 1]} : vector<32x64xf32> to vector<16x16xf32>
    %250 = vector.extract_strided_slice %244 {offsets = [0, 16], sizes = [16, 16], strides = [1, 1]} : vector<32x64xf32> to vector<16x16xf32>
    %cst_116 = arith.constant dense<0.000000e+00> : vector<16x16xf32>
    %251 = tpu.matmul %249, %250, %cst_116 {dimension_numbers = #tpu.dot_dimension_numbers<[1], [1], [0], [0], [0, 0, 1, 0], [], []>} : vector<16x16xf32>, vector<16x16xf32>, vector<16x16xf32> -> vector<16x16xf32>
    %252 = vector.extract_strided_slice %243 {offsets = [0, 32], sizes = [16, 16], strides = [1, 1]} : vector<32x64xf32> to vector<16x16xf32>
    %253 = vector.extract_strided_slice %244 {offsets = [0, 32], sizes = [16, 16], strides = [1, 1]} : vector<32x64xf32> to vector<16x16xf32>
    %cst_117 = arith.constant dense<0.000000e+00> : vector<16x16xf32>
    %254 = tpu.matmul %252, %253, %cst_117 {dimension_numbers = #tpu.dot_dimension_numbers<[1], [1], [0], [0], [0, 0, 1, 0], [], []>} : vector<16x16xf32>, vector<16x16xf32>, vector<16x16xf32> -> vector<16x16xf32>
    %255 = vector.extract_strided_slice %243 {offsets = [0, 48], sizes = [16, 16], strides = [1, 1]} : vector<32x64xf32> to vector<16x16xf32>
    %256 = vector.extract_strided_slice %244 {offsets = [0, 48], sizes = [16, 16], strides = [1, 1]} : vector<32x64xf32> to vector<16x16xf32>
    %cst_118 = arith.constant dense<0.000000e+00> : vector<16x16xf32>
    %257 = tpu.matmul %255, %256, %cst_118 {dimension_numbers = #tpu.dot_dimension_numbers<[1], [1], [0], [0], [0, 0, 1, 0], [], []>} : vector<16x16xf32>, vector<16x16xf32>, vector<16x16xf32> -> vector<16x16xf32>
    %258 = vector.extract_strided_slice %243 {offsets = [16, 0], sizes = [16, 16], strides = [1, 1]} : vector<32x64xf32> to vector<16x16xf32>
    %259 = vector.extract_strided_slice %244 {offsets = [16, 0], sizes = [16, 16], strides = [1, 1]} : vector<32x64xf32> to vector<16x16xf32>
    %cst_119 = arith.constant dense<0.000000e+00> : vector<16x16xf32>
    %260 = tpu.matmul %258, %259, %cst_119 {dimension_numbers = #tpu.dot_dimension_numbers<[1], [1], [0], [0], [0, 0, 1, 0], [], []>} : vector<16x16xf32>, vector<16x16xf32>, vector<16x16xf32> -> vector<16x16xf32>
    %261 = vector.extract_strided_slice %243 {offsets = [16, 16], sizes = [16, 16], strides = [1, 1]} : vector<32x64xf32> to vector<16x16xf32>
    %262 = vector.extract_strided_slice %244 {offsets = [16, 16], sizes = [16, 16], strides = [1, 1]} : vector<32x64xf32> to vector<16x16xf32>
    %cst_120 = arith.constant dense<0.000000e+00> : vector<16x16xf32>
    %263 = tpu.matmul %261, %262, %cst_120 {dimension_numbers = #tpu.dot_dimension_numbers<[1], [1], [0], [0], [0, 0, 1, 0], [], []>} : vector<16x16xf32>, vector<16x16xf32>, vector<16x16xf32> -> vector<16x16xf32>
    %264 = vector.extract_strided_slice %243 {offsets = [16, 32], sizes = [16, 16], strides = [1, 1]} : vector<32x64xf32> to vector<16x16xf32>
    %265 = vector.extract_strided_slice %244 {offsets = [16, 32], sizes = [16, 16], strides = [1, 1]} : vector<32x64xf32> to vector<16x16xf32>
    %cst_121 = arith.constant dense<0.000000e+00> : vector<16x16xf32>
    %266 = tpu.matmul %264, %265, %cst_121 {dimension_numbers = #tpu.dot_dimension_numbers<[1], [1], [0], [0], [0, 0, 1, 0], [], []>} : vector<16x16xf32>, vector<16x16xf32>, vector<16x16xf32> -> vector<16x16xf32>
    %267 = vector.extract_strided_slice %243 {offsets = [16, 48], sizes = [16, 16], strides = [1, 1]} : vector<32x64xf32> to vector<16x16xf32>
    %268 = vector.extract_strided_slice %244 {offsets = [16, 48], sizes = [16, 16], strides = [1, 1]} : vector<32x64xf32> to vector<16x16xf32>
    %cst_122 = arith.constant dense<0.000000e+00> : vector<16x16xf32>
    %269 = tpu.matmul %267, %268, %cst_122 {dimension_numbers = #tpu.dot_dimension_numbers<[1], [1], [0], [0], [0, 0, 1, 0], [], []>} : vector<16x16xf32>, vector<16x16xf32>, vector<16x16xf32> -> vector<16x16xf32>
    %270 = tpu.concatenate %248, %251, %254, %257, %260, %263, %266, %269 in 0 : vector<16x16xf32>, vector<16x16xf32>, vector<16x16xf32>, vector<16x16xf32>, vector<16x16xf32>, vector<16x16xf32>, vector<16x16xf32>, vector<16x16xf32> -> vector<128x16xf32>
    %271 = arith.addf %270, %69 : vector<128x16xf32>
    %cst_123 = arith.constant dense<0xFF800000> : vector<128xf32>
    %272 = vector.multi_reduction <maximumf>, %271, %cst_123 [1] : vector<128x16xf32> to vector<128xf32>
    %273 = vector.shape_cast %272 : vector<128xf32> to vector<128x1xf32>
    %274 = vector.broadcast %273 : vector<128x1xf32> to vector<128x16xf32>
    %275 = arith.subf %271, %274 : vector<128x16xf32>
    %276 = math.exp %275 : vector<128x16xf32>
    %cst_124 = arith.constant dense<0.000000e+00> : vector<128xf32>
    %277 = vector.multi_reduction <add>, %276, %cst_124 [1] : vector<128x16xf32> to vector<128xf32>
    %278 = vector.shape_cast %277 : vector<128xf32> to vector<128x1xf32>
    %279 = tpu.reciprocal %278 {approx = true} : vector<128x1xf32> -> vector<128x1xf32>
    %280 = vector.broadcast %279 : vector<128x1xf32> to vector<128x16xf32>
    %281 = arith.mulf %276, %280 : vector<128x16xf32>
    %282 = vector.extract_strided_slice %281 {offsets = [0, 0], sizes = [16, 16], strides = [1, 1]} : vector<128x16xf32> to vector<16x16xf32>
    %283 = vector.extract_strided_slice %245 {offsets = [0, 0], sizes = [16, 16], strides = [1, 1]} : vector<32x64xf32> to vector<16x16xf32>
    %cst_125 = arith.constant dense<0.000000e+00> : vector<16x16xf32>
    %284 = tpu.matmul %282, %283, %cst_125 {dimension_numbers = #tpu.dot_dimension_numbers<[1], [0], [0], [1], [0, 0, 1, 1], [], []>} : vector<16x16xf32>, vector<16x16xf32>, vector<16x16xf32> -> vector<16x16xf32>
    %285 = vector.extract_strided_slice %281 {offsets = [16, 0], sizes = [16, 16], strides = [1, 1]} : vector<128x16xf32> to vector<16x16xf32>
    %286 = vector.extract_strided_slice %245 {offsets = [0, 16], sizes = [16, 16], strides = [1, 1]} : vector<32x64xf32> to vector<16x16xf32>
    %cst_126 = arith.constant dense<0.000000e+00> : vector<16x16xf32>
    %287 = tpu.matmul %285, %286, %cst_126 {dimension_numbers = #tpu.dot_dimension_numbers<[1], [0], [0], [1], [0, 0, 1, 1], [], []>} : vector<16x16xf32>, vector<16x16xf32>, vector<16x16xf32> -> vector<16x16xf32>
    %288 = vector.extract_strided_slice %281 {offsets = [32, 0], sizes = [16, 16], strides = [1, 1]} : vector<128x16xf32> to vector<16x16xf32>
    %289 = vector.extract_strided_slice %245 {offsets = [0, 32], sizes = [16, 16], strides = [1, 1]} : vector<32x64xf32> to vector<16x16xf32>
    %cst_127 = arith.constant dense<0.000000e+00> : vector<16x16xf32>
    %290 = tpu.matmul %288, %289, %cst_127 {dimension_numbers = #tpu.dot_dimension_numbers<[1], [0], [0], [1], [0, 0, 1, 1], [], []>} : vector<16x16xf32>, vector<16x16xf32>, vector<16x16xf32> -> vector<16x16xf32>
    %291 = vector.extract_strided_slice %281 {offsets = [48, 0], sizes = [16, 16], strides = [1, 1]} : vector<128x16xf32> to vector<16x16xf32>
    %292 = vector.extract_strided_slice %245 {offsets = [0, 48], sizes = [16, 16], strides = [1, 1]} : vector<32x64xf32> to vector<16x16xf32>
    %cst_128 = arith.constant dense<0.000000e+00> : vector<16x16xf32>
    %293 = tpu.matmul %291, %292, %cst_128 {dimension_numbers = #tpu.dot_dimension_numbers<[1], [0], [0], [1], [0, 0, 1, 1], [], []>} : vector<16x16xf32>, vector<16x16xf32>, vector<16x16xf32> -> vector<16x16xf32>
    %294 = tpu.concatenate %284, %287, %290, %293 in 1 : vector<16x16xf32>, vector<16x16xf32>, vector<16x16xf32>, vector<16x16xf32> -> vector<16x64xf32>
    %295 = vector.extract_strided_slice %281 {offsets = [64, 0], sizes = [16, 16], strides = [1, 1]} : vector<128x16xf32> to vector<16x16xf32>
    %296 = vector.extract_strided_slice %245 {offsets = [16, 0], sizes = [16, 16], strides = [1, 1]} : vector<32x64xf32> to vector<16x16xf32>
    %cst_129 = arith.constant dense<0.000000e+00> : vector<16x16xf32>
    %297 = tpu.matmul %295, %296, %cst_129 {dimension_numbers = #tpu.dot_dimension_numbers<[1], [0], [0], [1], [0, 0, 1, 1], [], []>} : vector<16x16xf32>, vector<16x16xf32>, vector<16x16xf32> -> vector<16x16xf32>
    %298 = vector.extract_strided_slice %281 {offsets = [80, 0], sizes = [16, 16], strides = [1, 1]} : vector<128x16xf32> to vector<16x16xf32>
    %299 = vector.extract_strided_slice %245 {offsets = [16, 16], sizes = [16, 16], strides = [1, 1]} : vector<32x64xf32> to vector<16x16xf32>
    %cst_130 = arith.constant dense<0.000000e+00> : vector<16x16xf32>
    %300 = tpu.matmul %298, %299, %cst_130 {dimension_numbers = #tpu.dot_dimension_numbers<[1], [0], [0], [1], [0, 0, 1, 1], [], []>} : vector<16x16xf32>, vector<16x16xf32>, vector<16x16xf32> -> vector<16x16xf32>
    %301 = vector.extract_strided_slice %281 {offsets = [96, 0], sizes = [16, 16], strides = [1, 1]} : vector<128x16xf32> to vector<16x16xf32>
    %302 = vector.extract_strided_slice %245 {offsets = [16, 32], sizes = [16, 16], strides = [1, 1]} : vector<32x64xf32> to vector<16x16xf32>
    %cst_131 = arith.constant dense<0.000000e+00> : vector<16x16xf32>
    %303 = tpu.matmul %301, %302, %cst_131 {dimension_numbers = #tpu.dot_dimension_numbers<[1], [0], [0], [1], [0, 0, 1, 1], [], []>} : vector<16x16xf32>, vector<16x16xf32>, vector<16x16xf32> -> vector<16x16xf32>
    %304 = vector.extract_strided_slice %281 {offsets = [112, 0], sizes = [16, 16], strides = [1, 1]} : vector<128x16xf32> to vector<16x16xf32>
    %305 = vector.extract_strided_slice %245 {offsets = [16, 48], sizes = [16, 16], strides = [1, 1]} : vector<32x64xf32> to vector<16x16xf32>
    %cst_132 = arith.constant dense<0.000000e+00> : vector<16x16xf32>
    %306 = tpu.matmul %304, %305, %cst_132 {dimension_numbers = #tpu.dot_dimension_numbers<[1], [0], [0], [1], [0, 0, 1, 1], [], []>} : vector<16x16xf32>, vector<16x16xf32>, vector<16x16xf32> -> vector<16x16xf32>
    %307 = tpu.concatenate %297, %300, %303, %306 in 1 : vector<16x16xf32>, vector<16x16xf32>, vector<16x16xf32>, vector<16x16xf32> -> vector<16x64xf32>
    %308 = tpu.concatenate %294, %307 in 0 : vector<16x64xf32>, vector<16x64xf32> -> vector<32x64xf32>
    %309 = arith.truncf %308 : vector<32x64xf32> to vector<32x64xbf16>
    %c1_133 = arith.constant 1 : index
    %c0_134 = arith.constant 0 : index
    %c0_135 = arith.constant 0 : index
    %310 = vector.load %arg9[%c1_133, %c0_134, %c0_135] : memref<2x64x64xbf16, #tpu.memory_space<vmem>>, vector<1x64x64xbf16>
    %311 = vector.shape_cast %310 : vector<1x64x64xbf16> to vector<64x64xbf16>
    %cst_136 = arith.constant dense<0.000000e+00> : vector<32x64xf32>
    %312 = tpu.matmul %309, %311, %cst_136 {dimension_numbers = #tpu.dot_dimension_numbers<[1], [0], [0], [1], [0, 0, 1, 1], [], []>} : vector<32x64xbf16>, vector<64x64xbf16>, vector<32x64xf32> -> vector<32x64xf32>
    %c1_137 = arith.constant 1 : index
    %c0_138 = arith.constant 0 : index
    %c0_139 = arith.constant 0 : index
    %313 = vector.load %arg10[%c1_137, %c0_138, %c0_139] : memref<2x1x64xf32, #tpu.memory_space<vmem>>, vector<1x1x64xf32>
    %314 = vector.shape_cast %313 : vector<1x1x64xf32> to vector<1x64xf32>
    %315 = vector.broadcast %314 : vector<1x64xf32> to vector<32x64xf32>
    %316 = arith.addf %312, %315 : vector<32x64xf32>
    %317 = arith.addf %316, %234 : vector<32x64xf32>
    %c1_140 = arith.constant 1 : index
    %c0_141 = arith.constant 0 : index
    %c0_142 = arith.constant 0 : index
    %318 = vector.load %arg11[%c1_140, %c0_141, %c0_142] : memref<2x1x64xf32, #tpu.memory_space<vmem>>, vector<1x1x64xf32>
    %319 = vector.shape_cast %318 : vector<1x1x64xf32> to vector<1x64xf32>
    %c1_143 = arith.constant 1 : index
    %c0_144 = arith.constant 0 : index
    %c0_145 = arith.constant 0 : index
    %320 = vector.load %arg12[%c1_143, %c0_144, %c0_145] : memref<2x1x64xf32, #tpu.memory_space<vmem>>, vector<1x1x64xf32>
    %321 = vector.shape_cast %320 : vector<1x1x64xf32> to vector<1x64xf32>
    %cst_146 = arith.constant dense<0.000000e+00> : vector<32xf32>
    %322 = vector.multi_reduction <add>, %317, %cst_146 [1] : vector<32x64xf32> to vector<32xf32>
    %323 = vector.shape_cast %322 : vector<32xf32> to vector<32x1xf32>
    %cst_147 = arith.constant 6.400000e+01 : f32
    %324 = vector.broadcast %cst_147 : f32 to vector<32x1xf32>
    %325 = arith.divf %323, %324 : vector<32x1xf32>
    %326 = vector.broadcast %325 : vector<32x1xf32> to vector<32x64xf32>
    %327 = arith.subf %317, %326 : vector<32x64xf32>
    %328 = arith.mulf %327, %327 : vector<32x64xf32>
    %cst_148 = arith.constant dense<0.000000e+00> : vector<32xf32>
    %329 = vector.multi_reduction <add>, %328, %cst_148 [1] : vector<32x64xf32> to vector<32xf32>
    %330 = vector.shape_cast %329 : vector<32xf32> to vector<32x1xf32>
    %cst_149 = arith.constant 6.400000e+01 : f32
    %331 = vector.broadcast %cst_149 : f32 to vector<32x1xf32>
    %332 = arith.divf %330, %331 : vector<32x1xf32>
    %333 = vector.broadcast %325 : vector<32x1xf32> to vector<32x64xf32>
    %334 = arith.subf %317, %333 : vector<32x64xf32>
    %cst_150 = arith.constant 1.000000e-07 : f32
    %335 = vector.broadcast %cst_150 : f32 to vector<32x1xf32>
    %336 = arith.addf %332, %335 : vector<32x1xf32>
    %337 = math.rsqrt %336 : vector<32x1xf32>
    %338 = vector.broadcast %337 : vector<32x1xf32> to vector<32x64xf32>
    %339 = arith.mulf %334, %338 : vector<32x64xf32>
    %340 = vector.broadcast %319 : vector<1x64xf32> to vector<32x64xf32>
    %341 = arith.mulf %339, %340 : vector<32x64xf32>
    %342 = vector.broadcast %321 : vector<1x64xf32> to vector<32x64xf32>
    %343 = arith.addf %341, %342 : vector<32x64xf32>
    %344 = arith.truncf %343 : vector<32x64xf32> to vector<32x64xbf16>
    %c1_151 = arith.constant 1 : index
    %c0_152 = arith.constant 0 : index
    %c0_153 = arith.constant 0 : index
    %345 = vector.load %arg13[%c1_151, %c0_152, %c0_153] : memref<2x64x128xbf16, #tpu.memory_space<vmem>>, vector<1x64x128xbf16>
    %346 = vector.shape_cast %345 : vector<1x64x128xbf16> to vector<64x128xbf16>
    %cst_154 = arith.constant dense<0.000000e+00> : vector<32x128xf32>
    %347 = tpu.matmul %344, %346, %cst_154 {dimension_numbers = #tpu.dot_dimension_numbers<[1], [0], [0], [1], [0, 0, 1, 1], [], []>} : vector<32x64xbf16>, vector<64x128xbf16>, vector<32x128xf32> -> vector<32x128xf32>
    %c1_155 = arith.constant 1 : index
    %c0_156 = arith.constant 0 : index
    %c0_157 = arith.constant 0 : index
    %348 = vector.load %arg14[%c1_155, %c0_156, %c0_157] : memref<2x1x128xf32, #tpu.memory_space<vmem>>, vector<1x1x128xf32>
    %349 = vector.shape_cast %348 : vector<1x1x128xf32> to vector<1x128xf32>
    %350 = vector.broadcast %349 : vector<1x128xf32> to vector<32x128xf32>
    %351 = arith.addf %347, %350 : vector<32x128xf32>
    %cst_158 = arith.constant 5.000000e-01 : f32
    %352 = vector.broadcast %cst_158 : f32 to vector<32x128xf32>
    %353 = arith.mulf %352, %351 : vector<32x128xf32>
    %cst_159 = arith.constant 4.471500e-02 : f32
    %354 = vector.broadcast %cst_159 : f32 to vector<32x128xf32>
    %355 = arith.mulf %354, %351 : vector<32x128xf32>
    %356 = arith.mulf %355, %351 : vector<32x128xf32>
    %357 = arith.mulf %356, %351 : vector<32x128xf32>
    %358 = arith.addf %351, %357 : vector<32x128xf32>
    %cst_160 = arith.constant 0.797884583 : f32
    %359 = vector.broadcast %cst_160 : f32 to vector<32x128xf32>
    %360 = arith.mulf %359, %358 : vector<32x128xf32>
    %361 = math.tanh %360 : vector<32x128xf32>
    %cst_161 = arith.constant 1.000000e+00 : f32
    %362 = vector.broadcast %cst_161 : f32 to vector<32x128xf32>
    %363 = arith.addf %362, %361 : vector<32x128xf32>
    %364 = arith.mulf %353, %363 : vector<32x128xf32>
    %365 = arith.truncf %364 : vector<32x128xf32> to vector<32x128xbf16>
    %c1_162 = arith.constant 1 : index
    %c0_163 = arith.constant 0 : index
    %c0_164 = arith.constant 0 : index
    %366 = vector.load %arg15[%c1_162, %c0_163, %c0_164] : memref<2x128x64xbf16, #tpu.memory_space<vmem>>, vector<1x128x64xbf16>
    %367 = vector.shape_cast %366 : vector<1x128x64xbf16> to vector<128x64xbf16>
    %cst_165 = arith.constant dense<0.000000e+00> : vector<32x64xf32>
    %368 = tpu.matmul %365, %367, %cst_165 {dimension_numbers = #tpu.dot_dimension_numbers<[1], [0], [0], [1], [0, 0, 1, 1], [], []>} : vector<32x128xbf16>, vector<128x64xbf16>, vector<32x64xf32> -> vector<32x64xf32>
    %c1_166 = arith.constant 1 : index
    %c0_167 = arith.constant 0 : index
    %c0_168 = arith.constant 0 : index
    %369 = vector.load %arg16[%c1_166, %c0_167, %c0_168] : memref<2x1x64xf32, #tpu.memory_space<vmem>>, vector<1x1x64xf32>
    %370 = vector.shape_cast %369 : vector<1x1x64xf32> to vector<1x64xf32>
    %371 = vector.broadcast %370 : vector<1x64xf32> to vector<32x64xf32>
    %372 = arith.addf %368, %371 : vector<32x64xf32>
    %373 = arith.addf %372, %343 : vector<32x64xf32>
    %c1_169 = arith.constant 1 : index
    %c0_170 = arith.constant 0 : index
    %c0_171 = arith.constant 0 : index
    %374 = vector.load %arg17[%c1_169, %c0_170, %c0_171] : memref<2x1x64xf32, #tpu.memory_space<vmem>>, vector<1x1x64xf32>
    %375 = vector.shape_cast %374 : vector<1x1x64xf32> to vector<1x64xf32>
    %c1_172 = arith.constant 1 : index
    %c0_173 = arith.constant 0 : index
    %c0_174 = arith.constant 0 : index
    %376 = vector.load %arg18[%c1_172, %c0_173, %c0_174] : memref<2x1x64xf32, #tpu.memory_space<vmem>>, vector<1x1x64xf32>
    %377 = vector.shape_cast %376 : vector<1x1x64xf32> to vector<1x64xf32>
    %cst_175 = arith.constant dense<0.000000e+00> : vector<32xf32>
    %378 = vector.multi_reduction <add>, %373, %cst_175 [1] : vector<32x64xf32> to vector<32xf32>
    %379 = vector.shape_cast %378 : vector<32xf32> to vector<32x1xf32>
    %cst_176 = arith.constant 6.400000e+01 : f32
    %380 = vector.broadcast %cst_176 : f32 to vector<32x1xf32>
    %381 = arith.divf %379, %380 : vector<32x1xf32>
    %382 = vector.broadcast %381 : vector<32x1xf32> to vector<32x64xf32>
    %383 = arith.subf %373, %382 : vector<32x64xf32>
    %384 = arith.mulf %383, %383 : vector<32x64xf32>
    %cst_177 = arith.constant dense<0.000000e+00> : vector<32xf32>
    %385 = vector.multi_reduction <add>, %384, %cst_177 [1] : vector<32x64xf32> to vector<32xf32>
    %386 = vector.shape_cast %385 : vector<32xf32> to vector<32x1xf32>
    %cst_178 = arith.constant 6.400000e+01 : f32
    %387 = vector.broadcast %cst_178 : f32 to vector<32x1xf32>
    %388 = arith.divf %386, %387 : vector<32x1xf32>
    %389 = vector.broadcast %381 : vector<32x1xf32> to vector<32x64xf32>
    %390 = arith.subf %373, %389 : vector<32x64xf32>
    %cst_179 = arith.constant 1.000000e-07 : f32
    %391 = vector.broadcast %cst_179 : f32 to vector<32x1xf32>
    %392 = arith.addf %388, %391 : vector<32x1xf32>
    %393 = math.rsqrt %392 : vector<32x1xf32>
    %394 = vector.broadcast %393 : vector<32x1xf32> to vector<32x64xf32>
    %395 = arith.mulf %390, %394 : vector<32x64xf32>
    %396 = vector.broadcast %375 : vector<1x64xf32> to vector<32x64xf32>
    %397 = arith.mulf %395, %396 : vector<32x64xf32>
    %398 = vector.broadcast %377 : vector<1x64xf32> to vector<32x64xf32>
    %399 = arith.addf %397, %398 : vector<32x64xf32>
    %400 = vector.extract_strided_slice %399 {offsets = [0, 0], sizes = [1, 64], strides = [1, 1]} : vector<32x64xf32> to vector<1x64xf32>
    %401 = vector.extract_strided_slice %399 {offsets = [16, 0], sizes = [1, 64], strides = [1, 1]} : vector<32x64xf32> to vector<1x64xf32>
    %402 = tpu.concatenate %400, %401 in 0 : vector<1x64xf32>, vector<1x64xf32> -> vector<2x64xf32>
    %403 = arith.truncf %402 : vector<2x64xf32> to vector<2x64xbf16>
    %c0_180 = arith.constant 0 : index
    %c0_181 = arith.constant 0 : index
    %404 = vector.load %arg19[%c0_180, %c0_181] : memref<64x64xbf16, #tpu.memory_space<vmem>>, vector<64x64xbf16>
    %cst_182 = arith.constant dense<0.000000e+00> : vector<2x64xf32>
    %405 = tpu.matmul %403, %404, %cst_182 {dimension_numbers = #tpu.dot_dimension_numbers<[1], [0], [0], [1], [0, 0, 1, 1], [], []>} : vector<2x64xbf16>, vector<64x64xbf16>, vector<2x64xf32> -> vector<2x64xf32>
    %c0_183 = arith.constant 0 : index
    %c0_184 = arith.constant 0 : index
    %406 = vector.load %arg20[%c0_183, %c0_184] : memref<1x64xf32, #tpu.memory_space<vmem>>, vector<1x64xf32>
    %407 = vector.broadcast %406 : vector<1x64xf32> to vector<2x64xf32>
    %408 = arith.addf %405, %407 : vector<2x64xf32>
    %cst_185 = arith.constant 5.000000e-01 : f32
    %409 = vector.broadcast %cst_185 : f32 to vector<2x64xf32>
    %410 = arith.mulf %409, %408 : vector<2x64xf32>
    %cst_186 = arith.constant 4.471500e-02 : f32
    %411 = vector.broadcast %cst_186 : f32 to vector<2x64xf32>
    %412 = arith.mulf %411, %408 : vector<2x64xf32>
    %413 = arith.mulf %412, %408 : vector<2x64xf32>
    %414 = arith.mulf %413, %408 : vector<2x64xf32>
    %415 = arith.addf %408, %414 : vector<2x64xf32>
    %cst_187 = arith.constant 0.797884583 : f32
    %416 = vector.broadcast %cst_187 : f32 to vector<2x64xf32>
    %417 = arith.mulf %416, %415 : vector<2x64xf32>
    %418 = math.tanh %417 : vector<2x64xf32>
    %cst_188 = arith.constant 1.000000e+00 : f32
    %419 = vector.broadcast %cst_188 : f32 to vector<2x64xf32>
    %420 = arith.addf %419, %418 : vector<2x64xf32>
    %421 = arith.mulf %410, %420 : vector<2x64xf32>
    %422 = vector.shape_cast %421 : vector<2x64xf32> to vector<2x1x64xf32>
    %c0_189 = arith.constant 0 : index
    %c0_190 = arith.constant 0 : index
    %c0_191 = arith.constant 0 : index
    %423 = vector.load %arg21[%c0_189, %c0_190, %c0_191] : memref<2x1x64xf32, #tpu.memory_space<vmem>>, vector<2x1x64xf32>
    tpu.vector_store %arg21[%c0_189, %c0_190, %c0_191], %422 {strides = array<i32>} : memref<2x1x64xf32, #tpu.memory_space<vmem>>, vector<2x1x64xf32>,
    return
  }
}

</mosaic_0001>

<bundles_post_ra>
// kernel: deberta_forward.1
= control target key start
LH: loop header
LB: loop body
LE: loop exit
PB: predicated region body
PF: predicated region fallthrough
CT: control target
= control target key end

     0   :  { %s8439_s0 = inlined_call_operand.vmem [shape: s32[2,16,1], index: 0, kind: input, shape index: {}]   ;;  %s8440_s1 = inlined_call_operand.vmem [shape: f32[2,1,16], index: 1, kind: input, shape index: {}]   ;;  %s8441_s2 = inlined_call_operand.vmem [shape: f32[2,16,1], index: 2, kind: input, shape index: {}]   ;;  %s8442_s3 = inlined_call_operand.vmem [shape: f32[64,64], index: 3, kind: input, shape index: {}]   ;;  %s8443_s4 = inlined_call_operand.hbm [shape: f32[32,64], index: 4, kind: input, shape index: {}]   ;;  %s8444_s5 = inlined_call_operand.hbm [shape: f32[1,64], index: 5, kind: input, shape index: {}]   ;;  %s8445_s6 = inlined_call_operand.hbm [shape: f32[1,64], index: 6, kind: input, shape index: {}]   ;;  %s8446_s7 = inlined_call_operand.vmem [shape: bf16[2,64,192], index: 7, kind: input, shape index: {}]   ;;  %s8447_s8 = inlined_call_operand.hbm [shape: f32[2,1,192], index: 8, kind: input, shape index: {}]   ;;  %s8448_s9 = inlined_call_operand.vmem [shape: bf16[2,64,64], index: 9, kind: input, shape index: {}]   ;;  %s8449_s10 = inlined_call_operand.hbm [shape: f32[2,1,64], index: 10, kind: input, shape index: {}]   ;;  %s8450_s11 = inlined_call_operand.hbm [shape: f32[2,1,64], index: 11, kind: input, shape index: {}]   ;;  %s8451_s12 = inlined_call_operand.hbm [shape: f32[2,1,64], index: 12, kind: input, shape index: {}]   ;;  %s8452_s13 = inlined_call_operand.hbm [shape: bf16[2,64,128], index: 13, kind: input, shape index: {}]   ;;  %s8453_s14 = inlined_call_operand.hbm [shape: f32[2,1,128], index: 14, kind: input, shape index: {}]   ;;  %s8454_s15 = inlined_call_operand.vmem [shape: bf16[2,128,64], index: 15, kind: input, shape index: {}]   ;;  %s8455_s16 = inlined_call_operand.hbm [shape: f32[2,1,64], index: 16, kind: input, shape index: {}]   ;;  %s8456_s17 = inlined_call_operand.hbm [shape: f32[2,1,64], index: 17, kind: input, shape index: {}]   ;;  %s8457_s18 = inlined_call_operand.hbm [shape: f32[2,1,64], index: 18, kind: input, shape index: {}]   ;;  %s8458_s19 = inlined_call_operand.hbm [shape: bf16[64,64], index: 19, kind: input, shape index: {}]   ;;  %s8459_s20 = inlined_call_operand.hbm [shape: f32[1,64], index: 20, kind: input, shape index: {}]   ;;  %s8460_s21 = inlined_call_operand.hbm [shape: f32[2,1,64], index: 21, kind: output, shape index: {}]  }
   0x1   :  { %8470 = sst [smem:[#allocation35_spill]] %s8439_s0 }
   0x2   :  { %8471 = sst [smem:[#allocation36_spill]] %s8440_s1 }
   0x3   :  { %8472 = sst [smem:[#allocation37_spill]] %s8441_s2 }
   0x4   :  { %8473 = sst [smem:[#allocation38_spill]] %s8442_s3 }
   0x5   :  { %8474 = sst [smem:[#allocation39_spill]] %s8443_s4 }
   0x6   :  { %8475 = sst [smem:[#allocation40_spill]] %s8444_s5 }
   0x7   :  { %8476 = sst [smem:[#allocation41_spill]] %s8460_s21 }
   0x8   :  { %26 = vsyncpa [#allocation3], 0 }
   0x9   :  { %27 = vsyncpa [#allocation6], 0 }
   0xa   :  { %28 = vsyncpa [#allocation9], 0 }
   0xb   :  { %29 = vsyncpa [#allocation12], 0 }
   0xc   :  { %30 = vsyncpa [#allocation15], 0 }
   0xd   :  { %31 = vsyncpa [#allocation18], 0 }
   0xe   :  { %32 = vsyncpa [#allocation21], 0 }
   0xf   :  { %33 = vsyncpa [#allocation24], 0 }
  0x10   :  { %34 = vsyncpa [#allocation4], 0  ;;  %s7090_s2 = smov [#allocation5]   ;;  %s7091_s26 = smov [#allocation8]  }
  0x11   :  { %s61_s25 = sshll.u32 %s7090_s2, 4  ;;  %s82_s27 = sshll.u32 %s7091_s26, 4  ;;  %s62_s25 = int_to_ptr.vmem [resolvable:$true] %s61_s25  ;;  %s7231_s27 = int_to_ptr.vmem [resolvable:$true] %s82_s27 }
  0x12   :  { %s8477_s29 = sld [smem:[#allocation40_spill]] }
  0x18   :  { %s6742_s0 = scalar_lea.hbm %s8477_s29, 16 }
  0x19   :  { %p6743_p0 = scmp.ne.s32.totalorder %s8477_s29, %s6742_s0  ;;  %p6746_p1 = scmp.lt.u32.totalorder %s6742_s0, %s8477_s29 }
  0x1b   :  { %p6748_p2 = pnand %p6746_p1, %p6743_p0 }
  0x1d   :  { %6751 = shalt.err (!%p6748_p2)
}
  0x1e   :  { %s6752_s23 = scalar_lea.vmem %s62_s25, 16  ;;  %s6756_s1 = scalar_lea.vmem %s62_s25, 32 }
  0x1f   :  { %p6753_p3 = scmp.ne.s32.totalorder %s62_s25, %s6752_s23  ;;  %p6757_p4 = scmp.lt.s32.totalorder %s62_s25, %s62_s25 }
  0x20   :  { %p6758_p5 = scmp.lt.s32.totalorder %s6756_s1, %s6752_s23 }
  0x22   :  { %p6759_p6 = por %p6758_p5, %p6757_p4 }
  0x24   :  { %p6760_p7 = pnand %p6759_p6, %p6753_p3 }
  0x26   :  { %6763 = shalt.err (!%p6760_p7)
}
  0x27   :  { %64 = dma.hbm_to_vmem [thread:$0]  %s8477_s29, 16, %s62_s25, [#allocation6]  }
  0x28   :  { %s6764_s28 = scalar_lea.hbm %s8447_s8, 64 }
  0x29   :  { %p6765_p8 = scmp.ne.s32.totalorder %s8447_s8, %s6764_s28  ;;  %p6768_p9 = scmp.lt.u32.totalorder %s6764_s28, %s8447_s8 }
  0x2b   :  { %p6770_p10 = pnand %p6768_p9, %p6765_p8 }
  0x2d   :  { %6773 = shalt.err (!%p6770_p10)
}
  0x2e   :  { %s6774_s22 = scalar_lea.vmem %s7231_s27, 64  ;;  %p6779_p12 = scmp.lt.s32.totalorder %s7231_s27, %s7231_s27 }
  0x2f   :  { %p6775_p11 = scmp.ne.s32.totalorder %s7231_s27, %s6774_s22  ;;  %p6780_p13 = scmp.lt.s32.totalorder %s6774_s22, %s6774_s22 }
  0x31   :  { %p6781_p0 = por %p6780_p13, %p6779_p12 }
  0x33   :  { %p6782_p1 = pnand %p6781_p0, %p6775_p11 }
  0x35   :  { %6785 = shalt.err (!%p6782_p1)
}
  0x36   :  { %s8468_s25 = smov 32   ;;  %s7093_s29 = smov 2  }
  0x37   :  { %88 = dma.hbm_to_vmem [thread:$0]  %s8447_s8, 64, %s7231_s27, [#allocation9], %s8468_s25, %s8468_s25, %s7093_s29  }
  0x38   :  { %s7094_s24 = smov [#allocation11]   ;;  %s7095_s26 = smov [#allocation14]  }
  0x39   :  { %s108_s2 = sshll.u32 %s7094_s24, 4  ;;  %s132_s3 = sshll.u32 %s7095_s26, 4  ;;  %s109_s2 = int_to_ptr.vmem [resolvable:$true] %s108_s2  ;;  %s7264_s3 = int_to_ptr.vmem [resolvable:$true] %s132_s3 }
  0x3a   :  { %s6786_s0 = scalar_lea.hbm %s8450_s11, 32 }
  0x3b   :  { %p6787_p2 = scmp.ne.s32.totalorder %s8450_s11, %s6786_s0  ;;  %p6790_p3 = scmp.lt.u32.totalorder %s6786_s0, %s8450_s11 }
  0x3d   :  { %p6792_p4 = pnand %p6790_p3, %p6787_p2 }
  0x3f   :  { %6795 = shalt.err (!%p6792_p4)
}
  0x40   :  { %s6796_s8 = scalar_lea.vmem %s109_s2, 32  ;;  %p6801_p6 = scmp.lt.s32.totalorder %s109_s2, %s109_s2 }
  0x41   :  { %p6797_p5 = scmp.ne.s32.totalorder %s109_s2, %s6796_s8  ;;  %p6802_p7 = scmp.lt.s32.totalorder %s6796_s8, %s6796_s8 }
  0x43   :  { %p6803_p8 = por %p6802_p7, %p6801_p6 }
  0x45   :  { %p6804_p9 = pnand %p6803_p8, %p6797_p5 }
  0x47   :  { %6807 = shalt.err (!%p6804_p9)
}
  0x48   :  { %s7096_s27 = smov 16   ;;  %s7097_s29 = smov 1  }
  0x49   :  { %114 = dma.hbm_to_vmem [thread:$0]  %s8450_s11, 32, %s109_s2, [#allocation12], %s7096_s27, %s7096_s27, %s7097_s29  }
  0x4a   :  { %s6808_s26 = scalar_lea.hbm %s8452_s13, 1024 }
  0x4b   :  { %p6809_p10 = scmp.ne.s32.totalorder %s8452_s13, %s6808_s26  ;;  %p6812_p11 = scmp.lt.u32.totalorder %s6808_s26, %s8452_s13 }
  0x4d   :  { %p6814_p12 = pnand %p6812_p11, %p6809_p10 }
  0x4f   :  { %6817 = shalt.err (!%p6814_p12)
}
  0x50   :  { %s6818_s5 = scalar_lea.vmem %s7264_s3, 1024  ;;  %p6823_p0 = scmp.lt.s32.totalorder %s7264_s3, %s7264_s3 }
  0x51   :  { %p6819_p13 = scmp.ne.s32.totalorder %s7264_s3, %s6818_s5  ;;  %p6824_p1 = scmp.lt.s32.totalorder %s6818_s5, %s6818_s5 }
  0x53   :  { %p6825_p2 = por %p6824_p1, %p6823_p0 }
  0x55   :  { %p6826_p3 = pnand %p6825_p2, %p6819_p13 }
  0x57   :  { %6829 = shalt.err (!%p6826_p3)
}
  0x58   :  { %s7098_s11 = smov 64   ;;  %s7099_s2 = smov 4  }
  0x59   :  { %138 = dma.hbm_to_vmem [thread:$0]  %s8452_s13, 1024, %s7264_s3, [#allocation15], %s7098_s11, %s7098_s11, %s7099_s2  }
  0x5a   :  { %s7100_s23 = smov [#allocation17]   ;;  %s7101_s21 = smov [#allocation20]  }
  0x5b   :  { %s158_s1 = sshll.u32 %s7100_s23, 4  ;;  %s182_s24 = sshll.u32 %s7101_s21, 4  ;;  %s159_s1 = int_to_ptr.vmem [resolvable:$true] %s158_s1  ;;  %s7301_s24 = int_to_ptr.vmem [resolvable:$true] %s182_s24 }
  0x5c   :  { %s6830_s4 = scalar_lea.hbm %s8455_s16, 32 }
  0x5d   :  { %p6831_p4 = scmp.ne.s32.totalorder %s8455_s16, %s6830_s4  ;;  %p6834_p5 = scmp.lt.u32.totalorder %s6830_s4, %s8455_s16 }
  0x5f   :  { %p6836_p6 = pnand %p6834_p5, %p6831_p4 }
  0x61   :  { %6839 = shalt.err (!%p6836_p6)
}
  0x62   :  { %s6840_s13 = scalar_lea.vmem %s159_s1, 32  ;;  %p6845_p8 = scmp.lt.s32.totalorder %s159_s1, %s159_s1 }
  0x63   :  { %p6841_p7 = scmp.ne.s32.totalorder %s159_s1, %s6840_s13  ;;  %p6846_p9 = scmp.lt.s32.totalorder %s6840_s13, %s6840_s13 }
  0x65   :  { %p6847_p10 = por %p6846_p9, %p6845_p8 }
  0x67   :  { %p6848_p11 = pnand %p6847_p10, %p6841_p7 }
  0x69   :  { %6851 = shalt.err (!%p6848_p11)
}
  0x6a   :  { %164 = dma.hbm_to_vmem [thread:$0]  %s8455_s16, 32, %s159_s1, [#allocation18], %s7096_s27, %s7096_s27, %s7097_s29  }
  0x6b   :  { %s6852_s25 = scalar_lea.hbm %s8457_s18, 32 }
  0x6c   :  { %p6853_p12 = scmp.ne.s32.totalorder %s8457_s18, %s6852_s25  ;;  %p6856_p13 = scmp.lt.u32.totalorder %s6852_s25, %s8457_s18 }
  0x6e   :  { %p6858_p0 = pnand %p6856_p13, %p6853_p12 }
  0x70   :  { %6861 = shalt.err (!%p6858_p0)
}
  0x71   :  { %s6862_s0 = scalar_lea.vmem %s7301_s24, 32  ;;  %p6867_p2 = scmp.lt.s32.totalorder %s7301_s24, %s7301_s24 }
  0x72   :  { %p6863_p1 = scmp.ne.s32.totalorder %s7301_s24, %s6862_s0  ;;  %p6868_p3 = scmp.lt.s32.totalorder %s6862_s0, %s6862_s0 }
  0x74   :  { %p6869_p4 = por %p6868_p3, %p6867_p2 }
  0x76   :  { %p6870_p5 = pnand %p6869_p4, %p6863_p1 }
  0x78   :  { %6873 = shalt.err (!%p6870_p5)
}
  0x79   :  { %188 = dma.hbm_to_vmem [thread:$0]  %s8457_s18, 32, %s7301_s24, [#allocation21], %s7096_s27, %s7096_s27, %s7097_s29  }
  0x7a   :  { %s7102_s30 = smov [#allocation2]   ;;  %s8478_s22 = sld [smem:[#allocation39_spill]] }
  0x7b   :  { %s48_s5 = sshll.u32 %s7102_s30, 4  ;;  %s49_s5 = int_to_ptr.vmem [resolvable:$true] %s48_s5 }
  0x80   :  { %s6874_s8 = scalar_lea.hbm %s8478_s22, 512 }
  0x81   :  { %p6875_p6 = scmp.ne.s32.totalorder %s8478_s22, %s6874_s8  ;;  %p6878_p7 = scmp.lt.u32.totalorder %s6874_s8, %s8478_s22 }
  0x83   :  { %p6880_p8 = pnand %p6878_p7, %p6875_p6 }
  0x85   :  { %6883 = shalt.err (!%p6880_p8)
}
  0x86   :  { %s6884_s28 = scalar_lea.vmem %s49_s5, 512  ;;  %p6889_p10 = scmp.lt.s32.totalorder %s49_s5, %s49_s5 }
  0x87   :  { %p6885_p9 = scmp.ne.s32.totalorder %s49_s5, %s6884_s28  ;;  %p6890_p11 = scmp.lt.s32.totalorder %s6884_s28, %s6884_s28 }
  0x89   :  { %p6891_p12 = por %p6890_p11, %p6889_p10 }
  0x8b   :  { %p6892_p13 = pnand %p6891_p12, %p6885_p9 }
  0x8d   :  { %6895 = shalt.err (!%p6892_p13)
}
  0x8e   :  { %s7103_s18 = smov 128   ;;  %s7104_s24 = smov 8  }
  0x8f   :  { %54 = dma.hbm_to_vmem [thread:$0]  %s8478_s22, 512, %s49_s5, [#allocation3], %s7103_s18, %s7103_s18, %s7104_s24  }
  0x90   :  { %s7105_s16 = smov [#allocation7]   ;;  %s7106_s30 = smov [#allocation10]  }
  0x91   :  { %s71_s1 = sshll.u32 %s7105_s16, 4  ;;  %s96_s13 = sshll.u32 %s7106_s30, 4  ;;  %s72_s1 = int_to_ptr.vmem [resolvable:$true] %s71_s1  ;;  %s97_s13 = int_to_ptr.vmem [resolvable:$true] %s96_s13 }
  0x92   :  { %s6896_s23 = scalar_lea.hbm %s8445_s6, 16 }
  0x93   :  { %p6897_p0 = scmp.ne.s32.totalorder %s8445_s6, %s6896_s23  ;;  %p6900_p1 = scmp.lt.u32.totalorder %s6896_s23, %s8445_s6 }
  0x95   :  { %p6902_p2 = pnand %p6900_p1, %p6897_p0 }
  0x97   :  { %6905 = shalt.err (!%p6902_p2)
}
  0x98   :  { %s6906_s5 = scalar_lea.vmem %s72_s1, 16  ;;  %s6910_s22 = scalar_lea.vmem %s72_s1, 32 }
  0x99   :  { %p6907_p3 = scmp.ne.s32.totalorder %s72_s1, %s6906_s5  ;;  %p6911_p4 = scmp.lt.s32.totalorder %s72_s1, %s72_s1 }
  0x9a   :  { %p6912_p5 = scmp.lt.s32.totalorder %s6910_s22, %s6906_s5 }
  0x9c   :  { %p6913_p6 = por %p6912_p5, %p6911_p4 }
  0x9e   :  { %p6914_p7 = pnand %p6913_p6, %p6907_p3 }
  0xa0   :  { %6917 = shalt.err (!%p6914_p7)
}
  0xa1   :  { %74 = dma.hbm_to_vmem [thread:$0]  %s8445_s6, 16, %s72_s1, [#allocation6]  }
  0xa2   :  { %s6918_s16 = scalar_lea.hbm %s8449_s10, 32 }
  0xa3   :  { %p6919_p8 = scmp.ne.s32.totalorder %s8449_s10, %s6918_s16  ;;  %p6922_p9 = scmp.lt.u32.totalorder %s6918_s16, %s8449_s10 }
  0xa5   :  { %p6924_p10 = pnand %p6922_p9, %p6919_p8 }
  0xa7   :  { %6927 = shalt.err (!%p6924_p10)
}
  0xa8   :  { %s6928_s25 = scalar_lea.vmem %s97_s13, 32  ;;  %p6933_p12 = scmp.lt.s32.totalorder %s97_s13, %s97_s13 }
  0xa9   :  { %p6929_p11 = scmp.ne.s32.totalorder %s97_s13, %s6928_s25  ;;  %p6934_p13 = scmp.lt.s32.totalorder %s6928_s25, %s6928_s25 }
  0xab   :  { %p6935_p0 = por %p6934_p13, %p6933_p12 }
  0xad   :  { %p6936_p1 = pnand %p6935_p0, %p6929_p11 }
  0xaf   :  { %6939 = shalt.err (!%p6936_p1)
}
  0xb0   :  { %102 = dma.hbm_to_vmem [thread:$0]  %s8449_s10, 32, %s97_s13, [#allocation9], %s7096_s27, %s7096_s27, %s7097_s29  }
  0xb1   :  { %s7107_s21 = smov [#allocation13]   ;;  %s7108_s28 = smov [#allocation16]  }
  0xb2   :  { %s120_s26 = sshll.u32 %s7107_s21, 4  ;;  %s144_s5 = sshll.u32 %s7108_s28, 4  ;;  %s121_s26 = int_to_ptr.vmem [resolvable:$true] %s120_s26  ;;  %s145_s5 = int_to_ptr.vmem [resolvable:$true] %s144_s5 }
  0xb3   :  { %s6940_s24 = scalar_lea.hbm %s8451_s12, 32 }
  0xb4   :  { %p6941_p2 = scmp.ne.s32.totalorder %s8451_s12, %s6940_s24  ;;  %p6944_p3 = scmp.lt.u32.totalorder %s6940_s24, %s8451_s12 }
  0xb6   :  { %p6946_p4 = pnand %p6944_p3, %p6941_p2 }
  0xb8   :  { %6949 = shalt.err (!%p6946_p4)
}
  0xb9   :  { %s6950_s10 = scalar_lea.vmem %s121_s26, 32  ;;  %p6955_p6 = scmp.lt.s32.totalorder %s121_s26, %s121_s26 }
  0xba   :  { %p6951_p5 = scmp.ne.s32.totalorder %s121_s26, %s6950_s10  ;;  %p6956_p7 = scmp.lt.s32.totalorder %s6950_s10, %s6950_s10 }
  0xbc   :  { %p6957_p8 = por %p6956_p7, %p6955_p6 }
  0xbe   :  { %p6958_p9 = pnand %p6957_p8, %p6951_p5 }
  0xc0   :  { %6961 = shalt.err (!%p6958_p9)
}
  0xc1   :  { %126 = dma.hbm_to_vmem [thread:$0]  %s8451_s12, 32, %s121_s26, [#allocation12], %s7096_s27, %s7096_s27, %s7097_s29  }
  0xc2   :  { %s6962_s25 = scalar_lea.hbm %s8453_s14, 32 }
  0xc3   :  { %p6963_p10 = scmp.ne.s32.totalorder %s8453_s14, %s6962_s25  ;;  %p6966_p11 = scmp.lt.u32.totalorder %s6962_s25, %s8453_s14 }
  0xc5   :  { %p6968_p12 = pnand %p6966_p11, %p6963_p10 }
  0xc7   :  { %6971 = shalt.err (!%p6968_p12)
}
  0xc8   :  { %s6972_s22 = scalar_lea.vmem %s145_s5, 32  ;;  %p6977_p0 = scmp.lt.s32.totalorder %s145_s5, %s145_s5 }
  0xc9   :  { %p6973_p13 = scmp.ne.s32.totalorder %s145_s5, %s6972_s22  ;;  %p6978_p1 = scmp.lt.s32.totalorder %s6972_s22, %s6972_s22 }
  0xcb   :  { %p6979_p2 = por %p6978_p1, %p6977_p0 }
  0xcd   :  { %p6980_p3 = pnand %p6979_p2, %p6973_p13 }
  0xcf   :  { %6983 = shalt.err (!%p6980_p3)
}
  0xd0   :  { %150 = dma.hbm_to_vmem [thread:$0]  %s8453_s14, 32, %s145_s5, [#allocation15], %s7096_s27, %s7096_s27, %s7097_s29  }
  0xd1   :  { %s7109_s18 = smov [#allocation19]   ;;  %s7110_s4 = smov [#allocation22]  }
  0xd2   :  { %s170_s24 = sshll.u32 %s7109_s18, 4  ;;  %s194_s0 = sshll.u32 %s7110_s4, 4  ;;  %s171_s24 = int_to_ptr.vmem [resolvable:$true] %s170_s24  ;;  %s195_s0 = int_to_ptr.vmem [resolvable:$true] %s194_s0 }
  0xd3   :  { %s6984_s10 = scalar_lea.hbm %s8456_s17, 32 }
  0xd4   :  { %p6985_p4 = scmp.ne.s32.totalorder %s8456_s17, %s6984_s10  ;;  %p6988_p5 = scmp.lt.u32.totalorder %s6984_s10, %s8456_s17 }
  0xd6   :  { %p6990_p6 = pnand %p6988_p5, %p6985_p4 }
  0xd8   :  { %6993 = shalt.err (!%p6990_p6)
}
  0xd9   :  { %s6994_s14 = scalar_lea.vmem %s171_s24, 32  ;;  %p6999_p8 = scmp.lt.s32.totalorder %s171_s24, %s171_s24 }
  0xda   :  { %p6995_p7 = scmp.ne.s32.totalorder %s171_s24, %s6994_s14  ;;  %p7000_p9 = scmp.lt.s32.totalorder %s6994_s14, %s6994_s14 }
  0xdc   :  { %p7001_p10 = por %p7000_p9, %p6999_p8 }
  0xde   :  { %p7002_p11 = pnand %p7001_p10, %p6995_p7 }
  0xe0   :  { %7005 = shalt.err (!%p7002_p11)
}
  0xe1   :  { %176 = dma.hbm_to_vmem [thread:$0]  %s8456_s17, 32, %s171_s24, [#allocation18], %s7096_s27, %s7096_s27, %s7097_s29  }
  0xe2   :  { %s7006_s21 = scalar_lea.hbm %s8458_s19, 512 }
  0xe3   :  { %p7007_p12 = scmp.ne.s32.totalorder %s8458_s19, %s7006_s21  ;;  %p7010_p13 = scmp.lt.u32.totalorder %s7006_s21, %s8458_s19 }
  0xe5   :  { %p7012_p0 = pnand %p7010_p13, %p7007_p12 }
  0xe7   :  { %7015 = shalt.err (!%p7012_p0)
}
  0xe8   :  { %s7016_s18 = scalar_lea.vmem %s195_s0, 512  ;;  %p7021_p2 = scmp.lt.s32.totalorder %s195_s0, %s195_s0 }
  0xe9   :  { %p7017_p1 = scmp.ne.s32.totalorder %s195_s0, %s7016_s18  ;;  %p7022_p3 = scmp.lt.s32.totalorder %s7016_s18, %s7016_s18 }
  0xeb   :  { %p7023_p4 = por %p7022_p3, %p7021_p2 }
  0xed   :  { %p7024_p5 = pnand %p7023_p4, %p7017_p1 }
  0xef   :  { %7027 = shalt.err (!%p7024_p5)
}
  0xf0   :  { %200 = dma.hbm_to_vmem [thread:$0]  %s8458_s19, 512, %s195_s0, [#allocation21], %s7098_s11, %s7098_s11, %s7099_s2  }
  0xf1   :  { %s7111_s4 = smov [#allocation23]   ;;  %s7028_s13 = scalar_lea.hbm %s8459_s20, 16 }
  0xf2   :  { %s207_s16 = sshll.u32 %s7111_s4, 4  ;;  %p7029_p6 = scmp.ne.s32.totalorder %s8459_s20, %s7028_s13  ;;  %s208_s16 = int_to_ptr.vmem [resolvable:$true] %s207_s16 }
  0xf3   :  { %p7032_p7 = scmp.lt.u32.totalorder %s7028_s13, %s8459_s20 }
  0xf5   :  { %p7034_p8 = pnand %p7032_p7, %p7029_p6 }
  0xf7   :  { %7037 = shalt.err (!%p7034_p8)
}
  0xf8   :  { %s7038_s5 = scalar_lea.vmem %s208_s16, 16  ;;  %s7042_s19 = scalar_lea.vmem %s208_s16, 32 }
  0xf9   :  { %p7039_p9 = scmp.ne.s32.totalorder %s208_s16, %s7038_s5  ;;  %p7043_p10 = scmp.lt.s32.totalorder %s208_s16, %s208_s16 }
  0xfa   :  { %p7044_p11 = scmp.lt.s32.totalorder %s7042_s19, %s7038_s5 }
  0xfc   :  { %p7045_p12 = por %p7044_p11, %p7043_p10 }
  0xfe   :  { %p7046_p13 = pnand %p7045_p12, %p7039_p9 }
 0x100   :  { %7049 = shalt.err (!%p7046_p13)
}
 0x101   :  { %210 = dma.hbm_to_vmem [thread:$0]  %s8459_s20, 16, %s208_s16, [#allocation24]  }
 0x102   :  { %7072 = dma.done.wait [#allocation3], 512  }
 0x103   :  { %7073 = vsyncadd [#allocation3], 4294966784 }
 0x104   :  { %7074 = dma.done.wait [#allocation6], 32  }
 0x105   :  { %7075 = vsyncadd [#allocation6], 4294967264 }
 0x106   :  { %7076 = dma.done.wait [#allocation9], 96  }
 0x107   :  { %7077 = vsyncadd [#allocation9], 4294967200 }
 0x108   :  { %7078 = dma.done.wait [#allocation12], 64  }
 0x109   :  { %7079 = vsyncadd [#allocation12], 4294967232 }
 0x10a   :  { %7080 = dma.done.wait [#allocation15], 1056  }
 0x10b   :  { %7081 = vsyncadd [#allocation15], 4294966240 }
 0x10c   :  { %7082 = dma.done.wait [#allocation18], 64  }
 0x10d   :  { %7083 = vsyncadd [#allocation18], 4294967232 }
 0x10e   :  { %7084 = dma.done.wait [#allocation21], 544  }
 0x10f   :  { %7085 = vsyncadd [#allocation21], 4294966752 }
 0x110   :  { %7086 = dma.done.wait [#allocation24], 16  }
 0x111   :  { %7087 = vsyncadd [#allocation24], 4294967280  ;;  %v7112_v0 = vmov 0   ;;  %s8479_s6 = sld [smem:[#allocation35_spill]]  ;;  %s8480_s18 = sld [smem:[#allocation38_spill]]  ;;  %v258_v17 = vlaneseq  ;;  %vm280_vm0 = vcmask 523264  }
 0x112   :  { %6298 = vset.pattern.permute.xlu0 %v7112_v0  ;;  %6299 = vset.pattern.permute.xlu1 %v7112_v0  ;;  %v7113_v21 = vmov 0.0   ;;  %v255_v28 = vld [vmem:[#allocation2 + $0x8] sm:$0xff]  ;;  %v254_v29 = vld [vmem:[#allocation2] sm:$0xff]  ;;  %s8481_s1 = sld [smem:[#allocation37_spill]]  ;;  %v6505_v56 = vld [vmem:[%s8446_s7 + $0x14] ss:$8 sps:$4 sm:$0xff]  }
 0x113   :  { %v259_v18 = vand.u32 127, %v258_v17  ;;  %v6502_v54 = vld [vmem:[%s8446_s7 + $0x4] ss:$8 sps:$4 sm:$0xff]   ;;  %v6500_v55 = vld [vmem:[%s8446_s7] ss:$8 sps:$4 sm:$0xff]   ;;  %vm708_vm5 = vcmask 130048  }
 0x114   :  { %v6503_v57 = vld [vmem:[%s8446_s7 + $0x10] ss:$8 sps:$4 sm:$0xff]   ;;  %v6508_v58 = vld [vmem:[%s8446_s7 + $0x24] ss:$8 sps:$4 sm:$0xff]   ;;  %v6506_v60 = vld [vmem:[%s8446_s7 + $0x20] ss:$8 sps:$4 sm:$0xff]  }
 0x115   :  { %v6511_v61 = vld [vmem:[%s8446_s7 + $0x34] ss:$8 sps:$4 sm:$0xff]   ;;  %v6509_v62 = vld [vmem:[%s8446_s7 + $0x30] ss:$8 sps:$4 sm:$0xff]   ;;  %s8482_s25 = smov 32   ;;  %s7116_s21 = smov 96   ;;  %vm7611_vm6 = vmpackc.low %vm708_vm5, %vm708_vm5 }
 0x116   :  { %s7117_s28 = smov 80   ;;  %s8485_s26 = sld [smem:[#allocation36_spill]]  ;;  %vm1989_vm7 = vcmask 261120   ;;  %vm1992_vm8 = vcmask 392192   ;;  %vm7118_vm9 = vmmov 0   ;;  %vm5147_vm10 = vcmask 1040384  }
 0x117   :  { %v256_v1 = vld [vmem:[%s8479_s6] sm:$0xff]  ;;  %v5297_v2 = vld [vmem:[%s8479_s6 + $0x10] sm:$0xff]  ;;  %v257_v3 = vld [vmem:[%s8479_s6 + $0x8] sm:$0xff]  ;;  %vm5266_vm11 = vcmask 516096  }
 0x118   :  { %261 = vperm.xlu0 %6298, %v256_v1   ;;  %366 = vperm.xlu1 %6299, %v5297_v2   ;;  %v272_v4 = vld [vmem:[%s8480_s18] sm:$0xff]  ;;  %v273_v5 = vld [vmem:[%s8480_s18 + $0x8] sm:$0xff]  ;;  %v5298_v6 = vld [vmem:[%s8479_s6 + $0x18] sm:$0xff]  ;;  %s7114_s6 = smov 112  }
 0x119   :  { %v6075_v7 = vpack.c.bf16 %v273_v5, %v272_v4  ;;  %v274_v8 = vld [vmem:[%s8480_s18 + $0x10] sm:$0xff]  ;;  %v275_v9 = vld [vmem:[%s8480_s18 + $0x18] sm:$0xff]  ;;  %v276_v11 = vld [vmem:[%s8480_s18 + $0x20] sm:$0xff] }
 0x11a   :  { %v6079_v10 = vpack.c.bf16 %v275_v9, %v274_v8  ;;  %v277_v12 = vld [vmem:[%s8480_s18 + $0x28] sm:$0xff]  ;;  %v278_v13 = vld [vmem:[%s8480_s18 + $0x30] sm:$0xff]  ;;  %v279_v15 = vld [vmem:[%s8480_s18 + $0x38] sm:$0xff] }
 0x11b   :  { %6076 = vmatprep.subr.bf16.mxu0 %v6075_v7  ;;  %6092 = vmatprep.subr.bf16.mxu1 %v6075_v7  ;;  %v6083_v14 = vpack.c.bf16 %v277_v12, %v276_v11  ;;  %v6087_v16 = vpack.c.bf16 %v279_v15, %v278_v13  ;;  %v533_v52 = vld [vmem:[%s8481_s1] sm:$0xff]  ;;  %v534_v53 = vld [vmem:[%s8481_s1 + $0x8] sm:$0xff]  ;;  %v5305_v9 = vld [vmem:[%s8481_s1 + $0x10] sm:$0xff] }
 0x11c   :  { %264 = vperm.xlu0 %6298, %v257_v3   ;;  %369 = vperm.xlu1 %6299, %v5298_v6  }
 0x11d   :  { %6078 = vmatpush3.bf16.msra.mxu0 %v6075_v7  ;;  %6094 = vmatpush3.bf16.msra.mxu1 %v6075_v7 }
 0x11e   :  { %6080 = vmatprep.subr.bf16.mxu0 %v6079_v10  ;;  %6096 = vmatprep.subr.bf16.mxu1 %v6079_v10 }
 0x121   :  { %6082 = vmatpush3.bf16.msra.mxu0 %v6079_v10  ;;  %6098 = vmatpush3.bf16.msra.mxu1 %v6079_v10  ;;  %v5306_v10 = vld [vmem:[%s8481_s1 + $0x18] sm:$0xff]  ;;  %s7115_s1 = smov 48  }
 0x122   :  { %6084 = vmatprep.subr.bf16.mxu0 %v6083_v14  ;;  %6100 = vmatprep.subr.bf16.mxu1 %v6083_v14 }
 0x125   :  { %6086 = vmatpush3.bf16.msra.mxu0 %v6083_v14  ;;  %6102 = vmatpush3.bf16.msra.mxu1 %v6083_v14 }
 0x126   :  { %6088 = vmatprep.subr.bf16.mxu0 %v6087_v16  ;;  %6104 = vmatprep.subr.bf16.mxu1 %v6087_v16 }
 0x129   :  { %6090 = vmatpush3.bf16.msra.mxu0 %v6087_v16  ;;  %6106 = vmatpush3.bf16.msra.mxu1 %v6087_v16 }
 0x12a   :  { %649 = vmatprep.subr.bf16.mxu0 %v6502_v54 }
 0x197   :  { %v262_v19 = vpop.permute.xlu0 %261  ;;  %v367_v20 = vpop.permute.xlu1 %366 }
 0x198   :  { %vm266_vm1 = vcmp.eq.s32.totalorder %v262_v19, %v259_v18  ;;  %vm371_vm2 = vcmp.eq.s32.totalorder %v367_v20, %v259_v18  ;;  %v5303_v19 = vld [vmem:[#allocation5] ss:$0 sm:$0xff] }
 0x199   :  { %v5293_v22 = vsel %vm266_vm1, 1.0, %v7113_v21  ;;  %v5299_v23 = vsel %vm371_vm2, 1.0, %v7113_v21 }
 0x19a   :  { %5729 = vmatprep.mubr.msk.f32.mxu0 %vm280_vm0, %v5293_v22  ;;  %5748 = vmatprep.mubr.msk.f32.mxu1 %vm280_vm0, %v5299_v23  ;;  %v5304_v23 = vld [vmem:[#allocation7] ss:$0 sm:$0xff] }
 0x19b   :  { %v265_v24 = vpop.permute.xlu0 %264  ;;  %v370_v25 = vpop.permute.xlu1 %369 }
 0x19c   :  { %vm267_vm3 = vcmp.eq.s32.totalorder %v265_v24, %v259_v18  ;;  %vm372_vm4 = vcmp.eq.s32.totalorder %v370_v25, %v259_v18 }
 0x19d   :  { %v5294_v26 = vsel %vm267_vm3, 1.0, %v7113_v21  ;;  %v5300_v27 = vsel %vm372_vm4, 1.0, %v7113_v21 }
 0x19e   :  { %5730 = vmatmul.mubr.msk.f32.vlgmr.msra.gmra.mrb[0].mxu0 %vm280_vm0, %v5294_v26  ;;  %5749 = vmatmul.mubr.msk.f32.vlgmr.msra.gmra.mrb[0].mxu1 %vm280_vm0, %v5300_v27 }
 0x19f   :  { %681 = vmatprep.mubr.bf16.mxu0 %v7112_v0  ;;  %650 = vmatpush1.bf16.msra.mxu0 %v6500_v55  ;;  %v591_v55 = vld [vmem:[#allocation8] sm:$0x3] }
 0x1a0   :  { %651 = vmatprep.subr.bf16.mxu0 %v6505_v56 }
 0x1a3   :  { %652 = vmatpush1.bf16.msra.mxu0 %v6503_v57 }
 0x1a4   :  { %653 = vmatprep.subr.bf16.mxu0 %v6508_v58 }
 0x1a7   :  { %654 = vmatpush1.bf16.msra.mxu0 %v6506_v60 }
 0x1a8   :  { %655 = vmatprep.subr.bf16.mxu0 %v6511_v61 }
 0x1ab   :  { %656 = vmatpush1.bf16.msra.mxu0 %v6509_v62 }
 0x271   :  { %v5731_v30 = vpop.f32.mrb[0].mxu0  ;;  %v5750_v31 = vpop.f32.mrb[0].mxu1 }
 0x272   :  { %v359_v32 = vadd.f32 %v5731_v30, %v255_v28  ;;  %v353_v33 = vpop.f32.mrb[1].mxu0  ;;  %v449_v34 = vpop.f32.mrb[1].mxu1  ;;  %v455_v39 = vadd.f32 %v5750_v31, %v255_v28 }
 0x273   :  { %v354_v35 = vadd.f32 %v353_v33, %v254_v29  ;;  %v450_v36 = vadd.f32 %v449_v34, %v254_v29 }
 0x274   :  { %v463_v37 = vsel %vm280_vm0, %v359_v32, 0.0  ;;  %v469_v41 = vsel %vm280_vm0, %v455_v39, 0.0 }
 0x275   :  { %464 = vadd.xlane.f32.xlu1 %v463_v37  ;;  %v460_v38 = vsel %vm280_vm0, %v354_v35, 0.0  ;;  %v466_v40 = vsel %vm280_vm0, %v450_v36, 0.0 }
 0x276   :  { %461 = vadd.xlane.f32.xlu0 %v460_v38 }
 0x27a   :  { %467 = vadd.xlane.f32.xlu0 %v466_v40 }
 0x27e   :  { %470 = vadd.xlane.f32.xlu0 %v469_v41 }
 0x302   :  { %v465_v42 = vpop.xlane.xlu1 %464 }
 0x303   :  { %v474_v43 = vmul.f32 0.015625, %v465_v42  ;;  %v462_v44 = vpop.xlane.xlu0 %461 }
 0x304   :  { %v473_v45 = vmul.f32 0.015625, %v462_v44 }
 0x305   :  { %v478_v46 = vsub.f32 %v359_v32, %v474_v43 }
 0x306   :  { %v477_v47 = vsub.f32 %v354_v35, %v473_v45 }
 0x307   :  { %v482_v48 = vmul.f32 %v478_v46, %v478_v46  ;;  %v468_v59 = vpop.xlane.xlu0 %467 }
 0x308   :  { %v481_v49 = vmul.f32 %v477_v47, %v477_v47  ;;  %v475_v2 = vmul.f32 0.015625, %v468_v59 }
 0x309   :  { %v488_v50 = vsel %vm280_vm0, %v482_v48, 0.0 }
 0x30a   :  { %489 = vadd.xlane.f32.xlu0 %v488_v50  ;;  %v485_v51 = vsel %vm280_vm0, %v481_v49, 0.0  ;;  %v479_v4 = vsub.f32 %v450_v36, %v475_v2 }
 0x30b   :  { %486 = vadd.xlane.f32.xlu1 %v485_v51  ;;  %v471_v63 = vpop.xlane.xlu0 %470 }
 0x30c   :  { %v476_v1 = vmul.f32 0.015625, %v471_v63  ;;  %v483_v6 = vmul.f32 %v479_v4, %v479_v4 }
 0x30e   :  { %v480_v3 = vsub.f32 %v455_v39, %v476_v1  ;;  %v491_v8 = vsel %vm280_vm0, %v483_v6, 0.0 }
 0x310   :  { %v484_v5 = vmul.f32 %v480_v3, %v480_v3 }
 0x312   :  { %v494_v7 = vsel %vm280_vm0, %v484_v5, 0.0 }
 0x31c   :  { %540 = vperm.xlu1 %6299, %v533_v52  }
 0x320   :  { %545 = vperm.xlu0 %6298, %v534_v53   ;;  %v7557_v53 = vshrl.u32 %v258_v17, 7 }
 0x322   :  { %v7560_v54 = vsub.s32 0, %v7557_v53  ;;  %v599_v56 = vsub.s32 1, %v7557_v53 }
 0x324   :  { %v596_v57 = vrot.slane %v591_v55, %v7560_v54  ;;  %v600_v59 = vrot.slane %v591_v55, %v599_v56 }
 0x33f   :  { %495 = vadd.xlane.f32.xlu0 %v494_v7 }
 0x340   :  { %492 = vadd.xlane.f32.xlu1 %v491_v8 }
 0x351   :  { %550 = vperm.xlu1 %6299, %v5305_v9  }
 0x355   :  { %555 = vperm.xlu0 %6298, %v5306_v10  }
 0x397   :  { %v490_v11 = vpop.xlane.xlu0 %489 }
 0x398   :  { %v498_v12 = vmul.f32 0.015625, %v490_v11  ;;  %v487_v13 = vpop.xlane.xlu1 %486 }
 0x399   :  { %v497_v14 = vmul.f32 0.015625, %v487_v13 }
 0x39a   :  { %v502_v15 = vadd.f32 1e-07, %v498_v12 }
 0x39b   :  { %v501_v16 = vadd.f32 1e-07, %v497_v14 }
 0x39c   :  { %6560 = vrsqrt.f32 %v502_v15  ;;  %v541_v30 = vpop.permute.xlu1 %540 }
 0x39d   :  { %6562 = vrsqrt.f32 %v501_v16 }
 0x39f   :  { %v546_v29 = vpop.permute.xlu0 %545 }
 0x3a6   :  { %v6561_v18 = vpop.eup %6560 }
 0x3a7   :  { %v6563_v20 = vpop.eup %6562  ;;  %v510_v22 = vmul.f32 %v6561_v18, %v478_v46 }
 0x3a8   :  { %v509_v24 = vmul.f32 %v6563_v20, %v477_v47 }
 0x3a9   :  { %v520_v25 = vmul.f32 %v5303_v19, %v510_v22 }
 0x3aa   :  { %v519_v26 = vmul.f32 %v5303_v19, %v509_v24 }
 0x3ab   :  { %v530_v27 = vadd.f32 %v5304_v23, %v520_v25 }
 0x3ac   :  { %v529_v28 = vadd.f32 %v5304_v23, %v519_v26 }
 0x3ad   :  { %v7541_v31 = vmul.f32 %v546_v29, %v530_v27 }
 0x3ae   :  { %v7543_v32 = vmul.f32 %v541_v30, %v529_v28 }
 0x3b0   :  { %v581_v33 = vpack.c.bf16 %v7541_v31, %v7543_v32 }
 0x3b2   :  { %5316 = vmatmul.mubr.msk.bf16.vlgmr.msra.gmra.mrb[4].mxu0 %vm280_vm0, %v581_v33 }
 0x3b3   :  { %691 = vmatprep.mubr.bf16.mxu0 %v7112_v0 }
 0x3cc   :  { %v496_v34 = vpop.xlane.xlu0 %495 }
 0x3cd   :  { %v500_v35 = vmul.f32 0.015625, %v496_v34  ;;  %v493_v36 = vpop.xlane.xlu1 %492 }
 0x3ce   :  { %v499_v37 = vmul.f32 0.015625, %v493_v36 }
 0x3cf   :  { %v504_v38 = vadd.f32 1e-07, %v500_v35 }
 0x3d0   :  { %v503_v39 = vadd.f32 1e-07, %v499_v37 }
 0x3d1   :  { %6564 = vrsqrt.f32 %v504_v38  ;;  %v551_v49 = vpop.permute.xlu1 %550 }
 0x3d2   :  { %6566 = vrsqrt.f32 %v503_v39 }
 0x3d4   :  { %v556_v48 = vpop.permute.xlu0 %555 }
 0x3db   :  { %v6565_v40 = vpop.eup %6564 }
 0x3dc   :  { %v6567_v41 = vpop.eup %6566  ;;  %v512_v42 = vmul.f32 %v6565_v40, %v480_v3 }
 0x3dd   :  { %v511_v43 = vmul.f32 %v6567_v41, %v479_v4 }
 0x3de   :  { %v522_v44 = vmul.f32 %v5303_v19, %v512_v42 }
 0x3df   :  { %v521_v45 = vmul.f32 %v5303_v19, %v511_v43 }
 0x3e0   :  { %v532_v46 = vadd.f32 %v5304_v23, %v522_v44 }
 0x3e1   :  { %v531_v47 = vadd.f32 %v5304_v23, %v521_v45 }
 0x3e2   :  { %v7549_v50 = vmul.f32 %v556_v48, %v532_v46 }
 0x3e3   :  { %v7551_v51 = vmul.f32 %v551_v49, %v531_v47 }
 0x3e5   :  { %v582_v52 = vpack.c.bf16 %v7549_v50, %v7551_v51 }
 0x3e7   :  { %5317 = vmatmul.mubr.msk.bf16.gmra.mrb[8].mxu0 %vm280_vm0, %v582_v52 }
 0x485   :  { %v683_v58 = vpop.f32.mrb[4].mxu0 }
 0x486   :  { %v684_v60 = vadd.f32 %v683_v58, %v596_v57  ;;  %v685_v61 = vpop.f32.mrb[5].mxu0 }
 0x487   :  { %v687_v62 = vpop.f32.mrb[6].mxu0  ;;  %v686_v17 = vadd.f32 %v685_v61, %v600_v59 }
 0x488   :  { %v688_v63 = vadd.f32 %v687_v62, %v596_v57  ;;  %v689_v1 = vpop.f32.mrb[7].mxu0  ;;  %5755 = vmatprep.mubr.msk.f32.mxu1 %vm708_vm5, %v684_v60 }
 0x489   :  { %v690_v2 = vadd.f32 %v689_v1, %v600_v59 }
 0x48a   :  { %v6310_v3 = vpack.i.bf16 %v688_v63, %v684_v60 }
 0x48b   :  { %v7567_v4 = vpack.i.bf16 %v690_v2, %v686_v17  ;;  %v7569_v5 = vpack.c.bf16 %v690_v2, %v686_v17 }
 0x48c   :  { %6311 = vrot.lane.b32.xlu0 %v6310_v3, %s8482_s25  ;;  %6301 = vrot.lane.b32.xlu1 %v6310_v3, %s7098_s11 }
 0x490   :  { %794 = vrot.lane.b32.xlu0 %v688_v63, %s7114_s6  ;;  %6306 = vrot.lane.b32.xlu1 %v6310_v3, %s7115_s1 }
 0x494   :  { %883 = vrot.lane.b32.xlu0 %v684_v60, %s7116_s21  ;;  %792 = vrot.lane.b32.xlu1 %v684_v60, %s7114_s6 }
 0x498   :  { %6316 = vrot.lane.b32.xlu1 %v6310_v3, %s7096_s27 }
 0x49c   :  { %885 = vrot.lane.b32.xlu1 %v688_v63, %s7116_s21 }
 0x4ba   :  { %v693_v6 = vpop.f32.mrb[8].mxu0 }
 0x4bb   :  { %v695_v7 = vpop.f32.mrb[9].mxu0  ;;  %v7579_v10 = vadd.f32 %v693_v6, %v596_v57 }
 0x4bc   :  { %v696_v8 = vadd.f32 %v695_v7, %v600_v59  ;;  %v697_v9 = vpop.f32.mrb[10].mxu0 }
 0x4bd   :  { %v7581_v11 = vadd.f32 %v697_v9, %v596_v57  ;;  %v699_v12 = vpop.f32.mrb[11].mxu0 }
 0x4be   :  { %v700_v13 = vadd.f32 %v699_v12, %v600_v59 }
 0x4bf   :  { %v6325_v14 = vpack.i.bf16 %v7581_v11, %v7579_v10 }
 0x4c0   :  { %v7585_v15 = vpack.i.bf16 %v700_v13, %v696_v8  ;;  %v7587_v16 = vpack.c.bf16 %v700_v13, %v696_v8  ;;  %v562_v13 = vld [vmem:[%s8485_s26] sm:$0x1] }
 0x4c1   :  { %6326 = vrot.lane.b32.xlu1 %v6325_v14, %s7115_s1  ;;  %6321 = vrot.lane.b32.xlu0 %v6325_v14, %s7098_s11 }
 0x4c5   :  { %976 = vrot.lane.b32.xlu1 %v688_v63, %s7117_s28  ;;  %974 = vrot.lane.b32.xlu0 %v684_v60, %s7117_s28 }
 0x4c9   :  { %6336 = vrot.lane.b32.xlu1 %v6325_v14, %s7096_s27  ;;  %6331 = vrot.lane.b32.xlu0 %v6325_v14, %s8482_s25  ;;  %v563_v14 = vsub.f32 1.0, %v562_v13 }
 0x4cd   :  { %1156 = vrot.lane.b32.xlu1 %v7581_v11, %s7114_s6  ;;  %1154 = vrot.lane.b32.xlu0 %v7579_v10, %s7114_s6 }
 0x4d1   :  { %1247 = vrot.lane.b32.xlu1 %v7581_v11, %s7116_s21  ;;  %1245 = vrot.lane.b32.xlu0 %v7579_v10, %s7116_s21 }
 0x4d5   :  { %1338 = vrot.lane.b32.xlu1 %v7581_v11, %s7117_s28  ;;  %1336 = vrot.lane.b32.xlu0 %v7579_v10, %s7117_s28 }
 0x4d9   :  { %6341 = vrot.lane.b32.xlu1 %v7567_v4, %s7114_s6 }
 0x4fe   :  { %v6302_v18 = vpop.permute.xlu1 %6301  ;;  %v6312_v27 = vpop.permute.xlu0 %6311 }
 0x4ff   :  { %v6304_v19 = vunpack.i.h.bf16 %v6302_v18  ;;  %v6303_v20 = vunpack.i.l.bf16 %v6302_v18  ;;  %v6314_v30 = vunpack.i.h.bf16 %v6312_v27  ;;  %v6313_v33 = vunpack.i.l.bf16 %v6312_v27 }
 0x500   :  { %v564_v18 = vmul.f32 -1e+09, %v563_v14 }
 0x501   :  { %v6107_v23 = vpack.c.bf16 %v6304_v19, %v6303_v20  ;;  %v6119_v34 = vpack.c.bf16 %v6314_v30, %v6313_v33 }
 0x502   :  { %v6307_v24 = vpop.permute.xlu1 %6306  ;;  %v795_v36 = vpop.permute.xlu0 %794  ;;  %v7673_v19 = vrot.slane %v564_v18, %v7560_v54 }
 0x503   :  { %v6309_v25 = vunpack.i.h.bf16 %v6307_v24  ;;  %v6308_v26 = vunpack.i.l.bf16 %v6307_v24  ;;  %6109 = vmatprep.subr.msk.bf16.mxu1 %vm7611_vm6, %v6107_v23 }
 0x504   :  { %6112 = vmatpush3.bf16.xpose.msk.msra.mxu1 %vm7611_vm6, %v6107_v23 }
 0x505   :  { %v6113_v28 = vpack.c.bf16 %v6309_v25, %v6308_v26 }
 0x506   :  { %v793_v29 = vpop.permute.xlu1 %792  ;;  %v884_v39 = vpop.permute.xlu0 %883 }
 0x507   :  { %6115 = vmatprep.subr.msk.bf16.mxu1 %vm7611_vm6, %v6113_v28 }
 0x50a   :  { %v6317_v35 = vpop.permute.xlu1 %6316 }
 0x50b   :  { %5756 = vmatmul.mubr.msk.f32.vlgmr.msra.gmra.mrb[2].mxu1 %vm708_vm5, %v688_v63  ;;  %v6319_v37 = vunpack.i.h.bf16 %v6317_v35  ;;  %v6318_v38 = vunpack.i.l.bf16 %v6317_v35  ;;  %v5307_v35 = vld [vmem:[%s8485_s26 + $0x1] sm:$0x1] }
 0x50c   :  { %6118 = vmatpush3.bf16.xpose.msk.msra.mxu1 %vm7611_vm6, %v6113_v28  ;;  %5762 = vmatprep.mubr.msk.f32.mxu1 %vm708_vm5, %v793_v29 }
 0x50d   :  { %6121 = vmatprep.subr.msk.bf16.mxu1 %vm7611_vm6, %v6119_v34  ;;  %v6125_v40 = vpack.c.bf16 %v6319_v37, %v6318_v38 }
 0x50e   :  { %v886_v41 = vpop.permute.xlu1 %885 }
 0x513   :  { %5763 = vmatmul.mubr.msk.f32.vlgmr.msra.gmra.mrb[4].mxu1 %vm708_vm5, %v795_v36  ;;  %v573_v36 = vsub.f32 1.0, %v5307_v35 }
 0x514   :  { %6124 = vmatpush3.bf16.xpose.msk.msra.mxu1 %vm7611_vm6, %v6119_v34  ;;  %5769 = vmatprep.mubr.msk.f32.mxu1 %vm708_vm5, %v884_v39 }
 0x515   :  { %6127 = vmatprep.subr.msk.bf16.mxu1 %vm7611_vm6, %v6125_v40  ;;  %v574_v39 = vmul.f32 -1e+09, %v573_v36 }
 0x51b   :  { %5770 = vmatmul.mubr.msk.f32.vlgmr.msra.gmra.mrb[6].mxu1 %vm708_vm5, %v886_v41 }
 0x51c   :  { %6130 = vmatpush3.bf16.xpose.msk.msra.mxu1 %vm7611_vm6, %v6125_v40  ;;  %v7694_v40 = vrot.slane %v574_v39, %v7560_v54 }
 0x533   :  { %v6322_v42 = vpop.permute.xlu0 %6321  ;;  %v6327_v43 = vpop.permute.xlu1 %6326 }
 0x534   :  { %v6324_v44 = vunpack.i.h.bf16 %v6322_v42  ;;  %v6323_v45 = vunpack.i.l.bf16 %v6322_v42  ;;  %v6329_v46 = vunpack.i.h.bf16 %v6327_v43  ;;  %v6328_v47 = vunpack.i.l.bf16 %v6327_v43 }
 0x536   :  { %v6131_v48 = vpack.c.bf16 %v6324_v44, %v6323_v45  ;;  %v6137_v49 = vpack.c.bf16 %v6329_v46, %v6328_v47 }
 0x537   :  { %v975_v52 = vpop.permute.xlu0 %974  ;;  %v977_v55 = vpop.permute.xlu1 %976 }
 0x538   :  { %5776 = vmatprep.mubr.msk.f32.mxu1 %vm708_vm5, %v975_v52  ;;  %6133 = vmatprep.subr.msk.bf16.mxu1 %vm7611_vm6, %v6131_v48 }
 0x539   :  { %6139 = vmatprep.subr.msk.bf16.mxu0 %vm7611_vm6, %v6137_v49  ;;  %5777 = vmatmul.mubr.msk.f32.vlgmr.msra.gmra.mrb[8].mxu1 %vm708_vm5, %v977_v55 }
 0x53a   :  { %6136 = vmatpush3.bf16.xpose.msk.msra.mxu1 %vm7611_vm6, %v6131_v48  ;;  %6142 = vmatpush3.bf16.xpose.msk.msra.mxu0 %vm7611_vm6, %v6137_v49 }
 0x53b   :  { %5783 = vmatprep.mubr.msk.f32.mxu1 %vm708_vm5, %v7579_v10  ;;  %v6332_v57 = vpop.permute.xlu0 %6331  ;;  %v6337_v58 = vpop.permute.xlu1 %6336 }
 0x53c   :  { %v6334_v59 = vunpack.i.h.bf16 %v6332_v57  ;;  %v6333_v60 = vunpack.i.l.bf16 %v6332_v57  ;;  %v6339_v61 = vunpack.i.h.bf16 %v6337_v58  ;;  %v6338_v62 = vunpack.i.l.bf16 %v6337_v58 }
 0x53e   :  { %v6143_v63 = vpack.c.bf16 %v6334_v59, %v6333_v60  ;;  %v6149_v1 = vpack.c.bf16 %v6339_v61, %v6338_v62 }
 0x53f   :  { %v1155_v17 = vpop.permute.xlu0 %1154  ;;  %v1157_v2 = vpop.permute.xlu1 %1156 }
 0x540   :  { %5790 = vmatprep.mubr.msk.f32.mxu0 %vm708_vm5, %v1155_v17  ;;  %6145 = vmatprep.subr.msk.bf16.mxu1 %vm7611_vm6, %v6143_v63 }
 0x541   :  { %5784 = vmatmul.mubr.msk.f32.vlgmr.msra.gmra.mrb[10].mxu1 %vm708_vm5, %v7581_v11  ;;  %6151 = vmatprep.subr.msk.bf16.mxu0 %vm7611_vm6, %v6149_v1 }
 0x542   :  { %5791 = vmatmul.mubr.msk.f32.vlgmr.msra.gmra.mrb[2].mxu0 %vm708_vm5, %v1157_v2  ;;  %6148 = vmatpush3.bf16.xpose.msk.msra.mxu1 %vm7611_vm6, %v6143_v63 }
 0x543   :  { %6154 = vmatpush3.bf16.xpose.msk.msra.mxu0 %vm7611_vm6, %v6149_v1  ;;  %6156 = vmatprep.subr.bf16.mxu1 %v7569_v5  ;;  %v1246_v3 = vpop.permute.xlu0 %1245  ;;  %v1248_v6 = vpop.permute.xlu1 %1247 }
 0x544   :  { %5797 = vmatprep.mubr.msk.f32.mxu1 %vm708_vm5, %v1246_v3 }
 0x547   :  { %v1337_v7 = vpop.permute.xlu0 %1336  ;;  %v1339_v8 = vpop.permute.xlu1 %1338 }
 0x548   :  { %5804 = vmatprep.mubr.msk.f32.mxu0 %vm708_vm5, %v1337_v7 }
 0x549   :  { %5798 = vmatmul.mubr.msk.f32.vlgmr.msra.gmra.mrb[12].mxu1 %vm708_vm5, %v1248_v6 }
 0x54a   :  { %5805 = vmatmul.mubr.msk.f32.vlgmr.msra.gmra.mrb[12].mxu0 %vm708_vm5, %v1339_v8  ;;  %6158 = vmatpush3.bf16.msra.mxu1 %v7569_v5 }
 0x54b   :  { %v6342_v9 = vpop.permute.xlu1 %6341 }
 0x54c   :  { %v6344_v10 = vunpack.i.h.bf16 %v6342_v9  ;;  %v6343_v11 = vunpack.i.l.bf16 %v6342_v9 }
 0x54e   :  { %v7666_v12 = vpack.c.bf16 %v6344_v10, %v6343_v11 }
 0x550   :  { %6160 = vmatprep.subr.bf16.mxu1 %v7666_v12 }
 0x5de   :  { %v5757_v20 = vpop.f32.mrb[2].mxu1 }
 0x5df   :  { %v7676_v23 = vadd.f32 %v5757_v20, %v7673_v19  ;;  %v783_v5 = vpop.f32.mrb[3].mxu1 }
 0x5e0   :  { %v7679_v24 = vadd.f32 %v783_v5, %v7673_v19 }
 0x5e1   :  { %v1446_v25 = vsel %vm708_vm5, %v7676_v23, -inf }
 0x5e2   :  { %1447 = vmax.xlane.f32.xlu1 %v1446_v25  ;;  %v1443_v26 = vsel %vm708_vm5, %v7679_v24, -inf }
 0x5e3   :  { %1444 = vmax.xlane.f32.xlu0 %v1443_v26 }
 0x5e6   :  { %v5764_v27 = vpop.f32.mrb[4].mxu1 }
 0x5e7   :  { %v7686_v28 = vadd.f32 %v5764_v27, %v7673_v19  ;;  %v874_v29 = vpop.f32.mrb[5].mxu1 }
 0x5e8   :  { %v7703_v47 = vadd.f32 %v874_v29, %v7673_v19 }
 0x5e9   :  { %v1452_v30 = vsel %vm708_vm5, %v7686_v28, -inf }
 0x5ea   :  { %1453 = vmax.xlane.f32.xlu0 %v1452_v30  ;;  %v1449_v58 = vsel %vm708_vm5, %v7703_v47, -inf }
 0x5ee   :  { %v5771_v33 = vpop.f32.mrb[6].mxu1 }
 0x5ef   :  { %v965_v34 = vpop.f32.mrb[7].mxu1  ;;  %v7713_v55 = vadd.f32 %v5771_v33, %v7673_v19 }
 0x5f0   :  { %v7708_v49 = vadd.f32 %v965_v34, %v7673_v19 }
 0x5f1   :  { %v1458_v17 = vsel %vm708_vm5, %v7713_v55, -inf }
 0x5f2   :  { %v1455_v61 = vsel %vm708_vm5, %v7708_v49, -inf }
 0x60c   :  { %v5778_v37 = vpop.f32.mrb[8].mxu1 }
 0x60d   :  { %v1056_v38 = vpop.f32.mrb[9].mxu1  ;;  %v7733_v6 = vadd.f32 %v5778_v37, %v7673_v19 }
 0x60e   :  { %v7728_v2 = vadd.f32 %v1056_v38, %v7673_v19 }
 0x60f   :  { %v1464_v11 = vsel %vm708_vm5, %v7733_v6, -inf }
 0x610   :  { %v1461_v9 = vsel %vm708_vm5, %v7728_v2, -inf }
 0x614   :  { %v5785_v41 = vpop.f32.mrb[10].mxu1 }
 0x615   :  { %v1145_v42 = vpop.f32.mrb[11].mxu1  ;;  %v5792_v43 = vpop.f32.mrb[2].mxu0  ;;  %v7743_v10 = vadd.f32 %v5785_v41, %v7694_v40 }
 0x616   :  { %v7697_v44 = vadd.f32 %v5792_v43, %v7694_v40  ;;  %v1236_v45 = vpop.f32.mrb[3].mxu0  ;;  %v7738_v8 = vadd.f32 %v1145_v42, %v7694_v40 }
 0x617   :  { %v7700_v46 = vadd.f32 %v1236_v45, %v7694_v40  ;;  %v1470_v18 = vsel %vm708_vm5, %v7743_v10, -inf }
 0x618   :  { %v1476_v48 = vsel %vm708_vm5, %v7697_v44, -inf  ;;  %v1467_v13 = vsel %vm708_vm5, %v7738_v8, -inf }
 0x619   :  { %1477 = vmax.xlane.f32.xlu0 %v1476_v48  ;;  %v1473_v52 = vsel %vm708_vm5, %v7700_v46, -inf }
 0x61a   :  { %1474 = vmax.xlane.f32.xlu1 %v1473_v52 }
 0x61c   :  { %v5799_v57 = vpop.f32.mrb[12].mxu1 }
 0x61d   :  { %v5806_v59 = vpop.f32.mrb[12].mxu0  ;;  %1450 = vmax.xlane.f32.xlu0 %v1449_v58  ;;  %v1327_v60 = vpop.f32.mrb[13].mxu1  ;;  %v7750_v14 = vadd.f32 %v5799_v57, %v7694_v40 }
 0x61e   :  { %v1418_v62 = vpop.f32.mrb[13].mxu0  ;;  %1456 = vmax.xlane.f32.xlu1 %v1455_v61  ;;  %v7723_v1 = vadd.f32 %v5806_v59, %v7694_v40  ;;  %v7761_v5 = vadd.f32 %v1327_v60, %v7694_v40 }
 0x61f   :  { %v7720_v63 = vadd.f32 %v1418_v62, %v7694_v40  ;;  %v1482_v20 = vsel %vm708_vm5, %v7750_v14, -inf }
 0x620   :  { %v1488_v7 = vsel %vm708_vm5, %v7723_v1, -inf  ;;  %v1479_v25 = vsel %vm708_vm5, %v7761_v5, -inf }
 0x621   :  { %1459 = vmax.xlane.f32.xlu0 %v1458_v17  ;;  %v1485_v3 = vsel %vm708_vm5, %v7720_v63, -inf }
 0x622   :  { %1486 = vmax.xlane.f32.xlu1 %v1485_v3 }
 0x625   :  { %1489 = vmax.xlane.f32.xlu0 %v1488_v7 }
 0x626   :  { %1462 = vmax.xlane.f32.xlu1 %v1461_v9 }
 0x629   :  { %1465 = vmax.xlane.f32.xlu0 %v1464_v11 }
 0x62a   :  { %1468 = vmax.xlane.f32.xlu1 %v1467_v13 }
 0x62d   :  { %1471 = vmax.xlane.f32.xlu0 %v1470_v18 }
 0x631   :  { %1483 = vmax.xlane.f32.xlu0 %v1482_v20 }
 0x63b   :  { %6351 = vrot.lane.b32.xlu1 %v7567_v4, %s7117_s28 }
 0x647   :  { %6346 = vrot.lane.b32.xlu0 %v7567_v4, %s7116_s21 }
 0x65f   :  { %1480 = vmax.xlane.f32.xlu1 %v1479_v25 }
 0x66f   :  { %v1448_v26 = vpop.xlane.xlu1 %1447 }
 0x670   :  { %v1492_v27 = vsub.f32 %v7676_v23, %v1448_v26  ;;  %6356 = vrot.lane.b32.xlu1 %v7585_v15, %s7114_s6  ;;  %v1445_v30 = vpop.xlane.xlu0 %1444 }
 0x671   :  { %v1491_v36 = vsub.f32 %v7679_v24, %v1445_v30 }
 0x672   :  { %v1509_v29 = vmul.f32 1.442695, %v1492_v27 }
 0x673   :  { %v1507_v23 = vmul.f32 1.442695, %v1491_v36 }
 0x674   :  { %6568 = vpow2.f32 %v1509_v29 }
 0x677   :  { %v1454_v33 = vpop.xlane.xlu0 %1453 }
 0x678   :  { %v1494_v34 = vsub.f32 %v7686_v28, %v1454_v33 }
 0x67a   :  { %v1513_v4 = vmul.f32 1.442695, %v1494_v34 }
 0x67c   :  { %6570 = vpow2.f32 %v1513_v4 }
 0x67d   :  { %6572 = vpow2.f32 %v1507_v23 }
 0x67e   :  { %v7769_v35 = vpop.eup %6568 }
 0x67f   :  { %v1542_v37 = vsel %vm708_vm5, %v7769_v35, 0.0 }
 0x680   :  { %1543 = vadd.xlane.f32.xlu0 %v1542_v37 }
 0x686   :  { %v7774_v38 = vpop.eup %6570 }
 0x687   :  { %v1548_v39 = vsel %vm708_vm5, %v7774_v38, 0.0  ;;  %v7778_v41 = vpop.eup %6572 }
 0x688   :  { %1549 = vadd.xlane.f32.xlu0 %v1548_v39  ;;  %v1539_v28 = vsel %vm708_vm5, %v7778_v41, 0.0 }
 0x694   :  { %1540 = vadd.xlane.f32.xlu1 %v1539_v28 }
 0x6a6   :  { %v1478_v42 = vpop.xlane.xlu0 %1477 }
 0x6a7   :  { %v1502_v24 = vsub.f32 %v7697_v44, %v1478_v42  ;;  %v1475_v43 = vpop.xlane.xlu1 %1474 }
 0x6a8   :  { %v1501_v48 = vsub.f32 %v7700_v46, %v1475_v43 }
 0x6a9   :  { %v1529_v45 = vmul.f32 1.442695, %v1502_v24 }
 0x6aa   :  { %v1451_v52 = vpop.xlane.xlu0 %1450  ;;  %v1527_v59 = vmul.f32 1.442695, %v1501_v48 }
 0x6ab   :  { %6574 = vpow2.f32 %v1529_v45  ;;  %v1493_v57 = vsub.f32 %v7703_v47, %v1451_v52  ;;  %v1457_v58 = vpop.xlane.xlu1 %1456 }
 0x6ac   :  { %v1495_v61 = vsub.f32 %v7708_v49, %v1457_v58 }
 0x6ad   :  { %v1511_v60 = vmul.f32 1.442695, %v1493_v57 }
 0x6ae   :  { %v1460_v62 = vpop.xlane.xlu0 %1459  ;;  %v1515_v44 = vmul.f32 1.442695, %v1495_v61 }
 0x6af   :  { %6576 = vpow2.f32 %v1511_v60  ;;  %v1496_v17 = vsub.f32 %v7713_v55, %v1460_v62  ;;  %v1487_v3 = vpop.xlane.xlu1 %1486 }
 0x6b0   :  { %6578 = vpow2.f32 %v1527_v59  ;;  %v1505_v9 = vsub.f32 %v7720_v63, %v1487_v3 }
 0x6b1   :  { %v1517_v7 = vmul.f32 1.442695, %v1496_v17 }
 0x6b2   :  { %v1490_v46 = vpop.xlane.xlu0 %1489  ;;  %v1535_v49 = vmul.f32 1.442695, %v1505_v9 }
 0x6b3   :  { %6580 = vpow2.f32 %v1517_v7  ;;  %v1506_v11 = vsub.f32 %v7723_v1, %v1490_v46  ;;  %v1463_v47 = vpop.xlane.xlu1 %1462 }
 0x6b4   :  { %6582 = vpow2.f32 %v1515_v44  ;;  %v1497_v20 = vsub.f32 %v7728_v2, %v1463_v47 }
 0x6b5   :  { %v7789_v13 = vpop.eup %6574  ;;  %v1537_v18 = vmul.f32 1.442695, %v1506_v11 }
 0x6b6   :  { %v1466_v25 = vpop.xlane.xlu0 %1465  ;;  %v1572_v55 = vsel %vm708_vm5, %v7789_v13, 0.0  ;;  %v1519_v29 = vmul.f32 1.442695, %v1497_v20 }
 0x6b7   :  { %6584 = vpow2.f32 %v1537_v18  ;;  %v1498_v26 = vsub.f32 %v7733_v6, %v1466_v25  ;;  %v1469_v63 = vpop.xlane.xlu1 %1468  ;;  %1573 = vadd.xlane.f32.xlu0 %v1572_v55 }
 0x6b8   :  { %6586 = vpow2.f32 %v1535_v49  ;;  %v1499_v30 = vsub.f32 %v7738_v8, %v1469_v63 }
 0x6b9   :  { %v7795_v27 = vpop.eup %6576  ;;  %v1521_v1 = vmul.f32 1.442695, %v1498_v26 }
 0x6ba   :  { %v1472_v33 = vpop.xlane.xlu0 %1471  ;;  %v1545_v2 = vsel %vm708_vm5, %v7795_v27, 0.0  ;;  %v7800_v34 = vpop.eup %6578  ;;  %v1523_v37 = vmul.f32 1.442695, %v1499_v30 }
 0x6bb   :  { %6588 = vpow2.f32 %v1521_v1  ;;  %v1500_v4 = vsub.f32 %v7743_v10, %v1472_v33  ;;  %1546 = vadd.xlane.f32.xlu1 %v1545_v2  ;;  %v1569_v8 = vsel %vm708_vm5, %v7800_v34, 0.0  ;;  %v6352_v47 = vpop.permute.xlu1 %6351 }
 0x6bc   :  { %6590 = vpow2.f32 %v1519_v29  ;;  %v6354_v33 = vunpack.i.h.bf16 %v6352_v47 }
 0x6bd   :  { %v7803_v6 = vpop.eup %6580  ;;  %v1525_v36 = vmul.f32 1.442695, %v1500_v4 }
 0x6be   :  { %v1484_v23 = vpop.xlane.xlu0 %1483  ;;  %v1554_v39 = vsel %vm708_vm5, %v7803_v6, 0.0  ;;  %v7809_v28 = vpop.eup %6582 }
 0x6bf   :  { %6592 = vpow2.f32 %v1525_v36  ;;  %v1504_v42 = vsub.f32 %v7750_v14, %v1484_v23  ;;  %1555 = vadd.xlane.f32.xlu0 %v1554_v39  ;;  %1570 = vadd.xlane.f32.xlu1 %v1569_v8  ;;  %v1551_v48 = vsel %vm708_vm5, %v7809_v28, 0.0 }
 0x6c0   :  { %6594 = vpow2.f32 %v1523_v37 }
 0x6c1   :  { %v7812_v10 = vpop.eup %6584  ;;  %v1533_v24 = vmul.f32 1.442695, %v1504_v42 }
 0x6c2   :  { %v6347_v43 = vpop.permute.xlu0 %6346  ;;  %v1584_v45 = vsel %vm708_vm5, %v7812_v10, 0.0  ;;  %v7818_v58 = vpop.eup %6586 }
 0x6c3   :  { %6596 = vpow2.f32 %v1533_v24  ;;  %v6349_v52 = vunpack.i.h.bf16 %v6347_v43  ;;  %v6348_v57 = vunpack.i.l.bf16 %v6347_v43  ;;  %1585 = vadd.xlane.f32.xlu0 %v1584_v45  ;;  %1552 = vadd.xlane.f32.xlu1 %v1551_v48  ;;  %v1581_v61 = vsel %vm708_vm5, %v7818_v58, 0.0 }
 0x6c5   :  { %v7820_v14 = vpop.eup %6588  ;;  %v6163_v59 = vpack.c.bf16 %v6349_v52, %v6348_v57 }
 0x6c6   :  { %v1560_v60 = vsel %vm708_vm5, %v7820_v14, 0.0  ;;  %v7826_v62 = vpop.eup %6590 }
 0x6c7   :  { %1561 = vadd.xlane.f32.xlu0 %v1560_v60  ;;  %6164 = vmatprep.subr.bf16.mxu0 %v6163_v59  ;;  %v1557_v44 = vsel %vm708_vm5, %v7826_v62, 0.0 }
 0x6c8   :  { %1582 = vadd.xlane.f32.xlu1 %v1581_v61  ;;  %6166 = vmatpush3.bf16.msra.mxu0 %v6163_v59 }
 0x6c9   :  { %v7828_v17 = vpop.eup %6592  ;;  %6172 = vmatprep.subr.bf16.mxu0 %v7587_v16 }
 0x6ca   :  { %v1566_v3 = vsel %vm708_vm5, %v7828_v17, 0.0  ;;  %v7835_v7 = vpop.eup %6594 }
 0x6cb   :  { %1567 = vadd.xlane.f32.xlu0 %v1566_v3  ;;  %v1563_v11 = vsel %vm708_vm5, %v7835_v7, 0.0 }
 0x6cc   :  { %1558 = vadd.xlane.f32.xlu1 %v1557_v44 }
 0x6cd   :  { %v7837_v9 = vpop.eup %6596 }
 0x6ce   :  { %v1578_v46 = vsel %vm708_vm5, %v7837_v9, 0.0 }
 0x6cf   :  { %1579 = vadd.xlane.f32.xlu0 %v1578_v46 }
 0x6d0   :  { %1564 = vadd.xlane.f32.xlu1 %v1563_v11 }
 0x6e5   :  { %6361 = vrot.lane.b32.xlu0 %v7585_v15, %s7116_s21 }
 0x6ec   :  { %v1481_v18 = vpop.xlane.xlu1 %1480 }
 0x6ed   :  { %v1503_v49 = vsub.f32 %v7761_v5, %v1481_v18  ;;  %v6353_v5 = vunpack.i.l.bf16 %v6352_v47 }
 0x6ef   :  { %v1531_v20 = vmul.f32 1.442695, %v1503_v49  ;;  %v6167_v36 = vpack.c.bf16 %v6354_v33, %v6353_v5 }
 0x6f0   :  { %v6357_v26 = vpop.permute.xlu1 %6356 }
 0x6f1   :  { %6598 = vpow2.f32 %v1531_v20  ;;  %v6359_v43 = vunpack.i.h.bf16 %v6357_v26  ;;  %v6358_v45 = vunpack.i.l.bf16 %v6357_v26 }
 0x6f3   :  { %v6175_v59 = vpack.c.bf16 %v6359_v43, %v6358_v45 }
 0x6fb   :  { %v7846_v25 = vpop.eup %6598 }
 0x6fc   :  { %v1575_v55 = vsel %vm708_vm5, %v7846_v25, 0.0 }
 0x6fd   :  { %1576 = vadd.xlane.f32.xlu1 %v1575_v55 }
 0x70d   :  { %v1544_v63 = vpop.xlane.xlu0 %1543 }
 0x70e   :  { %6366 = vrot.lane.b32.xlu1 %v7585_v15, %s7117_s28  ;;  %6600 = vrcp.f32 %v1544_v63 }
 0x715   :  { %v1550_v15 = vpop.xlane.xlu0 %1549 }
 0x718   :  { %v6601_v29 = vpop.eup %6600 }
 0x719   :  { %v1604_v4 = vmul.f32 %v6601_v29, %v7769_v35 }
 0x721   :  { %v1541_v1 = vpop.xlane.xlu1 %1540 }
 0x722   :  { %6602 = vrcp.f32 %v1541_v1 }
 0x723   :  { %6604 = vrcp.f32 %v1550_v15 }
 0x72c   :  { %v6603_v30 = vpop.eup %6602 }
 0x72d   :  { %v1603_v2 = vmul.f32 %v6603_v30, %v7778_v41  ;;  %v6605_v35 = vpop.eup %6604 }
 0x72e   :  { %v1606_v57 = vmul.f32 %v6605_v35, %v7774_v38 }
 0x72f   :  { %5811 = vmatprep.mubr.msk.f32.mxu1 %vm708_vm5, %v1603_v2 }
 0x730   :  { %5812 = vmatmul.mubr.msk.f32.vlgmr.msra.gmra.mrb[14].mxu1 %vm708_vm5, %v1604_v4 }
 0x731   :  { %6162 = vmatpush3.bf16.msra.mxu1 %v7666_v12 }
 0x732   :  { %6168 = vmatprep.subr.bf16.mxu1 %v6167_v36 }
 0x744   :  { %v1574_v37 = vpop.xlane.xlu0 %1573 }
 0x748   :  { %v1547_v23 = vpop.xlane.xlu1 %1546 }
 0x749   :  { %6606 = vrcp.f32 %v1547_v23 }
 0x74c   :  { %v1556_v39 = vpop.xlane.xlu0 %1555  ;;  %v1571_v8 = vpop.xlane.xlu1 %1570 }
 0x74d   :  { %6608 = vrcp.f32 %v1556_v39 }
 0x750   :  { %v7857_v42 = vpop.xlane.xlu0 %1585  ;;  %v1553_v41 = vpop.xlane.xlu1 %1552 }
 0x751   :  { %6610 = vrcp.f32 %v1553_v41 }
 0x752   :  { %6612 = vrcp.f32 %v1571_v8 }
 0x753   :  { %v6607_v24 = vpop.eup %6606 }
 0x754   :  { %v1562_v48 = vpop.xlane.xlu0 %1561  ;;  %v1605_v12 = vmul.f32 %v6607_v24, %v7795_v27 }
 0x755   :  { %v1583_v52 = vpop.xlane.xlu1 %1582  ;;  %6614 = vrcp.f32 %v1562_v48 }
 0x756   :  { %5818 = vmatprep.mubr.msk.f32.mxu1 %vm708_vm5, %v1605_v12 }
 0x757   :  { %5819 = vmatmul.mubr.msk.f32.vlgmr.msra.gmra.mrb[16].mxu1 %vm708_vm5, %v1606_v57  ;;  %v6609_v3 = vpop.eup %6608 }
 0x758   :  { %6170 = vmatpush3.bf16.msra.mxu1 %v6167_v36  ;;  %v1568_v60 = vpop.xlane.xlu0 %1567  ;;  %v1608_v11 = vmul.f32 %v6609_v3, %v7803_v6 }
 0x759   :  { %v1559_v61 = vpop.xlane.xlu1 %1558  ;;  %6176 = vmatprep.subr.bf16.mxu1 %v6175_v59 }
 0x75a   :  { %6616 = vrcp.f32 %v1559_v61 }
 0x75b   :  { %6618 = vrcp.f32 %v1574_v37  ;;  %v6611_v44 = vpop.eup %6610 }
 0x75c   :  { %6620 = vrcp.f32 %v1583_v52  ;;  %v1580_v27 = vpop.xlane.xlu0 %1579  ;;  %v1607_v38 = vmul.f32 %v6611_v44, %v7809_v28  ;;  %v6613_v20 = vpop.eup %6612  ;;  %v6514_v44 = vld [vmem:[%s8448_s9 + $0x10] sm:$0xff]  }
 0x75d   :  { %6622 = vrcp.f32 %v1568_v60  ;;  %v1565_v46 = vpop.xlane.xlu1 %1564  ;;  %v1613_v33 = vmul.f32 %v6613_v20, %v7800_v34 }
 0x75e   :  { %6624 = vrcp.f32 %v1565_v46  ;;  %5825 = vmatprep.mubr.msk.f32.mxu0 %vm708_vm5, %v1607_v38 }
 0x75f   :  { %5826 = vmatmul.mubr.msk.f32.vlgmr.msra.gmra.mrb[14].mxu0 %vm708_vm5, %v1608_v11  ;;  %v6615_v55 = vpop.eup %6614  ;;  %6626 = vrcp.f32 %v7857_v42 }
 0x760   :  { %v6362_v47 = vpop.permute.xlu0 %6361  ;;  %6174 = vmatpush3.bf16.msra.mxu0 %v7587_v16  ;;  %v1610_v6 = vmul.f32 %v6615_v55, %v7820_v14  ;;  %6628 = vrcp.f32 %v1580_v27  ;;  %v6515_v27 = vld [vmem:[%s8448_s9 + $0x18] sm:$0xff]  }
 0x761   :  { %v6364_v18 = vunpack.i.h.bf16 %v6362_v47  ;;  %v6363_v49 = vunpack.i.l.bf16 %v6362_v47 }
 0x763   :  { %v6179_v26 = vpack.c.bf16 %v6364_v18, %v6363_v49 }
 0x764   :  { %v6617_v63 = vpop.eup %6616 }
 0x765   :  { %v6619_v1 = vpop.eup %6618  ;;  %6180 = vmatprep.subr.bf16.mxu0 %v6179_v26  ;;  %v1609_v28 = vmul.f32 %v6617_v63, %v7826_v62 }
 0x766   :  { %v6621_v29 = vpop.eup %6620  ;;  %v1614_v62 = vmul.f32 %v6619_v1, %v7789_v13 }
 0x767   :  { %v6623_v30 = vpop.eup %6622  ;;  %5832 = vmatprep.mubr.msk.f32.mxu1 %vm708_vm5, %v1609_v28  ;;  %v1617_v14 = vmul.f32 %v6621_v29, %v7818_v58 }
 0x768   :  { %v6625_v5 = vpop.eup %6624  ;;  %5833 = vmatmul.mubr.msk.f32.vlgmr.msra.gmra.mrb[18].mxu1 %vm708_vm5, %v1610_v6  ;;  %v1612_v2 = vmul.f32 %v6623_v30, %v7828_v17 }
 0x769   :  { %6178 = vmatpush3.bf16.msra.mxu1 %v6175_v59  ;;  %5846 = vmatprep.mubr.msk.f32.mxu1 %vm708_vm5, %v1613_v33  ;;  %v1611_v16 = vmul.f32 %v6625_v5, %v7835_v7  ;;  %v6627_v36 = vpop.eup %6626 }
 0x76a   :  { %v6629_v15 = vpop.eup %6628  ;;  %v1618_v37 = vmul.f32 %v6627_v36, %v7812_v10 }
 0x76b   :  { %5839 = vmatprep.mubr.msk.f32.mxu0 %vm708_vm5, %v1611_v16  ;;  %v1616_v39 = vmul.f32 %v6629_v15, %v7837_v9  ;;  %v6512_v9 = vld [vmem:[%s8448_s9] sm:$0xff]  }
 0x76c   :  { %5840 = vmatmul.mubr.msk.f32.vlgmr.msra.gmra.mrb[16].mxu0 %vm708_vm5, %v1612_v2  ;;  %5847 = vmatmul.mubr.msk.f32.vlgmr.msra.gmra.mrb[20].mxu1 %vm708_vm5, %v1614_v62 }
 0x76d   :  { %6182 = vmatpush3.bf16.msra.mxu0 %v6179_v26  ;;  %5860 = vmatprep.mubr.msk.f32.mxu1 %vm708_vm5, %v1617_v14 }
 0x76e   :  { %5863 = vmatprep.subr.bf16.mxu0 %v6512_v9 }
 0x78a   :  { %v1577_v34 = vpop.xlane.xlu1 %1576 }
 0x78b   :  { %6630 = vrcp.f32 %v1577_v34 }
 0x78e   :  { %v6367_v7 = vpop.permute.xlu1 %6366 }
 0x78f   :  { %v6369_v17 = vunpack.i.h.bf16 %v6367_v7  ;;  %v6368_v4 = vunpack.i.l.bf16 %v6367_v7 }
 0x791   :  { %v6183_v13 = vpack.c.bf16 %v6369_v17, %v6368_v4 }
 0x793   :  { %6184 = vmatprep.subr.bf16.mxu1 %v6183_v13 }
 0x794   :  { %6186 = vmatpush3.bf16.msra.mxu1 %v6183_v13 }
 0x795   :  { %v6631_v58 = vpop.eup %6630 }
 0x796   :  { %v1615_v23 = vmul.f32 %v6631_v58, %v7846_v25  ;;  %v6513_v25 = vld [vmem:[%s8448_s9 + $0x8] sm:$0xff]  }
 0x797   :  { %5861 = vmatmul.mubr.msk.f32.vlgmr.msra.gmra.mrb[22].mxu1 %vm708_vm5, %v1618_v37 }
 0x798   :  { %5853 = vmatprep.mubr.msk.f32.mxu0 %vm708_vm5, %v1615_v23 }
 0x799   :  { %5854 = vmatmul.mubr.msk.f32.vlgmr.msra.gmra.mrb[18].mxu0 %vm708_vm5, %v1616_v39 }
 0x79a   :  { %5864 = vmatpush3.bf16.msra.mxu0 %v6512_v9 }
 0x79b   :  { %5865 = vmatprep.subr.bf16.mxu0 %v6513_v25 }
 0x79e   :  { %5866 = vmatpush3.bf16.msra.mxu0 %v6513_v25 }
 0x79f   :  { %5867 = vmatprep.subr.bf16.mxu0 %v6514_v44 }
 0x7a2   :  { %5868 = vmatpush3.bf16.msra.mxu0 %v6514_v44 }
 0x7a3   :  { %5869 = vmatprep.subr.bf16.mxu0 %v6515_v27 }
 0x7a6   :  { %5870 = vmatpush3.bf16.msra.mxu0 %v6515_v27 }
 0x803   :  { %v5813_v8 = vpop.f32.mrb[14].mxu1 }
 0x804   :  { %v1691_v42 = vpop.f32.mrb[15].mxu1 }
 0x82a   :  { %v5820_v41 = vpop.f32.mrb[16].mxu1 }
 0x82b   :  { %v1780_v35 = vpop.f32.mrb[17].mxu1 }
 0x82c   :  { %v6370_v24 = vpack.i.bf16 %v5820_v41, %v1780_v35 }
 0x82e   :  { %6371 = vrot.lane.b32.xlu0 %v6370_v24, %s7096_s27 }
 0x832   :  { %v5827_v43 = vpop.f32.mrb[14].mxu0 }
 0x833   :  { %v1867_v45 = vpop.f32.mrb[15].mxu0 }
 0x834   :  { %v6375_v10 = vpack.i.bf16 %v5827_v43, %v1867_v45  ;;  %v5366_v45 = vld [vmem:[#allocation10] ss:$0 sm:$0xff] }
 0x836   :  { %6376 = vrot.lane.b32.xlu1 %v6375_v10, %s8482_s25 }
 0x83b   :  { %v5834_v48 = vpop.f32.mrb[18].mxu1 }
 0x83c   :  { %v1954_v12 = vpop.f32.mrb[19].mxu1 }
 0x83d   :  { %v6380_v52 = vpack.i.bf16 %v5834_v48, %v1954_v12 }
 0x83f   :  { %6381 = vrot.lane.b32.xlu1 %v6380_v52, %s7115_s1  ;;  %v5841_v57 = vpop.f32.mrb[16].mxu0  ;;  %v5848_v59 = vpop.f32.mrb[20].mxu1 }
 0x840   :  { %v2067_v60 = vpop.f32.mrb[17].mxu0  ;;  %v2156_v61 = vpop.f32.mrb[21].mxu1 }
 0x841   :  { %v6385_v3 = vpack.i.bf16 %v5848_v59, %v2156_v61 }
 0x843   :  { %6386 = vrot.lane.b32.xlu0 %v6385_v3, %s7096_s27 }
 0x86a   :  { %v5862_v46 = vpop.f32.mrb[22].mxu1 }
 0x86b   :  { %v2330_v38 = vpop.f32.mrb[23].mxu1 }
 0x86c   :  { %v6395_v11 = vpack.i.bf16 %v5862_v46, %v2330_v38  ;;  %v5855_v47 = vpop.f32.mrb[18].mxu0 }
 0x86d   :  { %v2243_v18 = vpop.f32.mrb[19].mxu0 }
 0x86e   :  { %v6390_v49 = vpack.i.bf16 %v5855_v47, %v2243_v18  ;;  %6396 = vrot.lane.b32.xlu1 %v6395_v11, %s7115_s1 }
 0x870   :  { %6391 = vrot.lane.b32.xlu0 %v6390_v49, %s8482_s25 }
 0x8a0   :  { %v6372_v20 = vpop.permute.xlu0 %6371 }
 0x8a1   :  { %v6374_v26 = vunpack.i.h.bf16 %v6372_v20  ;;  %v6373_v63 = vunpack.i.l.bf16 %v6372_v20 }
 0x8a3   :  { %v1988_v6 = vsel %vm708_vm5, %v5813_v8, %v6374_v26  ;;  %v1987_v30 = vsel %vm708_vm5, %v1691_v42, %v6373_v63 }
 0x8a8   :  { %v6377_v55 = vpop.permute.xlu1 %6376 }
 0x8a9   :  { %v6379_v1 = vunpack.i.h.bf16 %v6377_v55  ;;  %v6378_v28 = vunpack.i.l.bf16 %v6377_v55 }
 0x8ab   :  { %v1991_v16 = vsel %vm1989_vm7, %v1988_v6, %v6379_v1  ;;  %v1990_v2 = vsel %vm1989_vm7, %v1987_v30, %v6378_v28 }
 0x8b1   :  { %v6382_v29 = vpop.permute.xlu1 %6381 }
 0x8b2   :  { %v6384_v33 = vunpack.i.h.bf16 %v6382_v29  ;;  %v6383_v5 = vunpack.i.l.bf16 %v6382_v29 }
 0x8b4   :  { %v1993_v62 = vsel %vm1992_vm8, %v1990_v2, %v6383_v5  ;;  %v1994_v14 = vsel %vm1992_vm8, %v1991_v16, %v6384_v33 }
 0x8b5   :  { %v2369_v34 = vpack.c.bf16 %v1994_v14, %v1993_v62  ;;  %v6387_v7 = vpop.permute.xlu0 %6386  ;;  %v6516_v62 = vld [vmem:[#allocation14] sm:$0xff]   ;;  %v6517_v14 = vld [vmem:[#allocation14 + $0x8] sm:$0xff]  }
 0x8b6   :  { %v6389_v17 = vunpack.i.h.bf16 %v6387_v7  ;;  %v6388_v4 = vunpack.i.l.bf16 %v6387_v7  ;;  %5875 = vmatprep.subr.bf16.mxu1 %v6516_v62  ;;  %v6519_v7 = vld [vmem:[#allocation14 + $0x18] sm:$0xff]  }
 0x8b7   :  { %5871 = vmatprep.mubr.msk.bf16.mxu0 %vm280_vm0, %v2369_v34  ;;  %5876 = vmatpush3.bf16.msra.mxu1 %v6516_v62  ;;  %v6518_v34 = vld [vmem:[#allocation14 + $0x10] sm:$0xff]  }
 0x8b8   :  { %v2364_v37 = vsel %vm708_vm5, %v5841_v57, %v6389_v17  ;;  %v2363_v23 = vsel %vm708_vm5, %v2067_v60, %v6388_v4  ;;  %5877 = vmatprep.subr.bf16.mxu1 %v6517_v14 }
 0x8bb   :  { %5878 = vmatpush3.bf16.msra.mxu1 %v6517_v14 }
 0x8bc   :  { %5879 = vmatprep.subr.bf16.mxu1 %v6518_v34 }
 0x8bf   :  { %5880 = vmatpush3.bf16.msra.mxu1 %v6518_v34 }
 0x8c0   :  { %5881 = vmatprep.subr.bf16.mxu1 %v6519_v7 }
 0x8c3   :  { %5882 = vmatpush3.bf16.msra.mxu1 %v6519_v7 }
 0x8e0   :  { %v6397_v13 = vpop.permute.xlu1 %6396 }
 0x8e1   :  { %v6399_v39 = vunpack.i.h.bf16 %v6397_v13  ;;  %v6398_v8 = vunpack.i.l.bf16 %v6397_v13 }
 0x8e2   :  { %v6392_v36 = vpop.permute.xlu0 %6391 }
 0x8e3   :  { %v6394_v15 = vunpack.i.h.bf16 %v6392_v36  ;;  %v6393_v58 = vunpack.i.l.bf16 %v6392_v36 }
 0x8e5   :  { %v2365_v42 = vsel %vm1989_vm7, %v2363_v23, %v6393_v58  ;;  %v2366_v41 = vsel %vm1989_vm7, %v2364_v37, %v6394_v15 }
 0x8e6   :  { %v2367_v35 = vsel %vm1992_vm8, %v2365_v42, %v6398_v8  ;;  %v2368_v24 = vsel %vm1992_vm8, %v2366_v41, %v6399_v39 }
 0x8e7   :  { %v2370_v43 = vpack.c.bf16 %v2368_v24, %v2367_v35  ;;  %v5373_v24 = vld [vmem:[#allocation11] ss:$0 sm:$0xff] }
 0x8e9   :  { %5872 = vmatmul.mubr.msk.bf16.vlgmr.msra.gmra.mrb[20].mxu0 %vm280_vm0, %v2370_v43 }
 0x9bc   :  { %v5873_v10 = vpop.f32.mrb[20].mxu0 }
 0x9bd   :  { %v2450_v9 = vpop.f32.mrb[21].mxu0  ;;  %v2459_v25 = vadd.f32 %v5873_v10, %v5366_v45 }
 0x9be   :  { %v2451_v48 = vadd.f32 %v5366_v45, %v2450_v9  ;;  %v5874_v12 = vpop.f32.mrb[22].mxu0 }
 0x9bf   :  { %v2453_v52 = vpop.f32.mrb[23].mxu0  ;;  %v2462_v60 = vadd.f32 %v5874_v12, %v5366_v45  ;;  %v2467_v44 = vadd.f32 %v2459_v25, %v7551_v51 }
 0x9c0   :  { %v2454_v57 = vadd.f32 %v5366_v45, %v2453_v52  ;;  %v2465_v59 = vadd.f32 %v2451_v48, %v7543_v32  ;;  %v5374_v48 = vld [vmem:[#allocation13] ss:$0 sm:$0xff] }
 0x9c1   :  { %v2477_v46 = vsel %vm280_vm0, %v2467_v44, 0.0  ;;  %v2468_v38 = vadd.f32 %v2462_v60, %v7549_v50 }
 0x9c2   :  { %v2471_v61 = vsel %vm280_vm0, %v2465_v59, 0.0  ;;  %v2466_v3 = vadd.f32 %v2454_v57, %v7541_v31 }
 0x9c3   :  { %2472 = vadd.xlane.f32.xlu0 %v2471_v61  ;;  %v2480_v11 = vsel %vm280_vm0, %v2468_v38, 0.0 }
 0x9c4   :  { %v2474_v27 = vsel %vm280_vm0, %v2466_v3, 0.0 }
 0x9c5   :  { %2475 = vadd.xlane.f32.xlu1 %v2474_v27 }
 0x9c7   :  { %2478 = vadd.xlane.f32.xlu0 %v2477_v46 }
 0x9cb   :  { %2481 = vadd.xlane.f32.xlu0 %v2480_v11 }
 0xa50   :  { %v2473_v32 = vpop.xlane.xlu0 %2472 }
 0xa51   :  { %v2483_v47 = vmul.f32 0.015625, %v2473_v32  ;;  %v6520_v32 = vld [vmem:[%s8454_s15] sm:$0xff]  }
 0xa52   :  { %v2476_v18 = vpop.xlane.xlu1 %2475  ;;  %5887 = vmatprep.subr.bf16.mxu0 %v6520_v32 }
 0xa53   :  { %v2487_v49 = vsub.f32 %v2465_v59, %v2483_v47  ;;  %v2484_v20 = vmul.f32 0.015625, %v2476_v18  ;;  %5888 = vmatpush3.bf16.msra.mxu0 %v6520_v32  ;;  %v6521_v47 = vld [vmem:[%s8454_s15 + $0x8] sm:$0xff]   ;;  %v6522_v18 = vld [vmem:[%s8454_s15 + $0x10] sm:$0xff]  }
 0xa54   :  { %v2479_v31 = vpop.xlane.xlu0 %2478  ;;  %5889 = vmatprep.subr.bf16.mxu0 %v6521_v47 }
 0xa55   :  { %v2488_v55 = vsub.f32 %v2466_v3, %v2484_v20  ;;  %v2485_v51 = vmul.f32 0.015625, %v2479_v31  ;;  %v2491_v26 = vmul.f32 %v2487_v49, %v2487_v49  ;;  %v6524_v20 = vld [vmem:[%s8454_s15 + $0x20] sm:$0xff]   ;;  %v6525_v31 = vld [vmem:[%s8454_s15 + $0x28] sm:$0xff]  }
 0xa57   :  { %v2489_v63 = vsub.f32 %v2467_v44, %v2485_v51  ;;  %v2495_v1 = vsel %vm280_vm0, %v2491_v26, 0.0  ;;  %v2492_v28 = vmul.f32 %v2488_v55, %v2488_v55  ;;  %5890 = vmatpush3.bf16.msra.mxu0 %v6521_v47  ;;  %v6527_v51 = vld [vmem:[%s8454_s15 + $0x38] sm:$0xff]   ;;  %v5375_v26 = vld [vmem:[#allocation16] ss:$0 sm:$0xff] }
 0xa58   :  { %2496 = vadd.xlane.f32.xlu1 %v2495_v1  ;;  %v2482_v29 = vpop.xlane.xlu0 %2481  ;;  %5891 = vmatprep.subr.bf16.mxu0 %v6522_v18 }
 0xa59   :  { %v2486_v50 = vmul.f32 0.015625, %v2482_v29  ;;  %v2498_v6 = vsel %vm280_vm0, %v2492_v28, 0.0  ;;  %v2493_v30 = vmul.f32 %v2489_v63, %v2489_v63 }
 0xa5a   :  { %2499 = vadd.xlane.f32.xlu0 %v2498_v6 }
 0xa5b   :  { %v2490_v33 = vsub.f32 %v2468_v38, %v2486_v50  ;;  %v2501_v5 = vsel %vm280_vm0, %v2493_v30, 0.0  ;;  %5892 = vmatpush3.bf16.msra.mxu0 %v6522_v18 }
 0xa5c   :  { %2502 = vadd.xlane.f32.xlu1 %v2501_v5 }
 0xa5d   :  { %v2494_v16 = vmul.f32 %v2490_v33, %v2490_v33 }
 0xa5f   :  { %v2504_v2 = vsel %vm280_vm0, %v2494_v16, 0.0 }
 0xa60   :  { %2505 = vadd.xlane.f32.xlu0 %v2504_v2 }
 0xae5   :  { %v2497_v17 = vpop.xlane.xlu1 %2496 }
 0xae6   :  { %v2507_v4 = vmul.f32 0.015625, %v2497_v17 }
 0xae7   :  { %v2500_v13 = vpop.xlane.xlu0 %2499 }
 0xae8   :  { %v2511_v36 = vadd.f32 1e-07, %v2507_v4  ;;  %v2508_v15 = vmul.f32 0.015625, %v2500_v13 }
 0xae9   :  { %v2503_v58 = vpop.xlane.xlu1 %2502 }
 0xaea   :  { %6632 = vrsqrt.f32 %v2511_v36  ;;  %v2512_v37 = vadd.f32 1e-07, %v2508_v15  ;;  %v2509_v23 = vmul.f32 0.015625, %v2503_v58 }
 0xaec   :  { %6634 = vrsqrt.f32 %v2512_v37  ;;  %v2513_v39 = vadd.f32 1e-07, %v2509_v23 }
 0xaed   :  { %v2506_v8 = vpop.xlane.xlu0 %2505 }
 0xaee   :  { %6636 = vrsqrt.f32 %v2513_v39  ;;  %v2510_v42 = vmul.f32 0.015625, %v2506_v8 }
 0xaf0   :  { %v2514_v41 = vadd.f32 1e-07, %v2510_v42 }
 0xaf2   :  { %6638 = vrsqrt.f32 %v2514_v41 }
 0xaf4   :  { %v6633_v35 = vpop.eup %6632 }
 0xaf5   :  { %v2519_v43 = vmul.f32 %v6633_v35, %v2487_v49  ;;  %v6523_v49 = vld [vmem:[%s8454_s15 + $0x18] sm:$0xff]  }
 0xaf6   :  { %v6635_v45 = vpop.eup %6634  ;;  %5893 = vmatprep.subr.bf16.mxu0 %v6523_v49 }
 0xaf7   :  { %v2520_v10 = vmul.f32 %v6635_v45, %v2488_v55  ;;  %v2529_v9 = vmul.f32 %v5373_v24, %v2519_v43  ;;  %5894 = vmatpush3.bf16.msra.mxu0 %v6523_v49  ;;  %v6526_v55 = vld [vmem:[%s8454_s15 + $0x30] sm:$0xff]  }
 0xaf8   :  { %v6637_v25 = vpop.eup %6636  ;;  %5895 = vmatprep.subr.bf16.mxu0 %v6524_v20  ;;  %v5382_v49 = vld [vmem:[#allocation17] ss:$0 sm:$0xff] }
 0xaf9   :  { %v2521_v12 = vmul.f32 %v6637_v25, %v2489_v63  ;;  %v2530_v52 = vmul.f32 %v5373_v24, %v2520_v10  ;;  %v7933_v57 = vadd.f32 %v5374_v48, %v2529_v9 }
 0xafb   :  { %v7935_v59 = vadd.f32 %v5374_v48, %v2530_v52  ;;  %v2531_v61 = vmul.f32 %v5373_v24, %v2521_v12  ;;  %5896 = vmatpush3.bf16.msra.mxu0 %v6524_v20 }
 0xafc   :  { %v6639_v60 = vpop.eup %6638  ;;  %5897 = vmatprep.subr.bf16.mxu0 %v6525_v31 }
 0xafd   :  { %v2522_v3 = vmul.f32 %v6639_v60, %v2490_v33  ;;  %v2543_v44 = vpack.c.bf16 %v7935_v59, %v7933_v57  ;;  %v7940_v46 = vadd.f32 %v5374_v48, %v2531_v61 }
 0xaff   :  { %v2532_v27 = vmul.f32 %v5373_v24, %v2522_v3  ;;  %5883 = vmatprep.mubr.msk.bf16.mxu1 %vm280_vm0, %v2543_v44  ;;  %5898 = vmatpush3.bf16.msra.mxu0 %v6525_v31 }
 0xb00   :  { %5899 = vmatprep.subr.bf16.mxu0 %v6526_v55 }
 0xb01   :  { %v7942_v38 = vadd.f32 %v5374_v48, %v2532_v27 }
 0xb03   :  { %v2544_v11 = vpack.c.bf16 %v7942_v38, %v7940_v46  ;;  %5900 = vmatpush3.bf16.msra.mxu0 %v6526_v55 }
 0xb04   :  { %5901 = vmatprep.subr.bf16.mxu0 %v6527_v51 }
 0xb05   :  { %5884 = vmatmul.mubr.msk.bf16.vlgmr.msra.gmra.mrb[24].mxu1 %vm280_vm0, %v2544_v11 }
 0xb06   :  { %2977 = vmatprep.mubr.bf16.mxu1 %v7112_v0 }
 0xb07   :  { %5902 = vmatpush3.bf16.msra.mxu0 %v6527_v51 }
 0xbd8   :  { %v5885_v63 = vpop.f32.mrb[24].mxu1 }
 0xbd9   :  { %v2633_v1 = vadd.f32 %v5885_v63, %v5375_v26  ;;  %v2624_v28 = vpop.f32.mrb[25].mxu1 }
 0xbda   :  { %v2625_v29 = vadd.f32 %v5375_v26, %v2624_v28  ;;  %v5886_v50 = vpop.f32.mrb[26].mxu1 }
 0xbdb   :  { %v2645_v6 = vmul.f32 0.044715, %v2633_v1  ;;  %v2636_v30 = vadd.f32 %v5886_v50, %v5375_v26  ;;  %v2627_v33 = vpop.f32.mrb[27].mxu1  ;;  %v2641_v48 = vmul.f32 0.5, %v2633_v1 }
 0xbdc   :  { %v2643_v5 = vmul.f32 0.044715, %v2625_v29  ;;  %v2628_v16 = vadd.f32 %v5375_v26, %v2627_v33  ;;  %v2639_v60 = vmul.f32 0.5, %v2625_v29 }
 0xbdd   :  { %v2649_v2 = vmul.f32 %v2645_v6, %v2633_v1  ;;  %v2646_v62 = vmul.f32 0.044715, %v2636_v30  ;;  %v2642_v12 = vmul.f32 0.5, %v2636_v30 }
 0xbde   :  { %v2647_v14 = vmul.f32 %v2643_v5, %v2625_v29  ;;  %v2644_v34 = vmul.f32 0.044715, %v2628_v16  ;;  %v2640_v61 = vmul.f32 0.5, %v2628_v16 }
 0xbdf   :  { %v2653_v7 = vmul.f32 %v2649_v2, %v2633_v1  ;;  %v2650_v17 = vmul.f32 %v2646_v62, %v2636_v30 }
 0xbe0   :  { %v2651_v4 = vmul.f32 %v2647_v14, %v2625_v29  ;;  %v2648_v13 = vmul.f32 %v2644_v34, %v2628_v16 }
 0xbe1   :  { %v2657_v36 = vadd.f32 %v2653_v7, %v2633_v1  ;;  %v2654_v15 = vmul.f32 %v2650_v17, %v2636_v30 }
 0xbe2   :  { %v2652_v58 = vmul.f32 %v2648_v13, %v2628_v16  ;;  %v2655_v37 = vadd.f32 %v2651_v4, %v2625_v29 }
 0xbe3   :  { %v2661_v23 = vmul.f32 0.7978846, %v2657_v36  ;;  %v2658_v39 = vadd.f32 %v2654_v15, %v2636_v30 }
 0xbe4   :  { %v2656_v8 = vadd.f32 %v2652_v58, %v2628_v16  ;;  %v2659_v42 = vmul.f32 0.7978846, %v2655_v37 }
 0xbe5   :  { %6640 = vtanh.f32 %v2661_v23  ;;  %v2662_v41 = vmul.f32 0.7978846, %v2658_v39 }
 0xbe6   :  { %v2660_v35 = vmul.f32 0.7978846, %v2656_v8  ;;  %6642 = vtanh.f32 %v2659_v42 }
 0xbe7   :  { %6644 = vtanh.f32 %v2662_v41 }
 0xbe8   :  { %6646 = vtanh.f32 %v2660_v35  ;;  %v6530_v35 = vld [vmem:[%s8446_s7 + $0x44] ss:$8 sps:$4 sm:$0xff]  }
 0xbe9   :  { %2945 = vmatprep.subr.bf16.mxu1 %v6530_v35 }
 0xbef   :  { %v6641_v24 = vpop.eup %6640 }
 0xbf0   :  { %v6643_v43 = vpop.eup %6642  ;;  %v2669_v45 = vadd.f32 1.0, %v6641_v24  ;;  %v6528_v24 = vld [vmem:[%s8446_s7 + $0x40] ss:$8 sps:$4 sm:$0xff]  }
 0xbf1   :  { %v6645_v10 = vpop.eup %6644  ;;  %v2667_v9 = vadd.f32 1.0, %v6643_v43  ;;  %2946 = vmatpush1.bf16.msra.mxu1 %v6528_v24  ;;  %v6533_v43 = vld [vmem:[%s8446_s7 + $0x54] ss:$8 sps:$4 sm:$0xff]  }
 0xbf2   :  { %v6647_v25 = vpop.eup %6646  ;;  %v2670_v52 = vadd.f32 1.0, %v6645_v10  ;;  %v2673_v44 = vmul.f32 %v2669_v45, %v2641_v48  ;;  %v6531_v45 = vld [vmem:[%s8446_s7 + $0x50] ss:$8 sps:$4 sm:$0xff]   ;;  %2947 = vmatprep.subr.bf16.mxu1 %v6533_v43  ;;  %v6536_v10 = vld [vmem:[%s8446_s7 + $0x64] ss:$8 sps:$4 sm:$0xff]  }
 0xbf3   :  { %v2668_v3 = vadd.f32 1.0, %v6647_v25  ;;  %v2671_v11 = vmul.f32 %v2667_v9, %v2639_v60  ;;  %v6534_v9 = vld [vmem:[%s8446_s7 + $0x60] ss:$8 sps:$4 sm:$0xff]   ;;  %v6537_v25 = vld [vmem:[%s8446_s7 + $0x70] ss:$8 sps:$4 sm:$0xff]  }
 0xbf4   :  { %v2674_v27 = vmul.f32 %v2670_v52, %v2642_v12  ;;  %v6539_v48 = vld [vmem:[%s8446_s7 + $0x74] ss:$8 sps:$4 sm:$0xff]  }
 0xbf5   :  { %v2672_v32 = vmul.f32 %v2668_v3, %v2640_v61  ;;  %2948 = vmatpush1.bf16.msra.mxu1 %v6531_v45 }
 0xbf6   :  { %v2676_v47 = vpack.c.bf16 %v2674_v27, %v2673_v44  ;;  %2949 = vmatprep.subr.bf16.mxu1 %v6536_v10 }
 0xbf7   :  { %v2675_v18 = vpack.c.bf16 %v2672_v32, %v2671_v11 }
 0xbf9   :  { %5903 = vmatprep.mubr.bf16.mxu0 %v2675_v18  ;;  %2950 = vmatpush1.bf16.msra.mxu1 %v6534_v9 }
 0xbfa   :  { %5904 = vmatmul.mubr.bf16.vlgmr.msra.gmra.mrb[24].mxu0 %v2676_v47  ;;  %2951 = vmatprep.subr.bf16.mxu1 %v6539_v48 }
 0xbfd   :  { %2952 = vmatpush1.bf16.msra.mxu1 %v6537_v25 }
 0xccd   :  { %v5905_v20 = vpop.f32.mrb[24].mxu0 }
 0xcce   :  { %v2782_v31 = vpop.f32.mrb[25].mxu0  ;;  %v2791_v55 = vadd.f32 %v5905_v20, %v5382_v49 }
 0xccf   :  { %v2783_v51 = vadd.f32 %v5382_v49, %v2782_v31  ;;  %v5906_v26 = vpop.f32.mrb[26].mxu0  ;;  %v5391_v31 = vld [vmem:[#allocation19] ss:$0 sm:$0xff] }
 0xcd0   :  { %v2785_v63 = vpop.f32.mrb[27].mxu0  ;;  %v2794_v1 = vadd.f32 %v5906_v26, %v5382_v49  ;;  %v2799_v30 = vadd.f32 %v2791_v55, %v7940_v46 }
 0xcd1   :  { %v2786_v28 = vadd.f32 %v5382_v49, %v2785_v63  ;;  %v2797_v29 = vadd.f32 %v2783_v51, %v7933_v57 }
 0xcd2   :  { %v2800_v5 = vadd.f32 %v2794_v1, %v7942_v38  ;;  %v2809_v16 = vsel %vm280_vm0, %v2799_v30, 0.0 }
 0xcd3   :  { %v2803_v50 = vsel %vm280_vm0, %v2797_v29, 0.0  ;;  %v2798_v6 = vadd.f32 %v2786_v28, %v7935_v59  ;;  %v5392_v28 = vld [vmem:[#allocation20] ss:$0 sm:$0xff] }
 0xcd4   :  { %2804 = vadd.xlane.f32.xlu1 %v2803_v50  ;;  %v2812_v2 = vsel %vm280_vm0, %v2800_v5, 0.0 }
 0xcd5   :  { %v2806_v33 = vsel %vm280_vm0, %v2798_v6, 0.0 }
 0xcd6   :  { %2807 = vadd.xlane.f32.xlu0 %v2806_v33 }
 0xcd8   :  { %2810 = vadd.xlane.f32.xlu1 %v2809_v16 }
 0xcda   :  { %2813 = vadd.xlane.f32.xlu0 %v2812_v2 }
 0xd61   :  { %v2805_v62 = vpop.xlane.xlu1 %2804 }
 0xd62   :  { %v2815_v57 = vmul.f32 0.015625, %v2805_v62 }
 0xd63   :  { %v2808_v14 = vpop.xlane.xlu0 %2807 }
 0xd64   :  { %v2819_v34 = vsub.f32 %v2797_v29, %v2815_v57  ;;  %v2816_v7 = vmul.f32 0.015625, %v2808_v14 }
 0xd65   :  { %v2811_v59 = vpop.xlane.xlu1 %2810 }
 0xd66   :  { %v2820_v17 = vsub.f32 %v2798_v6, %v2816_v7  ;;  %v2817_v46 = vmul.f32 0.015625, %v2811_v59  ;;  %v2823_v4 = vmul.f32 %v2819_v34, %v2819_v34  ;;  %v2887_v7 = vld [vmem:[#allocation8 + $0x2] sm:$0x3] }
 0xd67   :  { %v2814_v13 = vpop.xlane.xlu0 %2813  ;;  %v2892_v59 = vrot.slane %v2887_v7, %v7560_v54 }
 0xd68   :  { %v2821_v36 = vsub.f32 %v2799_v30, %v2817_v46  ;;  %v2818_v15 = vmul.f32 0.015625, %v2814_v13  ;;  %v2827_v38 = vsel %vm280_vm0, %v2823_v4, 0.0  ;;  %v2824_v58 = vmul.f32 %v2820_v17, %v2820_v17 }
 0xd69   :  { %2828 = vadd.xlane.f32.xlu1 %v2827_v38  ;;  %v2896_v46 = vrot.slane %v2887_v7, %v599_v56 }
 0xd6a   :  { %v2822_v37 = vsub.f32 %v2800_v5, %v2818_v15  ;;  %v2830_v23 = vsel %vm280_vm0, %v2824_v58, 0.0  ;;  %v2825_v39 = vmul.f32 %v2821_v36, %v2821_v36 }
 0xd6b   :  { %2831 = vadd.xlane.f32.xlu0 %v2830_v23 }
 0xd6c   :  { %v2833_v8 = vsel %vm280_vm0, %v2825_v39, 0.0  ;;  %v2826_v42 = vmul.f32 %v2822_v37, %v2822_v37 }
 0xd6d   :  { %2834 = vadd.xlane.f32.xlu1 %v2833_v8 }
 0xd6e   :  { %v2836_v41 = vsel %vm280_vm0, %v2826_v42, 0.0 }
 0xd6f   :  { %2837 = vadd.xlane.f32.xlu0 %v2836_v41 }
 0xdf6   :  { %v2829_v12 = vpop.xlane.xlu1 %2828 }
 0xdf7   :  { %v2839_v52 = vmul.f32 0.015625, %v2829_v12 }
 0xdf8   :  { %v2832_v60 = vpop.xlane.xlu0 %2831 }
 0xdf9   :  { %v2843_v61 = vadd.f32 1e-07, %v2839_v52  ;;  %v2840_v3 = vmul.f32 0.015625, %v2832_v60 }
 0xdfa   :  { %v2835_v44 = vpop.xlane.xlu1 %2834 }
 0xdfb   :  { %6648 = vrsqrt.f32 %v2843_v61  ;;  %v2844_v27 = vadd.f32 1e-07, %v2840_v3  ;;  %v2841_v11 = vmul.f32 0.015625, %v2835_v44 }
 0xdfc   :  { %v2838_v32 = vpop.xlane.xlu0 %2837 }
 0xdfd   :  { %6650 = vrsqrt.f32 %v2844_v27  ;;  %v2845_v47 = vadd.f32 1e-07, %v2841_v11  ;;  %v2842_v18 = vmul.f32 0.015625, %v2838_v32 }
 0xdff   :  { %6652 = vrsqrt.f32 %v2845_v47  ;;  %v2846_v49 = vadd.f32 1e-07, %v2842_v18 }
 0xe01   :  { %6654 = vrsqrt.f32 %v2846_v49 }
 0xe05   :  { %v6649_v20 = vpop.eup %6648 }
 0xe06   :  { %v2851_v55 = vmul.f32 %v6649_v20, %v2819_v34 }
 0xe07   :  { %v6651_v51 = vpop.eup %6650 }
 0xe08   :  { %v2861_v26 = vmul.f32 %v5391_v31, %v2851_v55  ;;  %v2852_v63 = vmul.f32 %v6651_v51, %v2820_v17 }
 0xe09   :  { %v6653_v1 = vpop.eup %6652 }
 0xe0a   :  { %v2862_v29 = vmul.f32 %v5391_v31, %v2852_v63  ;;  %v2853_v6 = vmul.f32 %v6653_v1, %v2821_v36  ;;  %v8008_v33 = vadd.f32 %v5392_v28, %v2861_v26 }
 0xe0b   :  { %v6655_v50 = vpop.eup %6654 }
 0xe0c   :  { %v2854_v30 = vmul.f32 %v6655_v50, %v2822_v37  ;;  %v8010_v5 = vadd.f32 %v5392_v28, %v2862_v29  ;;  %v2863_v62 = vmul.f32 %v5391_v31, %v2853_v6 }
 0xe0e   :  { %v2875_v16 = vpack.c.bf16 %v8010_v5, %v8008_v33  ;;  %v2864_v2 = vmul.f32 %v5391_v31, %v2854_v30  ;;  %v8018_v14 = vadd.f32 %v5392_v28, %v2863_v62 }
 0xe10   :  { %5409 = vmatmul.mubr.msk.bf16.vlgmr.msra.gmra.mrb[28].mxu1 %vm280_vm0, %v2875_v16  ;;  %v8016_v57 = vadd.f32 %v5392_v28, %v2864_v2 }
 0xe11   :  { %2987 = vmatprep.mubr.bf16.mxu1 %v7112_v0 }
 0xe12   :  { %v2876_v34 = vpack.c.bf16 %v8016_v57, %v8018_v14 }
 0xe18   :  { %5410 = vmatmul.mubr.msk.bf16.gmra.mrb[32].mxu1 %vm280_vm0, %v2876_v34 }
 0xee3   :  { %v2979_v17 = vpop.f32.mrb[28].mxu1 }
 0xee4   :  { %v2980_v4 = vadd.f32 %v2979_v17, %v2892_v59  ;;  %v2981_v13 = vpop.f32.mrb[29].mxu1 }
 0xee5   :  { %v2983_v36 = vpop.f32.mrb[30].mxu1  ;;  %v2982_v38 = vadd.f32 %v2981_v13, %v2896_v46 }
 0xee6   :  { %v8026_v0 = vadd.f32 %v2983_v36, %v2892_v59  ;;  %v2985_v15 = vpop.f32.mrb[31].mxu1  ;;  %5911 = vmatprep.mubr.msk.f32.mxu1 %vm708_vm5, %v2980_v4 }
 0xee7   :  { %v2986_v58 = vadd.f32 %v2985_v15, %v2896_v46 }
 0xee8   :  { %v6405_v37 = vpack.i.bf16 %v8026_v0, %v2980_v4 }
 0xee9   :  { %v8030_v23 = vpack.i.bf16 %v2986_v58, %v2982_v38  ;;  %v8032_v39 = vpack.c.bf16 %v2986_v58, %v2982_v38 }
 0xeea   :  { %6406 = vrot.lane.b32.xlu0 %v6405_v37, %s7115_s1  ;;  %6401 = vrot.lane.b32.xlu1 %v6405_v37, %s7098_s11 }
 0xeeb   :  { %v2989_v54 = vpop.f32.mrb[32].mxu1 }
 0xeec   :  { %v2991_v56 = vpop.f32.mrb[33].mxu1  ;;  %v8044_v10 = vadd.f32 %v2989_v54, %v2892_v59 }
 0xeed   :  { %v2992_v8 = vadd.f32 %v2991_v56, %v2896_v46  ;;  %v2993_v42 = vpop.f32.mrb[34].mxu1 }
 0xeee   :  { %3087 = vrot.lane.b32.xlu0 %v2980_v4, %s7114_s6  ;;  %6411 = vrot.lane.b32.xlu1 %v6405_v37, %s8482_s25  ;;  %v2995_v41 = vpop.f32.mrb[35].mxu1  ;;  %v8038_v24 = vadd.f32 %v2993_v42, %v2892_v59 }
 0xeef   :  { %v2996_v35 = vadd.f32 %v2995_v41, %v2896_v46 }
 0xef0   :  { %v6420_v9 = vpack.i.bf16 %v8038_v24, %v8044_v10 }
 0xef1   :  { %v8040_v43 = vpack.i.bf16 %v2996_v35, %v2992_v8  ;;  %v8042_v45 = vpack.c.bf16 %v2996_v35, %v2992_v8 }
 0xef2   :  { %3178 = vrot.lane.b32.xlu0 %v2980_v4, %s7116_s21  ;;  %6416 = vrot.lane.b32.xlu1 %v6405_v37, %s7096_s27 }
 0xef6   :  { %3089 = vrot.lane.b32.xlu1 %v8026_v0, %s7114_s6  ;;  %6421 = vrot.lane.b32.xlu0 %v6420_v9, %s7098_s11 }
 0xefa   :  { %3180 = vrot.lane.b32.xlu1 %v8026_v0, %s7116_s21  ;;  %3269 = vrot.lane.b32.xlu0 %v2980_v4, %s7117_s28 }
 0xefe   :  { %6426 = vrot.lane.b32.xlu1 %v6420_v9, %s7115_s1  ;;  %6431 = vrot.lane.b32.xlu0 %v6420_v9, %s8482_s25 }
 0xf02   :  { %3271 = vrot.lane.b32.xlu1 %v8026_v0, %s7117_s28  ;;  %3449 = vrot.lane.b32.xlu0 %v8044_v10, %s7114_s6 }
 0xf06   :  { %6436 = vrot.lane.b32.xlu1 %v6420_v9, %s7096_s27  ;;  %3540 = vrot.lane.b32.xlu0 %v8044_v10, %s7116_s21 }
 0xf0a   :  { %3451 = vrot.lane.b32.xlu1 %v8038_v24, %s7114_s6  ;;  %3631 = vrot.lane.b32.xlu0 %v8044_v10, %s7117_s28 }
 0xf0e   :  { %3542 = vrot.lane.b32.xlu1 %v8038_v24, %s7116_s21 }
 0xf12   :  { %3633 = vrot.lane.b32.xlu1 %v8038_v24, %s7117_s28 }
 0xf16   :  { %6441 = vrot.lane.b32.xlu1 %v8030_v23, %s7114_s6 }
 0xf5c   :  { %v6407_v25 = vpop.permute.xlu0 %6406  ;;  %v6402_v48 = vpop.permute.xlu1 %6401 }
 0xf5d   :  { %v6409_v12 = vunpack.i.h.bf16 %v6407_v25  ;;  %v6408_v52 = vunpack.i.l.bf16 %v6407_v25  ;;  %v6404_v60 = vunpack.i.h.bf16 %v6402_v48  ;;  %v6403_v61 = vunpack.i.l.bf16 %v6402_v48 }
 0xf5f   :  { %v6193_v3 = vpack.c.bf16 %v6409_v12, %v6408_v52  ;;  %v6187_v44 = vpack.c.bf16 %v6404_v60, %v6403_v61 }
 0xf60   :  { %v3088_v27 = vpop.permute.xlu0 %3087  ;;  %v6412_v11 = vpop.permute.xlu1 %6411 }
 0xf61   :  { %v6414_v32 = vunpack.i.h.bf16 %v6412_v11  ;;  %v6413_v47 = vunpack.i.l.bf16 %v6412_v11  ;;  %6189 = vmatprep.subr.msk.bf16.mxu1 %vm7611_vm6, %v6187_v44  ;;  %6195 = vmatprep.subr.msk.bf16.mxu0 %vm7611_vm6, %v6193_v3 }
 0xf62   :  { %5918 = vmatprep.mubr.msk.f32.mxu0 %vm708_vm5, %v3088_v27  ;;  %6192 = vmatpush3.bf16.xpose.msk.msra.mxu1 %vm7611_vm6, %v6187_v44 }
 0xf63   :  { %v6199_v18 = vpack.c.bf16 %v6414_v32, %v6413_v47  ;;  %6198 = vmatpush3.bf16.xpose.msk.msra.mxu0 %vm7611_vm6, %v6193_v3 }
 0xf64   :  { %v3179_v49 = vpop.permute.xlu0 %3178  ;;  %v6417_v20 = vpop.permute.xlu1 %6416 }
 0xf65   :  { %v6419_v31 = vunpack.i.h.bf16 %v6417_v20  ;;  %v6418_v55 = vunpack.i.l.bf16 %v6417_v20  ;;  %6201 = vmatprep.subr.msk.bf16.mxu1 %vm7611_vm6, %v6199_v18 }
 0xf67   :  { %v6205_v51 = vpack.c.bf16 %v6419_v31, %v6418_v55 }
 0xf68   :  { %v6422_v26 = vpop.permute.xlu0 %6421  ;;  %v3090_v63 = vpop.permute.xlu1 %3089 }
 0xf69   :  { %v6424_v1 = vunpack.i.h.bf16 %v6422_v26  ;;  %v6423_v28 = vunpack.i.l.bf16 %v6422_v26  ;;  %5912 = vmatmul.mubr.msk.f32.vlgmr.msra.gmra.mrb[36].mxu1 %vm708_vm5, %v8026_v0  ;;  %6207 = vmatprep.subr.msk.bf16.mxu0 %vm7611_vm6, %v6205_v51 }
 0xf6a   :  { %5919 = vmatmul.mubr.msk.f32.vlgmr.msra.gmra.mrb[28].mxu0 %vm708_vm5, %v3090_v63  ;;  %6204 = vmatpush3.bf16.xpose.msk.msra.mxu1 %vm7611_vm6, %v6199_v18 }
 0xf6b   :  { %v6211_v29 = vpack.c.bf16 %v6424_v1, %v6423_v28  ;;  %5925 = vmatprep.mubr.msk.f32.mxu1 %vm708_vm5, %v3179_v49  ;;  %6210 = vmatpush3.bf16.xpose.msk.msra.mxu0 %vm7611_vm6, %v6205_v51 }
 0xf6c   :  { %v3270_v50 = vpop.permute.xlu0 %3269  ;;  %v3181_v6 = vpop.permute.xlu1 %3180 }
 0xf6d   :  { %5932 = vmatprep.mubr.msk.f32.mxu0 %vm708_vm5, %v3270_v50  ;;  %6213 = vmatprep.subr.msk.bf16.mxu1 %vm7611_vm6, %v6211_v29 }
 0xf70   :  { %v6432_v30 = vpop.permute.xlu0 %6431  ;;  %v6427_v16 = vpop.permute.xlu1 %6426 }
 0xf71   :  { %v6434_v2 = vunpack.i.h.bf16 %v6432_v30  ;;  %v6433_v62 = vunpack.i.l.bf16 %v6432_v30  ;;  %v6429_v34 = vunpack.i.h.bf16 %v6427_v16  ;;  %v6428_v7 = vunpack.i.l.bf16 %v6427_v16  ;;  %5926 = vmatmul.mubr.msk.f32.vlgmr.msra.gmra.mrb[38].mxu1 %vm708_vm5, %v3181_v6 }
 0xf72   :  { %6216 = vmatpush3.bf16.xpose.msk.msra.mxu1 %vm7611_vm6, %v6211_v29  ;;  %5939 = vmatprep.mubr.msk.f32.mxu1 %vm708_vm5, %v8044_v10 }
 0xf73   :  { %v6223_v59 = vpack.c.bf16 %v6434_v2, %v6433_v62  ;;  %v6217_v17 = vpack.c.bf16 %v6429_v34, %v6428_v7 }
 0xf74   :  { %v3450_v46 = vpop.permute.xlu0 %3449  ;;  %v3272_v4 = vpop.permute.xlu1 %3271 }
 0xf75   :  { %5933 = vmatmul.mubr.msk.f32.vlgmr.msra.gmra.mrb[30].mxu0 %vm708_vm5, %v3272_v4  ;;  %6219 = vmatprep.subr.msk.bf16.mxu0 %vm7611_vm6, %v6217_v17 }
 0xf76   :  { %6225 = vmatprep.subr.msk.bf16.mxu1 %vm7611_vm6, %v6223_v59  ;;  %6222 = vmatpush3.bf16.xpose.msk.msra.mxu0 %vm7611_vm6, %v6217_v17 }
 0xf77   :  { %5946 = vmatprep.mubr.msk.f32.mxu0 %vm708_vm5, %v3450_v46 }
 0xf78   :  { %v3541_v13 = vpop.permute.xlu0 %3540  ;;  %v6437_v36 = vpop.permute.xlu1 %6436 }
 0xf79   :  { %v6439_v0 = vunpack.i.h.bf16 %v6437_v36  ;;  %v6438_v15 = vunpack.i.l.bf16 %v6437_v36  ;;  %5940 = vmatmul.mubr.msk.f32.vlgmr.msra.gmra.mrb[40].mxu1 %vm708_vm5, %v8038_v24 }
 0xf7a   :  { %6228 = vmatpush3.bf16.xpose.msk.msra.mxu1 %vm7611_vm6, %v6223_v59  ;;  %5953 = vmatprep.mubr.msk.f32.mxu1 %vm708_vm5, %v3541_v13 }
 0xf7b   :  { %v6229_v38 = vpack.c.bf16 %v6439_v0, %v6438_v15  ;;  %6236 = vmatprep.subr.bf16.mxu1 %v8032_v39 }
 0xf7c   :  { %v3632_v58 = vpop.permute.xlu0 %3631  ;;  %v3452_v37 = vpop.permute.xlu1 %3451 }
 0xf7d   :  { %5947 = vmatmul.mubr.msk.f32.vlgmr.msra.gmra.mrb[32].mxu0 %vm708_vm5, %v3452_v37  ;;  %6231 = vmatprep.subr.msk.bf16.mxu0 %vm7611_vm6, %v6229_v38 }
 0xf7e   :  { %6234 = vmatpush3.bf16.xpose.msk.msra.mxu0 %vm7611_vm6, %v6229_v38  ;;  %5960 = vmatprep.mubr.msk.f32.mxu0 %vm708_vm5, %v3632_v58 }
 0xf80   :  { %v3543_v54 = vpop.permute.xlu1 %3542 }
 0xf81   :  { %5954 = vmatmul.mubr.msk.f32.vlgmr.msra.gmra.mrb[42].mxu1 %vm708_vm5, %v3543_v54 }
 0xf82   :  { %6238 = vmatpush3.bf16.msra.mxu1 %v8032_v39 }
 0xf84   :  { %v3634_v56 = vpop.permute.xlu1 %3633 }
 0xf85   :  { %5961 = vmatmul.mubr.msk.f32.vlgmr.msra.gmra.mrb[34].mxu0 %vm708_vm5, %v3634_v56 }
 0xf88   :  { %v6442_v8 = vpop.permute.xlu1 %6441 }
 0xf89   :  { %v6444_v42 = vunpack.i.h.bf16 %v6442_v8  ;;  %v6443_v41 = vunpack.i.l.bf16 %v6442_v8 }
 0xf8b   :  { %v8127_v35 = vpack.c.bf16 %v6444_v42, %v6443_v41 }
 0xf8d   :  { %6240 = vmatprep.subr.bf16.mxu1 %v8127_v35 }
0x103c   :  { %v5913_v24 = vpop.f32.mrb[36].mxu1 }
0x103d   :  { %v8131_v22 = vadd.f32 %v5913_v24, %v7673_v19  ;;  %v5920_v10 = vpop.f32.mrb[28].mxu0  ;;  %v3078_v9 = vpop.f32.mrb[37].mxu1 }
0x103e   :  { %v8134_v25 = vadd.f32 %v5920_v10, %v7673_v19  ;;  %v3169_v39 = vpop.f32.mrb[29].mxu0  ;;  %v8139_v12 = vadd.f32 %v3078_v9, %v7673_v19 }
0x103f   :  { %v3741_v48 = vsel %vm708_vm5, %v8131_v22, -inf  ;;  %v8144_v60 = vadd.f32 %v3169_v39, %v7673_v19 }
0x1040   :  { %v3747_v52 = vsel %vm708_vm5, %v8134_v25, -inf  ;;  %3742 = vmax.xlane.f32.xlu1 %v3741_v48  ;;  %v3738_v61 = vsel %vm708_vm5, %v8139_v12, -inf }
0x1041   :  { %3748 = vmax.xlane.f32.xlu0 %v3747_v52  ;;  %v3744_v47 = vsel %vm708_vm5, %v8144_v60, -inf }
0x1044   :  { %v5927_v3 = vpop.f32.mrb[38].mxu1 }
0x1045   :  { %3739 = vmax.xlane.f32.xlu0 %v3738_v61  ;;  %v3260_v44 = vpop.f32.mrb[39].mxu1  ;;  %v8152_v11 = vadd.f32 %v5927_v3, %v7673_v19 }
0x1046   :  { %v8149_v27 = vadd.f32 %v3260_v44, %v7673_v19 }
0x1047   :  { %v3753_v55 = vsel %vm708_vm5, %v8152_v11, -inf }
0x1048   :  { %v5934_v32 = vpop.f32.mrb[30].mxu0  ;;  %v3750_v18 = vsel %vm708_vm5, %v8149_v27, -inf }
0x1049   :  { %3745 = vmax.xlane.f32.xlu0 %v3744_v47  ;;  %v3351_v49 = vpop.f32.mrb[31].mxu0  ;;  %3751 = vmax.xlane.f32.xlu1 %v3750_v18  ;;  %v8162_v31 = vadd.f32 %v5934_v32, %v7673_v19 }
0x104a   :  { %v8159_v20 = vadd.f32 %v3351_v49, %v7673_v19 }
0x104b   :  { %v3759_v19 = vsel %vm708_vm5, %v8162_v31, -inf }
0x104c   :  { %v5941_v51 = vpop.f32.mrb[40].mxu1  ;;  %v3756_v26 = vsel %vm708_vm5, %v8159_v20, -inf }
0x104d   :  { %3754 = vmax.xlane.f32.xlu0 %v3753_v55  ;;  %3757 = vmax.xlane.f32.xlu1 %v3756_v26  ;;  %v3440_v63 = vpop.f32.mrb[41].mxu1  ;;  %v8172_v28 = vadd.f32 %v5941_v51, %v7694_v40 }
0x104e   :  { %v8169_v1 = vadd.f32 %v3440_v63, %v7694_v40 }
0x104f   :  { %v3765_v2 = vsel %vm708_vm5, %v8172_v28, -inf }
0x1050   :  { %v5948_v29 = vpop.f32.mrb[32].mxu0  ;;  %v3762_v50 = vsel %vm708_vm5, %v8169_v1, -inf }
0x1051   :  { %3760 = vmax.xlane.f32.xlu0 %v3759_v19  ;;  %v3531_v6 = vpop.f32.mrb[33].mxu0  ;;  %3763 = vmax.xlane.f32.xlu1 %v3762_v50  ;;  %v8182_v16 = vadd.f32 %v5948_v29, %v7694_v40 }
0x1052   :  { %v8179_v30 = vadd.f32 %v3531_v6, %v7694_v40 }
0x1053   :  { %v3771_v46 = vsel %vm708_vm5, %v8182_v16, -inf }
0x1054   :  { %v5955_v62 = vpop.f32.mrb[42].mxu1  ;;  %v3768_v34 = vsel %vm708_vm5, %v8179_v30, -inf }
0x1055   :  { %3766 = vmax.xlane.f32.xlu0 %v3765_v2  ;;  %3769 = vmax.xlane.f32.xlu1 %v3768_v34  ;;  %v3622_v7 = vpop.f32.mrb[43].mxu1  ;;  %v8189_v59 = vadd.f32 %v5955_v62, %v7694_v40 }
0x1056   :  { %v8205_v15 = vadd.f32 %v3622_v7, %v7694_v40 }
0x1057   :  { %v3777_v36 = vsel %vm708_vm5, %v8189_v59, -inf }
0x1058   :  { %v5962_v17 = vpop.f32.mrb[34].mxu0  ;;  %v3774_v58 = vsel %vm708_vm5, %v8205_v15, -inf }
0x1059   :  { %3772 = vmax.xlane.f32.xlu0 %v3771_v46  ;;  %v3713_v4 = vpop.f32.mrb[35].mxu0  ;;  %v8194_v13 = vadd.f32 %v5962_v17, %v7694_v40 }
0x105a   :  { %v8208_v38 = vadd.f32 %v3713_v4, %v7694_v40 }
0x105b   :  { %v3783_v0 = vsel %vm708_vm5, %v8194_v13, -inf }
0x105c   :  { %v3780_v37 = vsel %vm708_vm5, %v8208_v38, -inf }
0x105d   :  { %3778 = vmax.xlane.f32.xlu0 %v3777_v36 }
0x1061   :  { %3784 = vmax.xlane.f32.xlu0 %v3783_v0 }
0x1066   :  { %6451 = vrot.lane.b32.xlu1 %v8030_v23, %s7117_s28 }
0x1077   :  { %6446 = vrot.lane.b32.xlu0 %v8030_v23, %s7116_s21 }
0x108a   :  { %3775 = vmax.xlane.f32.xlu1 %v3774_v58 }
0x108e   :  { %3781 = vmax.xlane.f32.xlu1 %v3780_v37 }
0x109f   :  { %6456 = vrot.lane.b32.xlu1 %v8040_v43, %s7114_s6 }
0x10cd   :  { %v3743_v54 = vpop.xlane.xlu1 %3742 }
0x10ce   :  { %v3749_v56 = vpop.xlane.xlu0 %3748  ;;  %v3787_v23 = vsub.f32 %v8131_v22, %v3743_v54 }
0x10cf   :  { %v3789_v8 = vsub.f32 %v8134_v25, %v3749_v56 }
0x10d0   :  { %v3804_v42 = vmul.f32 1.442695, %v3787_v23 }
0x10d1   :  { %v3808_v40 = vmul.f32 1.442695, %v3789_v8 }
0x10d2   :  { %6656 = vpow2.f32 %v3804_v42  ;;  %v3740_v41 = vpop.xlane.xlu0 %3739 }
0x10d3   :  { %v3786_v24 = vsub.f32 %v8139_v12, %v3740_v41  ;;  %6658 = vpow2.f32 %v3808_v40 }
0x10d5   :  { %v3802_v10 = vmul.f32 1.442695, %v3786_v24 }
0x10d6   :  { %v3746_v9 = vpop.xlane.xlu0 %3745  ;;  %v3752_v39 = vpop.xlane.xlu1 %3751 }
0x10d7   :  { %6660 = vpow2.f32 %v3802_v10  ;;  %v3788_v48 = vsub.f32 %v8144_v60, %v3746_v9  ;;  %v3790_v52 = vsub.f32 %v8149_v27, %v3752_v39 }
0x10d9   :  { %v3806_v61 = vmul.f32 1.442695, %v3788_v48  ;;  %v3810_v3 = vmul.f32 1.442695, %v3790_v52 }
0x10da   :  { %v3755_v22 = vpop.xlane.xlu0 %3754  ;;  %v3758_v44 = vpop.xlane.xlu1 %3757 }
0x10db   :  { %6662 = vpow2.f32 %v3806_v61  ;;  %v3791_v25 = vsub.f32 %v8152_v11, %v3755_v22  ;;  %v3792_v32 = vsub.f32 %v8159_v20, %v3758_v44 }
0x10dc   :  { %v8223_v47 = vpop.eup %6656  ;;  %6664 = vpow2.f32 %v3810_v3 }
0x10dd   :  { %v3812_v12 = vmul.f32 1.442695, %v3791_v25  ;;  %v3814_v18 = vmul.f32 1.442695, %v3792_v32  ;;  %v3837_v49 = vsel %vm708_vm5, %v8223_v47, 0.0  ;;  %v8227_v60 = vpop.eup %6658 }
0x10de   :  { %v3761_v27 = vpop.xlane.xlu0 %3760  ;;  %v3764_v55 = vpop.xlane.xlu1 %3763  ;;  %3838 = vadd.xlane.f32.xlu0 %v3837_v49  ;;  %v3843_v29 = vsel %vm708_vm5, %v8227_v60, 0.0 }
0x10df   :  { %6666 = vpow2.f32 %v3812_v12  ;;  %v3793_v51 = vsub.f32 %v8162_v31, %v3761_v27  ;;  %v3794_v11 = vsub.f32 %v8169_v1, %v3764_v55 }
0x10e0   :  { %6668 = vpow2.f32 %v3814_v18 }
0x10e1   :  { %v8231_v26 = vpop.eup %6660  ;;  %v3816_v20 = vmul.f32 1.442695, %v3793_v51  ;;  %v3818_v63 = vmul.f32 1.442695, %v3794_v11 }
0x10e2   :  { %v3767_v19 = vpop.xlane.xlu0 %3766  ;;  %v3770_v50 = vpop.xlane.xlu1 %3769  ;;  %3844 = vadd.xlane.f32.xlu0 %v3843_v29  ;;  %v3834_v6 = vsel %vm708_vm5, %v8231_v26, 0.0 }
0x10e3   :  { %6670 = vpow2.f32 %v3816_v20  ;;  %v3795_v2 = vsub.f32 %v8172_v28, %v3767_v19  ;;  %v3796_v31 = vsub.f32 %v8179_v30, %v3770_v50  ;;  %3835 = vadd.xlane.f32.xlu1 %v3834_v6 }
0x10e4   :  { %6672 = vpow2.f32 %v3818_v63 }
0x10e5   :  { %v8239_v1 = vpop.eup %6662  ;;  %v3820_v62 = vmul.f32 1.442695, %v3795_v2  ;;  %v3822_v34 = vmul.f32 1.442695, %v3796_v31 }
0x10e6   :  { %v3773_v7 = vpop.xlane.xlu0 %3772  ;;  %v3840_v17 = vsel %vm708_vm5, %v8239_v1, 0.0  ;;  %v8243_v46 = vpop.eup %6664 }
0x10e7   :  { %6674 = vpow2.f32 %v3820_v62  ;;  %v3797_v4 = vsub.f32 %v8182_v16, %v3773_v7  ;;  %3841 = vadd.xlane.f32.xlu1 %v3840_v17  ;;  %v3846_v58 = vsel %vm708_vm5, %v8243_v46, 0.0  ;;  %v6452_v49 = vpop.permute.xlu1 %6451 }
0x10e8   :  { %6676 = vpow2.f32 %v3822_v34 }
0x10e9   :  { %v8246_v36 = vpop.eup %6666  ;;  %v3824_v28 = vmul.f32 1.442695, %v3797_v4 }
0x10ea   :  { %v3779_v30 = vpop.xlane.xlu0 %3778  ;;  %v3849_v0 = vsel %vm708_vm5, %v8246_v36, 0.0  ;;  %v8252_v37 = vpop.eup %6668 }
0x10eb   :  { %6678 = vpow2.f32 %v3824_v28  ;;  %v3799_v54 = vsub.f32 %v8189_v59, %v3779_v30  ;;  %3850 = vadd.xlane.f32.xlu0 %v3849_v0  ;;  %3847 = vadd.xlane.f32.xlu1 %v3846_v58  ;;  %v3852_v42 = vsel %vm708_vm5, %v8252_v37, 0.0  ;;  %v6454_v28 = vunpack.i.h.bf16 %v6452_v49 }
0x10ec   :  { %v6453_v30 = vunpack.i.l.bf16 %v6452_v49 }
0x10ed   :  { %v8255_v16 = vpop.eup %6670  ;;  %v3828_v56 = vmul.f32 1.442695, %v3799_v54 }
0x10ee   :  { %v3785_v23 = vpop.xlane.xlu0 %3784  ;;  %v3855_v8 = vsel %vm708_vm5, %v8255_v16, 0.0  ;;  %v8261_v40 = vpop.eup %6672 }
0x10ef   :  { %6680 = vpow2.f32 %v3828_v56  ;;  %v3801_v41 = vsub.f32 %v8194_v13, %v3785_v23  ;;  %3856 = vadd.xlane.f32.xlu0 %v3855_v8  ;;  %3853 = vadd.xlane.f32.xlu1 %v3852_v42  ;;  %v3858_v39 = vsel %vm708_vm5, %v8261_v40, 0.0  ;;  %v6247_v8 = vpack.c.bf16 %v6454_v28, %v6453_v30 }
0x10f1   :  { %v8264_v59 = vpop.eup %6674  ;;  %v3832_v24 = vmul.f32 1.442695, %v3801_v41 }
0x10f2   :  { %v6447_v10 = vpop.permute.xlu0 %6446  ;;  %v3861_v9 = vsel %vm708_vm5, %v8264_v59, 0.0  ;;  %v8270_v61 = vpop.eup %6676 }
0x10f3   :  { %6682 = vpow2.f32 %v3832_v24  ;;  %v6449_v48 = vunpack.i.h.bf16 %v6447_v10  ;;  %v6448_v52 = vunpack.i.l.bf16 %v6447_v10  ;;  %3862 = vadd.xlane.f32.xlu0 %v3861_v9  ;;  %3859 = vadd.xlane.f32.xlu1 %v3858_v39  ;;  %v3864_v44 = vsel %vm708_vm5, %v8270_v61, 0.0 }
0x10f5   :  { %v8272_v13 = vpop.eup %6678  ;;  %v6243_v3 = vpack.c.bf16 %v6449_v48, %v6448_v52 }
0x10f6   :  { %v3867_v22 = vsel %vm708_vm5, %v8272_v13, 0.0 }
0x10f7   :  { %3868 = vadd.xlane.f32.xlu0 %v3867_v22  ;;  %6244 = vmatprep.subr.bf16.mxu0 %v6243_v3 }
0x10f8   :  { %3865 = vadd.xlane.f32.xlu1 %v3864_v44  ;;  %6246 = vmatpush3.bf16.msra.mxu0 %v6243_v3 }
0x10f9   :  { %v8278_v25 = vpop.eup %6680  ;;  %6252 = vmatprep.subr.bf16.mxu0 %v8042_v45 }
0x10fa   :  { %v3873_v32 = vsel %vm708_vm5, %v8278_v25, 0.0 }
0x10fb   :  { %3874 = vadd.xlane.f32.xlu0 %v3873_v32 }
0x10fd   :  { %v8283_v12 = vpop.eup %6682 }
0x10fe   :  { %v3879_v18 = vsel %vm708_vm5, %v8283_v12, 0.0 }
0x10ff   :  { %3880 = vadd.xlane.f32.xlu0 %v3879_v18 }
0x1115   :  { %6461 = vrot.lane.b32.xlu0 %v8040_v43, %s7116_s21 }
0x1117   :  { %v3776_v27 = vpop.xlane.xlu1 %3775 }
0x1118   :  { %v3798_v55 = vsub.f32 %v8205_v15, %v3776_v27 }
0x111a   :  { %v3826_v51 = vmul.f32 1.442695, %v3798_v55 }
0x111b   :  { %v3782_v11 = vpop.xlane.xlu1 %3781 }
0x111c   :  { %6684 = vpow2.f32 %v3826_v51  ;;  %v3800_v20 = vsub.f32 %v8208_v38, %v3782_v11 }
0x111e   :  { %v3830_v63 = vmul.f32 1.442695, %v3800_v20 }
0x111f   :  { %v6457_v2 = vpop.permute.xlu1 %6456 }
0x1120   :  { %6686 = vpow2.f32 %v3830_v63  ;;  %v6459_v42 = vunpack.i.h.bf16 %v6457_v2  ;;  %v6458_v41 = vunpack.i.l.bf16 %v6457_v2 }
0x1122   :  { %v6255_v39 = vpack.c.bf16 %v6459_v42, %v6458_v41 }
0x1126   :  { %v8291_v29 = vpop.eup %6684 }
0x1127   :  { %v3870_v19 = vsel %vm708_vm5, %v8291_v29, 0.0 }
0x1128   :  { %3871 = vadd.xlane.f32.xlu1 %v3870_v19 }
0x112a   :  { %v8295_v50 = vpop.eup %6686 }
0x112b   :  { %v3876_v6 = vsel %vm708_vm5, %v8295_v50, 0.0 }
0x112c   :  { %3877 = vadd.xlane.f32.xlu1 %v3876_v6 }
0x113d   :  { %6466 = vrot.lane.b32.xlu1 %v8040_v43, %s7117_s28 }
0x116b   :  { %v3839_v15 = vpop.xlane.xlu0 %3838 }
0x116c   :  { %6688 = vrcp.f32 %v3839_v15 }
0x116f   :  { %v3845_v31 = vpop.xlane.xlu0 %3844 }
0x1170   :  { %v3836_v38 = vpop.xlane.xlu1 %3835 }
0x1171   :  { %6690 = vrcp.f32 %v3836_v38 }
0x1172   :  { %6692 = vrcp.f32 %v3845_v31 }
0x1174   :  { %v3842_v62 = vpop.xlane.xlu1 %3841 }
0x1175   :  { %6694 = vrcp.f32 %v3842_v62 }
0x1176   :  { %v6689_v17 = vpop.eup %6688 }
0x1177   :  { %v3899_v54 = vmul.f32 %v6689_v17, %v8223_v47 }
0x1178   :  { %v3851_v34 = vpop.xlane.xlu0 %3850  ;;  %v3848_v7 = vpop.xlane.xlu1 %3847 }
0x1179   :  { %6696 = vrcp.f32 %v3851_v34 }
0x117a   :  { %6698 = vrcp.f32 %v3848_v7 }
0x117b   :  { %v6691_v4 = vpop.eup %6690 }
0x117c   :  { %v3857_v0 = vpop.xlane.xlu0 %3856  ;;  %v3854_v58 = vpop.xlane.xlu1 %3853  ;;  %v3898_v43 = vmul.f32 %v6691_v4, %v8231_v26 }
0x117d   :  { %6700 = vrcp.f32 %v3857_v0  ;;  %v6693_v56 = vpop.eup %6692 }
0x117e   :  { %6702 = vrcp.f32 %v3854_v58  ;;  %5967 = vmatprep.mubr.msk.f32.mxu1 %vm708_vm5, %v3898_v43  ;;  %v3901_v26 = vmul.f32 %v6693_v56, %v8227_v60 }
0x117f   :  { %v6695_v23 = vpop.eup %6694  ;;  %5968 = vmatmul.mubr.msk.f32.vlgmr.msra.gmra.mrb[44].mxu1 %vm708_vm5, %v3899_v54 }
0x1180   :  { %6242 = vmatpush3.bf16.msra.mxu1 %v8127_v35  ;;  %v3863_v24 = vpop.xlane.xlu0 %3862  ;;  %v3860_v10 = vpop.xlane.xlu1 %3859  ;;  %v3900_v9 = vmul.f32 %v6695_v23, %v8239_v1  ;;  %v6541_v23 = vld [vmem:[%s8448_s9 + $0x28] sm:$0xff]  }
0x1181   :  { %6704 = vrcp.f32 %v3863_v24  ;;  %6248 = vmatprep.subr.bf16.mxu1 %v6247_v8 }
0x1182   :  { %6706 = vrcp.f32 %v3860_v10  ;;  %5974 = vmatprep.mubr.msk.f32.mxu1 %vm708_vm5, %v3900_v9 }
0x1183   :  { %v6697_v47 = vpop.eup %6696  ;;  %5975 = vmatmul.mubr.msk.f32.vlgmr.msra.gmra.mrb[46].mxu1 %vm708_vm5, %v3901_v26  ;;  %v6542_v26 = vld [vmem:[%s8448_s9 + $0x30] sm:$0xff]  }
0x1184   :  { %v6699_v48 = vpop.eup %6698  ;;  %v3903_v52 = vmul.f32 %v6697_v47, %v8246_v36  ;;  %6250 = vmatpush3.bf16.msra.mxu1 %v6247_v8  ;;  %v3869_v35 = vpop.xlane.xlu0 %3868  ;;  %v6543_v47 = vld [vmem:[%s8448_s9 + $0x38] sm:$0xff]  }
0x1185   :  { %6708 = vrcp.f32 %v3869_v35  ;;  %v3866_v3 = vpop.xlane.xlu1 %3865  ;;  %6256 = vmatprep.subr.bf16.mxu1 %v6255_v39  ;;  %v3902_v1 = vmul.f32 %v6699_v48, %v8243_v46 }
0x1186   :  { %6710 = vrcp.f32 %v3866_v3 }
0x1187   :  { %v6701_v60 = vpop.eup %6700  ;;  %5981 = vmatprep.mubr.msk.f32.mxu0 %vm708_vm5, %v3902_v1 }
0x1188   :  { %v6703_v22 = vpop.eup %6702  ;;  %v3905_v44 = vmul.f32 %v6701_v60, %v8255_v16  ;;  %5982 = vmatmul.mubr.msk.f32.vlgmr.msra.gmra.mrb[36].mxu0 %vm708_vm5, %v3903_v52  ;;  %v3875_v32 = vpop.xlane.xlu0 %3874 }
0x1189   :  { %6254 = vmatpush3.bf16.msra.mxu0 %v8042_v45  ;;  %v3904_v36 = vmul.f32 %v6703_v22, %v8252_v37  ;;  %6712 = vrcp.f32 %v3875_v32 }
0x118b   :  { %v6705_v18 = vpop.eup %6704  ;;  %5988 = vmatprep.mubr.msk.f32.mxu1 %vm708_vm5, %v3904_v36 }
0x118c   :  { %v6707_v49 = vpop.eup %6706  ;;  %v3907_v46 = vmul.f32 %v6705_v18, %v8264_v59  ;;  %5989 = vmatmul.mubr.msk.f32.vlgmr.msra.gmra.mrb[48].mxu1 %vm708_vm5, %v3905_v44  ;;  %v3881_v27 = vpop.xlane.xlu0 %3880 }
0x118d   :  { %6258 = vmatpush3.bf16.msra.mxu1 %v6255_v39  ;;  %v3906_v55 = vmul.f32 %v6707_v49, %v8261_v40 }
0x118f   :  { %v6709_v16 = vpop.eup %6708  ;;  %5995 = vmatprep.mubr.msk.f32.mxu0 %vm708_vm5, %v3906_v55 }
0x1190   :  { %v6711_v51 = vpop.eup %6710  ;;  %v3909_v45 = vmul.f32 %v6709_v16, %v8272_v13  ;;  %5996 = vmatmul.mubr.msk.f32.vlgmr.msra.gmra.mrb[38].mxu0 %vm708_vm5, %v3907_v46  ;;  %v6462_v37 = vpop.permute.xlu0 %6461 }
0x1191   :  { %v6464_v11 = vunpack.i.h.bf16 %v6462_v37  ;;  %v6463_v20 = vunpack.i.l.bf16 %v6462_v37  ;;  %v3908_v63 = vmul.f32 %v6711_v51, %v8270_v61 }
0x1193   :  { %v6259_v59 = vpack.c.bf16 %v6464_v11, %v6463_v20  ;;  %6002 = vmatprep.mubr.msk.f32.mxu1 %vm708_vm5, %v3908_v63  ;;  %v6713_v2 = vpop.eup %6712 }
0x1194   :  { %6003 = vmatmul.mubr.msk.f32.vlgmr.msra.gmra.mrb[50].mxu1 %vm708_vm5, %v3909_v45  ;;  %v3911_v62 = vmul.f32 %v6713_v2, %v8278_v25 }
0x1195   :  { %6260 = vmatprep.subr.bf16.mxu0 %v6259_v59 }
0x1196   :  { %6262 = vmatpush3.bf16.msra.mxu0 %v6259_v59 }
0x11b5   :  { %v3872_v40 = vpop.xlane.xlu1 %3871 }
0x11b6   :  { %6714 = vrcp.f32 %v3872_v40 }
0x11b7   :  { %6716 = vrcp.f32 %v3881_v27 }
0x11b9   :  { %v3878_v19 = vpop.xlane.xlu1 %3877 }
0x11ba   :  { %6718 = vrcp.f32 %v3878_v19 }
0x11bd   :  { %v6467_v13 = vpop.permute.xlu1 %6466 }
0x11be   :  { %v6469_v6 = vunpack.i.h.bf16 %v6467_v13  ;;  %v6468_v15 = vunpack.i.l.bf16 %v6467_v13 }
0x11c0   :  { %v6715_v38 = vpop.eup %6714  ;;  %v6263_v31 = vpack.c.bf16 %v6469_v6, %v6468_v15 }
0x11c1   :  { %v3910_v61 = vmul.f32 %v6715_v38, %v8291_v29  ;;  %v6717_v34 = vpop.eup %6716 }
0x11c2   :  { %6264 = vmatprep.subr.bf16.mxu1 %v6263_v31  ;;  %v3913_v4 = vmul.f32 %v6717_v34, %v8283_v12  ;;  %v6540_v12 = vld [vmem:[%s8448_s9 + $0x20] sm:$0xff]  }
0x11c3   :  { %6009 = vmatprep.mubr.msk.f32.mxu0 %vm708_vm5, %v3910_v61  ;;  %6266 = vmatpush3.bf16.msra.mxu1 %v6263_v31 }
0x11c4   :  { %v6719_v7 = vpop.eup %6718  ;;  %6010 = vmatmul.mubr.msk.f32.vlgmr.msra.gmra.mrb[40].mxu0 %vm708_vm5, %v3911_v62  ;;  %6019 = vmatprep.subr.bf16.mxu0 %v6540_v12 }
0x11c5   :  { %v3912_v17 = vmul.f32 %v6719_v7, %v8295_v50  ;;  %6020 = vmatpush3.bf16.msra.mxu0 %v6540_v12 }
0x11c6   :  { %6021 = vmatprep.subr.bf16.mxu0 %v6541_v23 }
0x11c7   :  { %6016 = vmatprep.mubr.msk.f32.mxu1 %vm708_vm5, %v3912_v17 }
0x11c8   :  { %6017 = vmatmul.mubr.msk.f32.vlgmr.msra.gmra.mrb[52].mxu1 %vm708_vm5, %v3913_v4 }
0x11c9   :  { %6022 = vmatpush3.bf16.msra.mxu0 %v6541_v23 }
0x11ca   :  { %6023 = vmatprep.subr.bf16.mxu0 %v6542_v26 }
0x11cd   :  { %6024 = vmatpush3.bf16.msra.mxu0 %v6542_v26 }
0x11ce   :  { %6025 = vmatprep.subr.bf16.mxu0 %v6543_v47 }
0x11d1   :  { %6026 = vmatpush3.bf16.msra.mxu0 %v6543_v47 }
0x1252   :  { %v5969_v28 = vpop.f32.mrb[44].mxu1 }
0x1253   :  { %v3986_v29 = vpop.f32.mrb[45].mxu1 }
0x1256   :  { %v5976_v30 = vpop.f32.mrb[46].mxu1 }
0x1257   :  { %v4075_v25 = vpop.f32.mrb[47].mxu1 }
0x1258   :  { %v6470_v0 = vpack.i.bf16 %v5976_v30, %v4075_v25 }
0x125a   :  { %6471 = vrot.lane.b32.xlu0 %v6470_v0, %s7096_s27 }
0x125b   :  { %v5983_v58 = vpop.f32.mrb[36].mxu0 }
0x125c   :  { %v4162_v43 = vpop.f32.mrb[37].mxu0 }
0x125d   :  { %v6475_v54 = vpack.i.bf16 %v5983_v58, %v4162_v43 }
0x125f   :  { %6476 = vrot.lane.b32.xlu1 %v6475_v54, %s8482_s25  ;;  %v5990_v56 = vpop.f32.mrb[48].mxu1 }
0x1260   :  { %v4249_v50 = vpop.f32.mrb[49].mxu1 }
0x1261   :  { %v6480_v8 = vpack.i.bf16 %v5990_v56, %v4249_v50 }
0x1263   :  { %6481 = vrot.lane.b32.xlu1 %v6480_v8, %s7115_s1  ;;  %v5997_v42 = vpop.f32.mrb[38].mxu0 }
0x1264   :  { %v4360_v41 = vpop.f32.mrb[39].mxu0 }
0x1267   :  { %v6004_v24 = vpop.f32.mrb[50].mxu1 }
0x1268   :  { %v4449_v10 = vpop.f32.mrb[51].mxu1 }
0x1269   :  { %v6485_v9 = vpack.i.bf16 %v6004_v24, %v4449_v10 }
0x126b   :  { %6486 = vrot.lane.b32.xlu0 %v6485_v9, %s7096_s27 }
0x1297   :  { %v6011_v39 = vpop.f32.mrb[40].mxu0 }
0x1298   :  { %v4536_v48 = vpop.f32.mrb[41].mxu0 }
0x1299   :  { %v6490_v52 = vpack.i.bf16 %v6011_v39, %v4536_v48 }
0x129b   :  { %6491 = vrot.lane.b32.xlu0 %v6490_v52, %s8482_s25  ;;  %v6018_v35 = vpop.f32.mrb[52].mxu1 }
0x129c   :  { %v4623_v3 = vpop.f32.mrb[53].mxu1 }
0x129d   :  { %v6495_v1 = vpack.i.bf16 %v6018_v35, %v4623_v3 }
0x129f   :  { %6496 = vrot.lane.b32.xlu1 %v6495_v1, %s7115_s1 }
0x12cc   :  { %v6472_v60 = vpop.permute.xlu0 %6471 }
0x12cd   :  { %v6474_v44 = vunpack.i.h.bf16 %v6472_v60  ;;  %v6473_v32 = vunpack.i.l.bf16 %v6472_v60 }
0x12cf   :  { %v4283_v46 = vsel %vm708_vm5, %v5969_v28, %v6474_v44  ;;  %v4282_v27 = vsel %vm708_vm5, %v3986_v29, %v6473_v32  ;;  %v5467_v28 = vld [vmem:[#allocation10 + $0x1] ss:$0 sm:$0xff] }
0x12d1   :  { %v6477_v22 = vpop.permute.xlu1 %6476 }
0x12d2   :  { %v6479_v36 = vunpack.i.h.bf16 %v6477_v22  ;;  %v6478_v18 = vunpack.i.l.bf16 %v6477_v22 }
0x12d4   :  { %v4285_v51 = vsel %vm1989_vm7, %v4283_v46, %v6479_v36  ;;  %v4284_v45 = vsel %vm1989_vm7, %v4282_v27, %v6478_v18  ;;  %v6544_v46 = vld [vmem:[#allocation14 + $0x20] sm:$0xff]   ;;  %v6545_v27 = vld [vmem:[#allocation14 + $0x28] sm:$0xff]  }
0x12d5   :  { %v6482_v49 = vpop.permute.xlu1 %6481  ;;  %6031 = vmatprep.subr.bf16.mxu1 %v6544_v46 }
0x12d6   :  { %v6484_v55 = vunpack.i.h.bf16 %v6482_v49  ;;  %v6483_v16 = vunpack.i.l.bf16 %v6482_v49  ;;  %6032 = vmatpush3.bf16.msra.mxu1 %v6544_v46 }
0x12d7   :  { %6033 = vmatprep.subr.bf16.mxu1 %v6545_v27 }
0x12d8   :  { %v4286_v37 = vsel %vm1992_vm8, %v4284_v45, %v6483_v16  ;;  %v4287_v11 = vsel %vm1992_vm8, %v4285_v51, %v6484_v55  ;;  %v6546_v55 = vld [vmem:[#allocation14 + $0x30] sm:$0xff]   ;;  %v6547_v16 = vld [vmem:[#allocation14 + $0x38] sm:$0xff]  }
0x12d9   :  { %v4662_v20 = vpack.c.bf16 %v4287_v11, %v4286_v37 }
0x12da   :  { %6034 = vmatpush3.bf16.msra.mxu1 %v6545_v27 }
0x12db   :  { %6027 = vmatprep.mubr.msk.bf16.mxu0 %vm280_vm0, %v4662_v20  ;;  %6035 = vmatprep.subr.bf16.mxu1 %v6546_v55 }
0x12dd   :  { %v6487_v63 = vpop.permute.xlu0 %6486 }
0x12de   :  { %v6489_v40 = vunpack.i.h.bf16 %v6487_v63  ;;  %v6488_v19 = vunpack.i.l.bf16 %v6487_v63  ;;  %6036 = vmatpush3.bf16.msra.mxu1 %v6546_v55 }
0x12df   :  { %6037 = vmatprep.subr.bf16.mxu1 %v6547_v16 }
0x12e0   :  { %v4657_v2 = vsel %vm708_vm5, %v5997_v42, %v6489_v40  ;;  %v4656_v38 = vsel %vm708_vm5, %v4360_v41, %v6488_v19 }
0x12e2   :  { %6038 = vmatpush3.bf16.msra.mxu1 %v6547_v16 }
0x12e3   :  { %6063 = vmatprep.subr.bf16.mxu1 %v7113_v21 }
0x130d   :  { %v6492_v59 = vpop.permute.xlu0 %6491 }
0x130e   :  { %v6494_v13 = vunpack.i.h.bf16 %v6492_v59  ;;  %v6493_v6 = vunpack.i.l.bf16 %v6492_v59 }
0x1310   :  { %v4658_v62 = vsel %vm1989_vm7, %v4656_v38, %v6493_v6  ;;  %v4659_v34 = vsel %vm1989_vm7, %v4657_v2, %v6494_v13  ;;  %v5474_v38 = vld [vmem:[#allocation11 + $0x1] ss:$0 sm:$0xff] }
0x1311   :  { %v6497_v15 = vpop.permute.xlu1 %6496 }
0x1312   :  { %v6499_v31 = vunpack.i.h.bf16 %v6497_v15  ;;  %v6498_v61 = vunpack.i.l.bf16 %v6497_v15 }
0x1314   :  { %v4661_v7 = vsel %vm1992_vm8, %v4659_v34, %v6499_v31  ;;  %v4660_v17 = vsel %vm1992_vm8, %v4658_v62, %v6498_v61 }
0x1315   :  { %v4663_v4 = vpack.c.bf16 %v4661_v7, %v4660_v17  ;;  %v5475_v17 = vld [vmem:[#allocation13 + $0x1] ss:$0 sm:$0xff] }
0x1317   :  { %6028 = vmatmul.mubr.msk.bf16.vlgmr.msra.gmra.mrb[44].mxu0 %vm280_vm0, %v4663_v4 }
0x13ea   :  { %v6029_v29 = vpop.f32.mrb[44].mxu0 }
0x13eb   :  { %v4745_v30 = vpop.f32.mrb[45].mxu0  ;;  %v4754_v25 = vadd.f32 %v6029_v29, %v5467_v28 }
0x13ec   :  { %v4746_v0 = vadd.f32 %v5467_v28, %v4745_v30  ;;  %v6030_v58 = vpop.f32.mrb[46].mxu0 }
0x13ed   :  { %v4748_v43 = vpop.f32.mrb[47].mxu0  ;;  %v4762_v50 = vadd.f32 %v4754_v25, %v8018_v14  ;;  %v4757_v12 = vadd.f32 %v6030_v58, %v5467_v28 }
0x13ee   :  { %v4760_v54 = vadd.f32 %v4746_v0, %v8008_v33  ;;  %v4749_v56 = vadd.f32 %v5467_v28, %v4748_v43 }
0x13ef   :  { %v4763_v41 = vadd.f32 %v4757_v12, %v8016_v57  ;;  %v4774_v24 = vsel %vm280_vm0, %v4762_v50, 0.0 }
0x13f0   :  { %v4761_v23 = vadd.f32 %v4749_v56, %v8010_v5  ;;  %v4768_v8 = vsel %vm280_vm0, %v4760_v54, 0.0 }
0x13f1   :  { %4769 = vadd.xlane.f32.xlu0 %v4768_v8  ;;  %v4777_v10 = vsel %vm280_vm0, %v4763_v41, 0.0  ;;  %v6549_v8 = vld [vmem:[%s8454_s15 + $0x48] sm:$0xff]  }
0x13f2   :  { %v4771_v42 = vsel %vm280_vm0, %v4761_v23, 0.0 }
0x13f3   :  { %4772 = vadd.xlane.f32.xlu1 %v4771_v42  ;;  %v6550_v42 = vld [vmem:[%s8454_s15 + $0x50] sm:$0xff]  }
0x13f5   :  { %4775 = vadd.xlane.f32.xlu0 %v4774_v24  ;;  %v6552_v24 = vld [vmem:[%s8454_s15 + $0x60] sm:$0xff]  }
0x13f9   :  { %4778 = vadd.xlane.f32.xlu0 %v4777_v10  ;;  %v6553_v10 = vld [vmem:[%s8454_s15 + $0x68] sm:$0xff]  }
0x147e   :  { %v4770_v33 = vpop.xlane.xlu0 %4769 }
0x147f   :  { %v4780_v9 = vmul.f32 0.015625, %v4770_v33  ;;  %v6554_v33 = vld [vmem:[%s8454_s15 + $0x70] sm:$0xff]  }
0x1480   :  { %v4773_v14 = vpop.xlane.xlu1 %4772 }
0x1481   :  { %v4784_v26 = vsub.f32 %v4760_v54, %v4780_v9  ;;  %v4781_v47 = vmul.f32 0.015625, %v4773_v14  ;;  %v6555_v9 = vld [vmem:[%s8454_s15 + $0x78] sm:$0xff]   ;;  %v5476_v14 = vld [vmem:[#allocation16 + $0x1] ss:$0 sm:$0xff] }
0x1482   :  { %v4776_v5 = vpop.xlane.xlu0 %4775 }
0x1483   :  { %v4785_v39 = vsub.f32 %v4761_v23, %v4781_v47  ;;  %v4782_v48 = vmul.f32 0.015625, %v4776_v5  ;;  %v4788_v52 = vmul.f32 %v4784_v26, %v4784_v26  ;;  %v6548_v23 = vld [vmem:[%s8454_s15 + $0x40] sm:$0xff]  }
0x1484   :  { %6043 = vmatprep.subr.bf16.mxu0 %v6548_v23 }
0x1485   :  { %v4786_v35 = vsub.f32 %v4762_v50, %v4782_v48  ;;  %v4792_v3 = vsel %vm280_vm0, %v4788_v52, 0.0  ;;  %v4789_v1 = vmul.f32 %v4785_v39, %v4785_v39  ;;  %6044 = vmatpush3.bf16.msra.mxu0 %v6548_v23 }
0x1486   :  { %4793 = vadd.xlane.f32.xlu1 %v4792_v3  ;;  %v4779_v57 = vpop.xlane.xlu0 %4778  ;;  %6045 = vmatprep.subr.bf16.mxu0 %v6549_v8 }
0x1487   :  { %v4783_v60 = vmul.f32 0.015625, %v4779_v57  ;;  %v4795_v22 = vsel %vm280_vm0, %v4789_v1, 0.0  ;;  %v4790_v44 = vmul.f32 %v4786_v35, %v4786_v35 }
0x1488   :  { %4796 = vadd.xlane.f32.xlu0 %v4795_v22 }
0x1489   :  { %v4787_v32 = vsub.f32 %v4763_v41, %v4783_v60  ;;  %v4798_v36 = vsel %vm280_vm0, %v4790_v44, 0.0  ;;  %6046 = vmatpush3.bf16.msra.mxu0 %v6549_v8  ;;  %v6551_v41 = vld [vmem:[%s8454_s15 + $0x58] sm:$0xff]   ;;  %s7120_s15 = smov [#allocation25]  }
0x148a   :  { %4799 = vadd.xlane.f32.xlu1 %v4798_v36  ;;  %6047 = vmatprep.subr.bf16.mxu0 %v6550_v42  ;;  %s5274_s12 = sshll.u32 %s7120_s15, 4  ;;  %s5275_s12 = int_to_ptr.vmem [resolvable:$true] %s5274_s12 }
0x148b   :  { %v4791_v18 = vmul.f32 %v4787_v32, %v4787_v32  ;;  %s7050_s26 = scalar_lea.vmem %s5275_s12, 32  ;;  %p7055_p1 = scmp.lt.s32.totalorder %s5275_s12, %s5275_s12 }
0x148c   :  { %p7051_p0 = scmp.ne.s32.totalorder %s5275_s12, %s7050_s26  ;;  %p7056_p2 = scmp.lt.s32.totalorder %s7050_s26, %s7050_s26 }
0x148d   :  { %v4801_v49 = vsel %vm280_vm0, %v4791_v18, 0.0  ;;  %6048 = vmatpush3.bf16.msra.mxu0 %v6550_v42 }
0x148e   :  { %4802 = vadd.xlane.f32.xlu0 %v4801_v49  ;;  %6049 = vmatprep.subr.bf16.mxu0 %v6551_v41  ;;  %p7057_p3 = por %p7056_p2, %p7055_p1 }
0x1490   :  { %p7058_p4 = pnand %p7057_p3, %p7051_p0 }
0x1491   :  { %6050 = vmatpush3.bf16.msra.mxu0 %v6551_v41 }
0x1492   :  { %6051 = vmatprep.subr.bf16.mxu0 %v6552_v24 }
0x1495   :  { %6052 = vmatpush3.bf16.msra.mxu0 %v6552_v24 }
0x1496   :  { %6053 = vmatprep.subr.bf16.mxu0 %v6553_v10 }
0x1499   :  { %6054 = vmatpush3.bf16.msra.mxu0 %v6553_v10 }
0x149a   :  { %6055 = vmatprep.subr.bf16.mxu0 %v6554_v33 }
0x149d   :  { %6056 = vmatpush3.bf16.msra.mxu0 %v6554_v33 }
0x149e   :  { %6057 = vmatprep.subr.bf16.mxu0 %v6555_v9 }
0x14a1   :  { %6058 = vmatpush3.bf16.msra.mxu0 %v6555_v9 }
0x1513   :  { %v4794_v51 = vpop.xlane.xlu1 %4793 }
0x1514   :  { %v4804_v45 = vmul.f32 0.015625, %v4794_v51 }
0x1515   :  { %v4797_v37 = vpop.xlane.xlu0 %4796 }
0x1516   :  { %v4808_v11 = vadd.f32 1e-07, %v4804_v45  ;;  %v4805_v20 = vmul.f32 0.015625, %v4797_v37 }
0x1517   :  { %v4800_v63 = vpop.xlane.xlu1 %4799 }
0x1518   :  { %6720 = vrsqrt.f32 %v4808_v11  ;;  %v4809_v59 = vadd.f32 1e-07, %v4805_v20  ;;  %v4806_v40 = vmul.f32 0.015625, %v4800_v63 }
0x151a   :  { %6722 = vrsqrt.f32 %v4809_v59  ;;  %v4810_v19 = vadd.f32 1e-07, %v4806_v40 }
0x151b   :  { %v4803_v13 = vpop.xlane.xlu0 %4802 }
0x151c   :  { %6724 = vrsqrt.f32 %v4810_v19  ;;  %v4807_v6 = vmul.f32 0.015625, %v4803_v13 }
0x151e   :  { %v4811_v15 = vadd.f32 1e-07, %v4807_v6 }
0x1520   :  { %6726 = vrsqrt.f32 %v4811_v15 }
0x1522   :  { %v6721_v2 = vpop.eup %6720 }
0x1523   :  { %v4816_v31 = vmul.f32 %v6721_v2, %v4784_v26 }
0x1524   :  { %v6723_v61 = vpop.eup %6722 }
0x1525   :  { %v4817_v62 = vmul.f32 %v6723_v61, %v4785_v39  ;;  %v4826_v34 = vmul.f32 %v5474_v38, %v4816_v31 }
0x1526   :  { %v6725_v7 = vpop.eup %6724 }
0x1527   :  { %v4818_v4 = vmul.f32 %v6725_v7, %v4786_v35  ;;  %v4827_v28 = vmul.f32 %v5474_v38, %v4817_v62  ;;  %v8380_v29 = vadd.f32 %v5475_v17, %v4826_v34 }
0x1529   :  { %v4837_v30 = vadd.f32 %v5475_v17, %v4827_v28  ;;  %v4828_v0 = vmul.f32 %v5474_v38, %v4818_v4 }
0x152a   :  { %v6727_v25 = vpop.eup %6726 }
0x152b   :  { %v4819_v58 = vmul.f32 %v6727_v25, %v4787_v32  ;;  %v4840_v43 = vpack.c.bf16 %v4837_v30, %v8380_v29  ;;  %v8384_v56 = vadd.f32 %v5475_v17, %v4828_v0 }
0x152d   :  { %v4829_v54 = vmul.f32 %v5474_v38, %v4819_v58  ;;  %6039 = vmatprep.mubr.msk.bf16.mxu1 %vm280_vm0, %v4840_v43  ;;  %v5499_v58 = vld [vmem:[#allocation17 + $0x1] ss:$0 sm:$0xff] }
0x152f   :  { %v4839_v50 = vadd.f32 %v5475_v17, %v4829_v54 }
0x1531   :  { %v4841_v12 = vpack.c.bf16 %v4839_v50, %v8384_v56 }
0x1533   :  { %6040 = vmatmul.mubr.msk.bf16.vlgmr.msra.gmra.mrb[56].mxu1 %vm280_vm0, %v4841_v12 }
0x1534   :  { %6071 = vmatprep.mubr.msk.bf16.mxu1 %vm7118_vm9, %v7113_v21 }
0x1606   :  { %v6041_v26 = vpop.f32.mrb[56].mxu1 }
0x1607   :  { %v4932_v47 = vadd.f32 %v6041_v26, %v5476_v14  ;;  %v4923_v5 = vpop.f32.mrb[57].mxu1 }
0x1608   :  { %v4924_v39 = vadd.f32 %v5476_v14, %v4923_v5  ;;  %v6042_v48 = vpop.f32.mrb[58].mxu1 }
0x1609   :  { %v4944_v52 = vmul.f32 0.044715, %v4932_v47  ;;  %v4935_v35 = vadd.f32 %v6042_v48, %v5476_v14  ;;  %v4926_v3 = vpop.f32.mrb[59].mxu1  ;;  %v4940_v38 = vmul.f32 0.5, %v4932_v47 }
0x160a   :  { %v4942_v1 = vmul.f32 0.044715, %v4924_v39  ;;  %v4927_v57 = vadd.f32 %v5476_v14, %v4926_v3  ;;  %v4938_v62 = vmul.f32 0.5, %v4924_v39  ;;  %v6558_v3 = vld [vmem:[#allocation22 + $0x10] sm:$0xff]  }
0x160b   :  { %v4948_v60 = vmul.f32 %v4944_v52, %v4932_v47  ;;  %v4945_v22 = vmul.f32 0.044715, %v4935_v35  ;;  %v4941_v31 = vmul.f32 0.5, %v4935_v35 }
0x160c   :  { %v4946_v44 = vmul.f32 %v4942_v1, %v4924_v39  ;;  %v4943_v32 = vmul.f32 0.044715, %v4927_v57  ;;  %v4939_v34 = vmul.f32 0.5, %v4927_v57  ;;  %v6559_v1 = vld [vmem:[#allocation22 + $0x18] sm:$0xff]  }
0x160d   :  { %v4952_v36 = vmul.f32 %v4948_v60, %v4932_v47  ;;  %v4949_v18 = vmul.f32 %v4945_v22, %v4935_v35 }
0x160e   :  { %v4950_v49 = vmul.f32 %v4946_v44, %v4924_v39  ;;  %v4947_v46 = vmul.f32 %v4943_v32, %v4927_v57 }
0x160f   :  { %v4956_v27 = vadd.f32 %v4952_v36, %v4932_v47  ;;  %v4953_v55 = vmul.f32 %v4949_v18, %v4935_v35 }
0x1610   :  { %v4951_v16 = vmul.f32 %v4947_v46, %v4927_v57  ;;  %v4954_v51 = vadd.f32 %v4950_v49, %v4924_v39  ;;  %v5508_v49 = vld [vmem:[#allocation19 + $0x1] ss:$0 sm:$0xff] }
0x1611   :  { %v4960_v45 = vmul.f32 0.7978846, %v4956_v27  ;;  %v4957_v37 = vadd.f32 %v4953_v55, %v4935_v35  ;;  %v6557_v35 = vld [vmem:[#allocation22 + $0x8] sm:$0xff]   ;;  %v5509_v55 = vld [vmem:[#allocation20 + $0x1] ss:$0 sm:$0xff] }
0x1612   :  { %v4955_v11 = vadd.f32 %v4951_v16, %v4927_v57  ;;  %v4958_v20 = vmul.f32 0.7978846, %v4954_v51 }
0x1613   :  { %6728 = vtanh.f32 %v4960_v45  ;;  %v4961_v63 = vmul.f32 0.7978846, %v4957_v37 }
0x1614   :  { %v4959_v59 = vmul.f32 0.7978846, %v4955_v11  ;;  %6730 = vtanh.f32 %v4958_v20 }
0x1615   :  { %6732 = vtanh.f32 %v4961_v63 }
0x1616   :  { %6734 = vtanh.f32 %v4959_v59  ;;  %v5510_v59 = vld [vmem:[#allocation23] ss:$0 sm:$0xff] }
0x161d   :  { %v6729_v40 = vpop.eup %6728 }
0x161e   :  { %v6731_v19 = vpop.eup %6730  ;;  %v4968_v13 = vadd.f32 1.0, %v6729_v40 }
0x161f   :  { %v6733_v6 = vpop.eup %6732  ;;  %v4966_v15 = vadd.f32 1.0, %v6731_v19 }
0x1620   :  { %v6735_v2 = vpop.eup %6734  ;;  %v4969_v61 = vadd.f32 1.0, %v6733_v6  ;;  %v4972_v17 = vmul.f32 %v4968_v13, %v4940_v38 }
0x1621   :  { %v4967_v7 = vadd.f32 1.0, %v6735_v2  ;;  %v4970_v28 = vmul.f32 %v4966_v15, %v4938_v62 }
0x1622   :  { %v4973_v4 = vmul.f32 %v4969_v61, %v4941_v31 }
0x1623   :  { %v4971_v30 = vmul.f32 %v4967_v7, %v4939_v34  ;;  %v7119_v34 = vmov 1966171168  }
0x1624   :  { %v4975_v25 = vpack.c.bf16 %v4973_v4, %v4972_v17  ;;  %v5243_v7 = vunpack.c.l.s4 %v7119_v34 }
0x1625   :  { %v4974_v0 = vpack.c.bf16 %v4971_v30, %v4970_v28 }
0x1626   :  { %v5244_v17 = vunpack.c.0.s8 %v5243_v7 }
0x1627   :  { %6059 = vmatprep.mubr.bf16.mxu0 %v4974_v0 }
0x1628   :  { %6060 = vmatmul.mubr.bf16.vlgmr.msra.gmra.mrb[48].mxu0 %v4975_v25  ;;  %v5247_v25 = vsub.s32 %v5244_v17, %v7557_v53 }
0x16fb   :  { %v6061_v43 = vpop.f32.mrb[48].mxu0 }
0x16fc   :  { %v5091_v54 = vadd.f32 %v6061_v43, %v5499_v58  ;;  %v5083_v50 = vpop.f32.mrb[49].mxu0 }
0x16fd   :  { %v5084_v12 = vadd.f32 %v5499_v58, %v5083_v50  ;;  %v6062_v23 = vpop.f32.mrb[50].mxu0 }
0x16fe   :  { %v5097_v8 = vadd.f32 %v5091_v54, %v8384_v56  ;;  %v5086_v42 = vpop.f32.mrb[51].mxu0 }
0x16ff   :  { %v5096_v41 = vadd.f32 %v5084_v12, %v8380_v29  ;;  %v6556_v29 = vld [vmem:[#allocation22] sm:$0xff]  }
0x1700   :  { %v5105_v24 = vsel %vm280_vm0, %v5097_v8, 0.0  ;;  %6064 = vmatpush3.bf16.msra.mxu1 %v6556_v29 }
0x1701   :  { %5106 = vadd.xlane.f32.xlu1 %v5105_v24  ;;  %v5102_v10 = vsel %vm280_vm0, %v5096_v41, 0.0  ;;  %6065 = vmatprep.subr.bf16.mxu1 %v7113_v21 }
0x1702   :  { %5103 = vadd.xlane.f32.xlu0 %v5102_v10 }
0x1704   :  { %6066 = vmatpush3.bf16.msra.mxu1 %v6557_v35 }
0x1705   :  { %6067 = vmatprep.subr.bf16.mxu1 %v7113_v21 }
0x1708   :  { %6068 = vmatpush3.bf16.msra.mxu1 %v6558_v3 }
0x1709   :  { %6069 = vmatprep.subr.bf16.mxu1 %v7113_v21 }
0x170c   :  { %6070 = vmatpush3.bf16.msra.mxu1 %v6559_v1 }
0x178e   :  { %v5107_v33 = vpop.xlane.xlu1 %5106 }
0x178f   :  { %v5109_v9 = vmul.f32 0.015625, %v5107_v33  ;;  %v5104_v14 = vpop.xlane.xlu0 %5103 }
0x1790   :  { %v5108_v26 = vmul.f32 0.015625, %v5104_v14 }
0x1791   :  { %v5111_v47 = vsub.f32 %v5097_v8, %v5109_v9 }
0x1792   :  { %v5110_v5 = vsub.f32 %v5096_v41, %v5108_v26 }
0x1793   :  { %v5113_v39 = vmul.f32 %v5111_v47, %v5111_v47 }
0x1794   :  { %v5112_v48 = vmul.f32 %v5110_v5, %v5110_v5 }
0x1795   :  { %v5117_v52 = vsel %vm280_vm0, %v5113_v39, 0.0 }
0x1796   :  { %5118 = vadd.xlane.f32.xlu1 %v5117_v52  ;;  %v5114_v56 = vsel %vm280_vm0, %v5112_v48, 0.0 }
0x1797   :  { %5115 = vadd.xlane.f32.xlu0 %v5114_v56 }
0x1823   :  { %v5119_v57 = vpop.xlane.xlu1 %5118 }
0x1824   :  { %v5121_v60 = vmul.f32 0.015625, %v5119_v57  ;;  %v5116_v22 = vpop.xlane.xlu0 %5115 }
0x1825   :  { %v5120_v44 = vmul.f32 0.015625, %v5116_v22 }
0x1826   :  { %v5123_v32 = vadd.f32 1e-07, %v5121_v60 }
0x1827   :  { %v5122_v36 = vadd.f32 1e-07, %v5120_v44 }
0x1828   :  { %6736 = vrsqrt.f32 %v5123_v32 }
0x1829   :  { %6738 = vrsqrt.f32 %v5122_v36 }
0x1832   :  { %v6737_v18 = vpop.eup %6736 }
0x1833   :  { %v6739_v46 = vpop.eup %6738  ;;  %v5127_v27 = vmul.f32 %v6737_v18, %v5111_v47 }
0x1834   :  { %v5126_v16 = vmul.f32 %v6739_v46, %v5110_v5 }
0x1835   :  { %v5135_v51 = vmul.f32 %v5508_v49, %v5127_v27 }
0x1836   :  { %v5134_v45 = vmul.f32 %v5508_v49, %v5126_v16 }
0x1837   :  { %v5143_v37 = vadd.f32 %v5509_v55, %v5135_v51 }
0x1838   :  { %v5142_v11 = vadd.f32 %v5509_v55, %v5134_v45 }
0x1839   :  { %v5145_v21 = vrot.slane %v5143_v37, 7 }
0x183b   :  { %v5148_v20 = vsel %vm5147_vm10, %v5142_v11, %v5145_v21 }
0x183c   :  { %v5149_v63 = vpack.c.bf16 %v5148_v20, %v5148_v20 }
0x183e   :  { %6072 = vmatmul.mubr.msk.bf16.vlgmr.msra.gmra.mrb[60].mxu1 %vm280_vm0, %v5149_v63 }
0x1911   :  { %v5226_v40 = vpop.f32.mrb[60].mxu1 }
0x1912   :  { %v5227_v19 = vadd.f32 %v5510_v59, %v5226_v40  ;;  %v6073_v13 = vpop.f32.mrb[61].mxu1 }
0x1913   :  { %v5229_v6 = vpop.f32.mrb[62].mxu1 }
0x1914   :  { %v5233_v15 = vmul.f32 0.044715, %v5227_v19  ;;  %v6074_v2 = vpop.f32.mrb[63].mxu1  ;;  %v5232_v28 = vmul.f32 0.5, %v5227_v19 }
0x1916   :  { %v5234_v38 = vmul.f32 %v5233_v15, %v5227_v19 }
0x1918   :  { %v5235_v31 = vmul.f32 %v5234_v38, %v5227_v19 }
0x191a   :  { %v5236_v61 = vadd.f32 %v5235_v31, %v5227_v19 }
0x191c   :  { %v5237_v62 = vmul.f32 0.7978846, %v5236_v61 }
0x191e   :  { %6740 = vtanh.f32 %v5237_v62 }
0x1928   :  { %v6741_v4 = vpop.eup %6740 }
0x1929   :  { %v5239_v30 = vadd.f32 1.0, %v6741_v4 }
0x192b   :  { %v5240_v0 = vmul.f32 %v5239_v30, %v5232_v28 }
0x192d   :  { %v5248_v58 = vrot.slane %v5240_v0, %v5247_v25 }
0x192f   :  { %v5249_v43 = vcombine.high %v5248_v58, %v5248_v58  ;;  %v5256_v54 = vrot.slane %v5248_v58, %v5247_v25 }
0x1931   :  { %v5263_v50 = vrot.slane %v5249_v43, %v5247_v25  ;;  %5267 = vst.msk [vmem:[#allocation25] sm:$0x1] %vm5266_vm11, %v5256_v54 }
0x1933   :  { %5268 = vst.msk [vmem:[#allocation25 + $0x1] sm:$0x1] %vm5266_vm11, %v5263_v50 }
0x1934   :  { %7061 = shalt.err (!%p7058_p4)
}
0x1935   :  { %s8486_s7 = sld [smem:[#allocation41_spill]] }
0x193b   :  { %s7062_s11 = scalar_lea.hbm %s8486_s7, 32 }
0x193c   :  { %p7063_p5 = scmp.ne.s32.totalorder %s8486_s7, %s7062_s11  ;;  %p7066_p6 = scmp.lt.u32.totalorder %s7062_s11, %s8486_s7 }
0x193e   :  { %p7068_p7 = pnand %p7066_p6, %p7063_p5 }
0x1940   :  { %7071 = shalt.err (!%p7068_p7)
}
0x1941   :  { %5280 = dma.vmem_to_hbm [thread:$0]  %s5275_s12, 32, %s8486_s7, [#allocation4], %s7096_s27, %s7096_s27, %s7097_s29  }
0x1942   :  { %7088 = dma.done.wait [#allocation4], 32  }
0x1943   :  { %7089 = vsyncadd [#allocation4], 4294967264 }
0x1944   :  { %5284 = vsyncpa [#allocation3], 1 }
0x1945   :  { %5285 = vsyncpa [#allocation6], 1 }
0x1946   :  { %5286 = vsyncpa [#allocation9], 1 }
0x1947   :  { %5287 = vsyncpa [#allocation12], 1 }
0x1948   :  { %5288 = vsyncpa [#allocation15], 1 }
0x1949   :  { %5289 = vsyncpa [#allocation18], 1 }
0x194a   :  { %5290 = vsyncpa [#allocation21], 1 }
0x194b   :  { %5291 = vsyncpa [#allocation24], 1 }
0x194c   :  { %5292 = vsyncpa [#allocation4], 1 }

</bundles_post_ra>
